<compile_context>
chip_gen: v7x
topology: tpu7x:2x2x1
jax: 0.10.0
libtpu: 0.0.40
codegen_flags: <defaults>
</compile_context>

<pallas_src>
import math
from functools import partial

import jax
import jax.numpy as jnp
from jax.experimental import pallas as pl
from jax.experimental.pallas import tpu as pltpu


def _round_up(v, m):
    return ((v + m - 1) // m) * m


def _bounded_sin(z):
    """sin(z) for moderately bounded phases (tens-to-hundreds of radians).

    Single Cody-Waite reduction by pi (k = round(z/pi), r = z - k*pi with a
    split-pi constant) then a degree-9 odd polynomial on [-pi/2, pi/2] and a
    (-1)^k sign.  Cheaper on the saturated VALU slot than jnp.sin's generic
    lowering; abs error ~6e-6, well inside the 1e-4 tolerance.
    """
    inv_pi = 0.3183098861837907
    pi_hi = 3.140625                 # exact in 12 bits -> k*pi_hi exact
    pi_lo = 9.67653589793e-4         # pi - pi_hi
    k = jnp.round(z * inv_pi)
    r = (z - k * pi_hi) - k * pi_lo  # r in [-pi/2, pi/2]
    r2 = r * r
    p = -1.98412698e-4 + r2 * 2.75573192e-6
    p = 8.33333333e-3 + r2 * p
    p = -1.66666667e-1 + r2 * p
    s = r + r * (r2 * p)             # sin(r)
    parity = k - 2.0 * jnp.floor(k * 0.5)   # 0.0 or 1.0
    return (1.0 - 2.0 * parity) * s         # sin(z) = (-1)^k * sin(r)


def fourier_layer_kernel(x_ref, w_ref, b_ref, o_ref, *, fast_sin):
    """o = sin(x @ W + b) for one [tm, tn] output tile."""
    x = x_ref[...].astype(jnp.float32)      # [tm, in_features]
    w = w_ref[...].astype(jnp.float32)      # [in_features, tn]
    b = b_ref[...].astype(jnp.float32)      # [1, tn]  (sublane broadcast)
    in_features = w.shape[0]
    if in_features <= 4:
        # Tiny contraction over coordinates: broadcast FMAs on the VPU,
        # bias folded into the accumulator init (one fewer full-tile add).
        z = b + x[:, 0:1] * w[0:1, :]
        for i in range(1, in_features):
            z = z + x[:, i:i + 1] * w[i:i + 1, :]
    else:
        # MXU fallback if the coordinate count ever grows.
        z = b + jnp.dot(x, w, preferred_element_type=jnp.float32)
    s = _bounded_sin(z) if fast_sin else jnp.sin(z)
    o_ref[...] = s.astype(o_ref.dtype)


def fourier_layer_forward(x, w, b, *, tm=None, tn=None, out_dtype=None,
                          fast_sin=True):
    """x: [N, in_features] f32; w: [in_features, out_features]; b: [1, out_features]."""
    N, in_features = x.shape
    out_features = w.shape[1]
    out_dtype = x.dtype if out_dtype is None else out_dtype

    if tn is None:
        # Keep the full feature axis resident while modest; tile wide layers so
        # [tm, tn] double-buffers stay well inside v7x's scoped-VMEM default.
        tn = out_features if out_features <= 1024 else 512
    if tm is None:
        # >= 2 grid steps (both v7x TCs fed, pipeline has overlap) while
        # growing the row tile up to 2048 to amortize per-step overhead.
        tm = min(2048, max(8, _round_up(pl.cdiv(N, 2), 8)))

    grid = (pl.cdiv(N, tm), pl.cdiv(out_features, tn))  # ragged tiles masked

    cost = pl.CostEstimate(
        flops=2 * N * in_features * out_features,
        transcendentals=N * out_features,
        bytes_accessed=(4 * (N * in_features
                             + in_features * out_features
                             + out_features)
                        + N * out_features * jnp.dtype(out_dtype).itemsize),
    )

    return pl.pallas_call(
        partial(fourier_layer_kernel, fast_sin=fast_sin),
        out_shape=jax.ShapeDtypeStruct((N, out_features), out_dtype),
        grid_spec=pltpu.PrefetchScalarGridSpec(
            num_scalar_prefetch=0,
            grid=grid,
            in_specs=[
                pl.BlockSpec((tm, in_features), lambda i, j: (i, 0)),
                # Weights / bias: KB-scale, constant along the row axis, so
                # they stay resident and are only re-fetched when j changes.
                pl.BlockSpec((in_features, tn), lambda i, j: (0, j)),
                pl.BlockSpec((1, tn), lambda i, j: (0, j)),
            ],
            out_specs=pl.BlockSpec((tm, tn), lambda i, j: (i, j)),
        ),
        compiler_params=pltpu.CompilerParams(
            dimension_semantics=("parallel", "parallel")),
        cost_estimate=cost,
    )(x, w, b)


def init_fourier_layer_params(key, in_features, out_features, weight_scale,
                              quantization_interval=2.0 * math.pi):
    """Mirrors FourierLayer.__init__: quantized integer-grid frequencies
    (frozen) and bias ~ U(-pi, pi). Returns (W [in, out], b [1, out])."""
    r = 2.0 * weight_scale[0] / quantization_interval
    assert math.isclose(r, round(r)), \
        'weight_scale should be divisible by quantization interval'
    key_b, *key_w = jax.random.split(key, in_features + 1)
    rows = []
    for i in range(in_features):
        n_levels = int(2 * weight_scale[i] / quantization_interval) + 1
        ints = jax.random.randint(key_w[i], (out_features,), 0, n_levels)
        rows.append(ints.astype(jnp.float32) * quantization_interval
                    - weight_scale[i])
    # Stored as [in_features, out_features] == torch weight.T (frozen in torch).
    w = jnp.stack(rows, axis=0)
    b = jax.random.uniform(key_b, (1, out_features), jnp.float32,
                           minval=-math.pi, maxval=math.pi)
    return w, b


def fourier_layer_reference(x, w, b):
    return jnp.sin(jnp.dot(x, w) + b)


if __name__ == "__main__":
    # Small-but-realistic BACON FourierLayer: 2-D coords -> 256 Fourier features.
    # N is intentionally NOT a multiple of the row tile: the overhanging rows of
    # the last block are computed on undefined data but their stores are masked.
    in_features, out_features = 2, 256
    N = 1000                                          # coordinate samples
    weight_scale = [8.0 * math.pi, 8.0 * math.pi]     # divisible by 2*pi

    key = jax.random.PRNGKey(0)
    key, kx = jax.random.split(key)
    coords = jax.random.uniform(kx, (N, in_features), jnp.float32,
                                minval=-1.0, maxval=1.0)
    w, b = init_fourier_layer_params(key, in_features, out_features,
                                     weight_scale)

    out = jax.block_until_ready(fourier_layer_forward(coords, w, b))

    ref = fourier_layer_reference(coords, w, b)
    assert out.shape == (N, out_features)
    assert jnp.allclose(out, ref, atol=1e-4, rtol=1e-4), "mismatch vs JAX reference"

    print("KERNEL_OK")
</pallas_src>

<mosaic_0001>
module attributes {stable_mosaic.version = 11 : i64} {
  func.func @fourier_layer_kernel(%arg0: i32, %arg1: i32, %arg2: memref<504x2xf32, #tpu.memory_space<vmem>>, %arg3: memref<2x256xf32, #tpu.memory_space<vmem>>, %arg4: memref<1x256xf32, #tpu.memory_space<vmem>>, %arg5: memref<504x256xf32, #tpu.memory_space<vmem>>) attributes {dimension_semantics = [#tpu.dimension_semantics<parallel>, #tpu.dimension_semantics<parallel>], iteration_bounds = array<i64: 2, 1>, scalar_prefetch = 0 : i64, scratch_operands = 0 : i64, tpu.core_type = #tpu.core_type<tc>, window_params = [{transform_indices = @transform_0, window_bounds = array<i64: 504, 2>}, {transform_indices = @transform_1, window_bounds = array<i64: 2, 256>}, {transform_indices = @transform_2, window_bounds = array<i64: 1, 256>}, {transform_indices = @transform_3, window_bounds = array<i64: 504, 256>}]} {
    %c0 = arith.constant 0 : index
    %c0_0 = arith.constant 0 : index
    %0 = vector.load %arg2[%c0, %c0_0] : memref<504x2xf32, #tpu.memory_space<vmem>>, vector<504x2xf32>
    %c0_1 = arith.constant 0 : index
    %c0_2 = arith.constant 0 : index
    %1 = vector.load %arg3[%c0_1, %c0_2] : memref<2x256xf32, #tpu.memory_space<vmem>>, vector<2x256xf32>
    %c0_3 = arith.constant 0 : index
    %c0_4 = arith.constant 0 : index
    %2 = vector.load %arg4[%c0_3, %c0_4] : memref<1x256xf32, #tpu.memory_space<vmem>>, vector<1x256xf32>
    %3 = vector.extract_strided_slice %0 {offsets = [0, 0], sizes = [504, 1], strides = [1, 1]} : vector<504x2xf32> to vector<504x1xf32>
    %4 = vector.extract_strided_slice %1 {offsets = [0, 0], sizes = [1, 256], strides = [1, 1]} : vector<2x256xf32> to vector<1x256xf32>
    %5 = vector.broadcast %3 : vector<504x1xf32> to vector<504x256xf32>
    %6 = vector.broadcast %4 : vector<1x256xf32> to vector<504x256xf32>
    %7 = arith.mulf %5, %6 : vector<504x256xf32>
    %8 = vector.broadcast %2 : vector<1x256xf32> to vector<504x256xf32>
    %9 = arith.addf %8, %7 : vector<504x256xf32>
    %10 = vector.extract_strided_slice %0 {offsets = [0, 1], sizes = [504, 1], strides = [1, 1]} : vector<504x2xf32> to vector<504x1xf32>
    %11 = vector.extract_strided_slice %1 {offsets = [1, 0], sizes = [1, 256], strides = [1, 1]} : vector<2x256xf32> to vector<1x256xf32>
    %12 = vector.broadcast %10 : vector<504x1xf32> to vector<504x256xf32>
    %13 = vector.broadcast %11 : vector<1x256xf32> to vector<504x256xf32>
    %14 = arith.mulf %12, %13 : vector<504x256xf32>
    %15 = arith.addf %9, %14 : vector<504x256xf32>
    %cst = arith.constant 0.318309873 : f32
    %16 = vector.broadcast %cst : f32 to vector<504x256xf32>
    %17 = arith.mulf %15, %16 : vector<504x256xf32>
    %18 = math.roundeven %17 : vector<504x256xf32>
    %cst_5 = arith.constant 3.140625 : f32
    %19 = vector.broadcast %cst_5 : f32 to vector<504x256xf32>
    %20 = arith.mulf %18, %19 : vector<504x256xf32>
    %21 = arith.subf %15, %20 : vector<504x256xf32>
    %cst_6 = arith.constant 9.67653584E-4 : f32
    %22 = vector.broadcast %cst_6 : f32 to vector<504x256xf32>
    %23 = arith.mulf %18, %22 : vector<504x256xf32>
    %24 = arith.subf %21, %23 : vector<504x256xf32>
    %25 = arith.mulf %24, %24 : vector<504x256xf32>
    %cst_7 = arith.constant 2.75573188E-6 : f32
    %26 = vector.broadcast %cst_7 : f32 to vector<504x256xf32>
    %27 = arith.mulf %25, %26 : vector<504x256xf32>
    %cst_8 = arith.constant -1.98412701E-4 : f32
    %28 = vector.broadcast %cst_8 : f32 to vector<504x256xf32>
    %29 = arith.addf %28, %27 : vector<504x256xf32>
    %30 = arith.mulf %25, %29 : vector<504x256xf32>
    %cst_9 = arith.constant 0.00833333377 : f32
    %31 = vector.broadcast %cst_9 : f32 to vector<504x256xf32>
    %32 = arith.addf %31, %30 : vector<504x256xf32>
    %33 = arith.mulf %25, %32 : vector<504x256xf32>
    %cst_10 = arith.constant -0.166666672 : f32
    %34 = vector.broadcast %cst_10 : f32 to vector<504x256xf32>
    %35 = arith.addf %34, %33 : vector<504x256xf32>
    %36 = arith.mulf %25, %35 : vector<504x256xf32>
    %37 = arith.mulf %24, %36 : vector<504x256xf32>
    %38 = arith.addf %24, %37 : vector<504x256xf32>
    %cst_11 = arith.constant 5.000000e-01 : f32
    %39 = vector.broadcast %cst_11 : f32 to vector<504x256xf32>
    %40 = arith.mulf %18, %39 : vector<504x256xf32>
    %41 = math.floor %40 : vector<504x256xf32>
    %cst_12 = arith.constant 2.000000e+00 : f32
    %42 = vector.broadcast %cst_12 : f32 to vector<504x256xf32>
    %43 = arith.mulf %42, %41 : vector<504x256xf32>
    %44 = arith.subf %18, %43 : vector<504x256xf32>
    %cst_13 = arith.constant 2.000000e+00 : f32
    %45 = vector.broadcast %cst_13 : f32 to vector<504x256xf32>
    %46 = arith.mulf %45, %44 : vector<504x256xf32>
    %cst_14 = arith.constant 1.000000e+00 : f32
    %47 = vector.broadcast %cst_14 : f32 to vector<504x256xf32>
    %48 = arith.subf %47, %46 : vector<504x256xf32>
    %49 = arith.mulf %48, %38 : vector<504x256xf32>
    %c0_15 = arith.constant 0 : index
    %c0_16 = arith.constant 0 : index
    %50 = vector.load %arg5[%c0_15, %c0_16] : memref<504x256xf32, #tpu.memory_space<vmem>>, vector<504x256xf32>
    tpu.vector_store %arg5[%c0_15, %c0_16], %49 {strides = array<i32>} : memref<504x256xf32, #tpu.memory_space<vmem>>, vector<504x256xf32>,
    return
  }
  func.func @transform_0(%arg0: i32, %arg1: i32) -> (i32, i32) {
    %c0_i32 = arith.constant 0 : i32
    %c0_i32_0 = arith.constant 0 : i32
    return %arg0, %c0_i32 : i32, i32
  }
  func.func @transform_1(%arg0: i32, %arg1: i32) -> (i32, i32) {
    %c0_i32 = arith.constant 0 : i32
    %c0_i32_0 = arith.constant 0 : i32
    return %c0_i32, %arg1 : i32, i32
  }
  func.func @transform_2(%arg0: i32, %arg1: i32) -> (i32, i32) {
    %c0_i32 = arith.constant 0 : i32
    %c0_i32_0 = arith.constant 0 : i32
    return %c0_i32, %arg1 : i32, i32
  }
  func.func @transform_3(%arg0: i32, %arg1: i32) -> (i32, i32) {
    %c0_i32 = arith.constant 0 : i32
    return %arg0, %arg1 : i32, i32
  }
}

</mosaic_0001>

<bundles_post_ra>
// kernel: tpu_custom_call.1
= control target key start
LH: loop header
LB: loop body
LE: loop exit
PB: predicated region body
PF: predicated region fallthrough
CT: control target
= control target key end

     0   :  { %8 = vsyncpa [#allocation3], 0  ;;  %s7965_s0 = inlined_call_operand.vmem [shape: f32[1000,2], index: 0, kind: input, shape index: {}]   ;;  %s7966_s1 = inlined_call_operand.vmem [shape: f32[2,256], index: 1, kind: input, shape index: {}]   ;;  %s7967_s2 = inlined_call_operand.vmem [shape: f32[1,256], index: 2, kind: input, shape index: {}]   ;;  %s7968_s3 = inlined_call_operand.hbm [shape: f32[1000,256], index: 3, kind: output, shape index: {}]  }
   0x1   :  { %10 = vsyncpa [#allocation3 + $0x1], 0  ;;  %s4900_s12 = smov 0   ;;  %s4902_s13 = smov 0  }
   0x2   :  { %s4904_s14 = smov 0   ;;  %s4906_s15 = smov 0  }
   0x3   :  { %s4908_s16 = smov 0   ;;  %s4910_s17 = smov 0  }
   0x4 LB: > { %s4585_s18 = sadd.s32 4294967295, %s4873_s17   ;;  %s4586_s19 = sadd.s32 4294967294, %s4873_s17   ;;  %s4873_s17 = sphi %s4910_s17, %s16_s17   ;;  %s4869_s16 = sphi %s4908_s16, %s8232_s16   ;;  %s4865_s15 = sphi %s4906_s15, %s8231_s15   ;;  %s4861_s14 = sphi %s4904_s14, %s8230_s14   ;;  %s4857_s13 = sphi %s4902_s13, %s8229_s13   ;;  %s4853_s12 = sphi %s4900_s12, %s8228_s12  }
   0x5   : > { %s28_s20 = sadd.s32 1, %s4869_s16  ;;  %s115_s21 = sadd.s32 1, %s4861_s14 }
   0x6   : > { %p30_p0 = scmp.ge.s32.totalorder %s28_s20, 2  ;;  %p125_p1 = scmp.ne.s32.totalorder %s4861_s14, %s4857_s13 }
   0x7   : > { %p126_p2 = scmp.eq.s32.totalorder %s4585_s18, 1  ;;  %p131_p3 = scmp.ne.s32.totalorder %s4857_s13, %s4853_s12 }
   0x8   : > { %s8234_s20 = smov (%p30_p0, %s28_s20), 0  ;;  %p132_p5 = scmp.eq.s32.totalorder %s4586_s19, 1 }
   0x9   : > { %p4940_p4 = por %p126_p2, %p125_p1  ;;  %s110_s23 = ssub.s32 %s4869_s16, %s8234_s20 }
   0xa   : > { %p4591_p6 = scmp.ge.s32.totalorder %s4873_s17, 1  ;;  %p113_p7 = scmp.eq.s32.totalorder %s110_s23, 0 }
   0xb   : > { %p4947_p8 = por %p132_p5, %p131_p3  ;;  %p184_p9 = scmp.lt.s32.totalorder %s4873_s17, 3 }
   0xc   : > { %s4953_s25 = scalar_select %p113_p7, %s4861_s14, %s115_s21  }
   0xd   : > { %p185_p10 = pnand %p4591_p6, %p184_p9 }
   0xf   : > { %188 = sbr.rel (%p185_p10) target bundleno = 1123 (0x463), region = 32 }
  0x16   : > { %s4956_s26 = smul.u32 63, %s4865_s15  ;;  %v4875_v0 = vmov 0   ;;  %s218_s9 = sand.u32 1, %s4857_s13  }
  0x17   : > { %4792 = vset.pattern.permute.xlu1 %v4875_v0  ;;  %4791 = vset.pattern.permute.xlu0 %v4875_v0  ;;  %v4876_v0 = vmov 1   ;;  %s4606_s10 = smul.u32 1008, %s218_s9  ;;  %s7899_s18 = scalar_lea.sflag [#allocation3], %s218_s9 }
  0x18   : > { %p226_p11 = scmp.lt.s32.totalorder %s4956_s26, 124  ;;  %s4471_s19 = ssub.s32 (%p4940_p4), 125, %s4956_s26 }
  0x19   : > { %s6097_s11 = scalar_lea.vmem [#allocation2], %s4606_s10  ;;  %p4472_p12 = scmp.lt.s32.totalorder (%p4940_p4), %s4471_s19, 63 }
  0x1a   : > { %s227_s27 = scalar_select %p226_p11, %s4956_s26, 124 }
  0x1c   : > { %s4592_s28 = sshll.u32 %s227_s27, 3 }
  0x1d   : > { %s4963_s4 = scalar_lea.vmem %s7965_s0, %s4592_s28 }
  0x1e   : > { %v4966_v1 = vld [vmem:[%s4963_s4 + $0x10] sm:$0xff]  ;;  %v4969_v2 = vld [vmem:[%s4963_s4] sm:$0xff]  ;;  %v4974_v3 = vld [vmem:[%s4963_s4 + $0x18] sm:$0xff] }
  0x1f   : > { %330 = vperm.xlu1 %4792, %v4966_v1   ;;  %320 = vperm.xlu0 %4791, %v4969_v2   ;;  %v4977_v4 = vld [vmem:[%s4963_s4 + $0x8] sm:$0xff]  ;;  %v4985_v6 = vld [vmem:[%s4963_s4 + $0x20] sm:$0xff]  ;;  %v4990_v7 = vld [vmem:[%s4963_s4 + $0x38] sm:$0xff] }
  0x20   : > { %v4982_v5 = vld [vmem:[%s4963_s4 + $0x28] sm:$0xff]  ;;  %v4993_v8 = vld [vmem:[%s4963_s4 + $0x30] sm:$0xff]  ;;  %v5001_v10 = vld [vmem:[%s4963_s4 + $0x40] sm:$0xff] }
  0x21   : > { %v4998_v9 = vld [vmem:[%s4963_s4 + $0x48] sm:$0xff]  ;;  %v5006_v11 = vld [vmem:[%s4963_s4 + $0x58] sm:$0xff]  ;;  %v5009_v12 = vld [vmem:[%s4963_s4 + $0x50] sm:$0xff] }
  0x22   : > { %v5014_v13 = vld [vmem:[%s4963_s4 + $0x68] sm:$0xff]  ;;  %v5017_v14 = vld [vmem:[%s4963_s4 + $0x60] sm:$0xff]  ;;  %v5022_v15 = vld [vmem:[%s4963_s4 + $0x78] sm:$0xff] }
  0x23   : > { %335 = vperm.xlu1 %4792, %v4974_v3   ;;  %325 = vperm.xlu0 %4791, %v4977_v4   ;;  %v5025_v16 = vld [vmem:[%s4963_s4 + $0x70] sm:$0xff]  ;;  %v5030_v17 = vld [vmem:[%s4963_s4 + $0x88] sm:$0xff]  ;;  %v5033_v18 = vld [vmem:[%s4963_s4 + $0x80] sm:$0xff] }
  0x24   : > { %v5038_v19 = vld [vmem:[%s4963_s4 + $0x98] sm:$0xff]  ;;  %v5041_v20 = vld [vmem:[%s4963_s4 + $0x90] sm:$0xff]  ;;  %v5046_v21 = vld [vmem:[%s4963_s4 + $0xa8] sm:$0xff] }
  0x25   : > { %v5049_v22 = vld [vmem:[%s4963_s4 + $0xa0] sm:$0xff]  ;;  %v5054_v23 = vld [vmem:[%s4963_s4 + $0xb8] sm:$0xff]  ;;  %v5057_v24 = vld [vmem:[%s4963_s4 + $0xb0] sm:$0xff] }
  0x26   : > { %v5062_v25 = vld [vmem:[%s4963_s4 + $0xc8] sm:$0xff]  ;;  %v5065_v26 = vld [vmem:[%s4963_s4 + $0xc0] sm:$0xff]  ;;  %v5070_v27 = vld [vmem:[%s4963_s4 + $0xd8] sm:$0xff] }
  0x27   : > { %345 = vperm.xlu1 %4792, %v4982_v5   ;;  %340 = vperm.xlu0 %4791, %v4985_v6   ;;  %v5073_v28 = vld [vmem:[%s4963_s4 + $0xd0] sm:$0xff]  ;;  %v5078_v29 = vld [vmem:[%s4963_s4 + $0xe8] sm:$0xff]  ;;  %v5081_v30 = vld [vmem:[%s4963_s4 + $0xe0] sm:$0xff] }
  0x28   : > { %v5086_v31 = vld [vmem:[%s4963_s4 + $0xf8] sm:$0xff]  ;;  %v5089_v32 = vld [vmem:[%s4963_s4 + $0xf0] sm:$0xff]  ;;  %v5094_v33 = vld [vmem:[%s4963_s4 + $0x108] sm:$0xff] }
  0x29   : > { %v5097_v34 = vld [vmem:[%s4963_s4 + $0x100] sm:$0xff]  ;;  %v5102_v35 = vld [vmem:[%s4963_s4 + $0x118] sm:$0xff]  ;;  %v5105_v36 = vld [vmem:[%s4963_s4 + $0x110] sm:$0xff] }
  0x2a   : > { %v5110_v37 = vld [vmem:[%s4963_s4 + $0x128] sm:$0xff]  ;;  %v5113_v38 = vld [vmem:[%s4963_s4 + $0x120] sm:$0xff]  ;;  %v5118_v39 = vld [vmem:[%s4963_s4 + $0x138] sm:$0xff] }
  0x2b   : > { %355 = vperm.xlu1 %4792, %v4990_v7   ;;  %350 = vperm.xlu0 %4791, %v4993_v8   ;;  %v5121_v40 = vld [vmem:[%s4963_s4 + $0x130] sm:$0xff]  ;;  %v5126_v41 = vld [vmem:[%s4963_s4 + $0x148] sm:$0xff]  ;;  %v5129_v42 = vld [vmem:[%s4963_s4 + $0x140] sm:$0xff] }
  0x2c   : > { %v5134_v43 = vld [vmem:[%s4963_s4 + $0x158] sm:$0xff]  ;;  %v5137_v44 = vld [vmem:[%s4963_s4 + $0x150] sm:$0xff]  ;;  %v5142_v45 = vld [vmem:[%s4963_s4 + $0x168] sm:$0xff] }
  0x2d   : > { %v5145_v46 = vld [vmem:[%s4963_s4 + $0x160] sm:$0xff]  ;;  %v5150_v47 = vld [vmem:[%s4963_s4 + $0x178] sm:$0xff]  ;;  %v5153_v48 = vld [vmem:[%s4963_s4 + $0x170] sm:$0xff] }
  0x2e   : > { %v5158_v49 = vld [vmem:[%s4963_s4 + $0x188] sm:$0xff]  ;;  %v5161_v50 = vld [vmem:[%s4963_s4 + $0x180] sm:$0xff]  ;;  %v5166_v51 = vld [vmem:[%s4963_s4 + $0x198] sm:$0xff] }
  0x2f   : > { %365 = vperm.xlu1 %4792, %v4998_v9   ;;  %360 = vperm.xlu0 %4791, %v5001_v10   ;;  %7988 = vst [vmem:[#allocation5_spill] sm:$0xff] %v5158_v49  ;;  %7989 = vst [vmem:[#allocation6_spill] sm:$0xff] %v5161_v50  ;;  %v5169_v52 = vld [vmem:[%s4963_s4 + $0x190] sm:$0xff]  ;;  %v5174_v53 = vld [vmem:[%s4963_s4 + $0x1a8] sm:$0xff] }
  0x30   : > { %7990 = vst [vmem:[#allocation7_spill] sm:$0xff] %v5166_v51  ;;  %7991 = vst [vmem:[#allocation8_spill] sm:$0xff] %v5169_v52  ;;  %v5177_v54 = vld [vmem:[%s4963_s4 + $0x1a0] sm:$0xff]  ;;  %v5182_v55 = vld [vmem:[%s4963_s4 + $0x1b8] sm:$0xff] }
  0x31   : > { %7992 = vst [vmem:[#allocation9_spill] sm:$0xff] %v5174_v53  ;;  %7993 = vst [vmem:[#allocation10_spill] sm:$0xff] %v5177_v54  ;;  %v5185_v56 = vld [vmem:[%s4963_s4 + $0x1b0] sm:$0xff]  ;;  %v5190_v57 = vld [vmem:[%s4963_s4 + $0x1c8] sm:$0xff] }
  0x32   : > { %7994 = vst [vmem:[#allocation11_spill] sm:$0xff] %v5182_v55  ;;  %7995 = vst [vmem:[#allocation12_spill] sm:$0xff] %v5185_v56  ;;  %v5193_v58 = vld [vmem:[%s4963_s4 + $0x1c0] sm:$0xff]  ;;  %v5198_v59 = vld [vmem:[%s4963_s4 + $0x1d8] sm:$0xff] }
  0x33   : > { %375 = vperm.xlu1 %4792, %v5006_v11   ;;  %370 = vperm.xlu0 %4791, %v5009_v12   ;;  %7996 = vst [vmem:[#allocation13_spill] sm:$0xff] %v5190_v57  ;;  %7997 = vst [vmem:[#allocation14_spill] sm:$0xff] %v5193_v58  ;;  %v5201_v60 = vld [vmem:[%s4963_s4 + $0x1d0] sm:$0xff]  ;;  %v5206_v61 = vld [vmem:[%s4963_s4 + $0x1e8] sm:$0xff] }
  0x34   : > { %7998 = vst [vmem:[#allocation15_spill] sm:$0xff] %v5198_v59  ;;  %7999 = vst [vmem:[#allocation16_spill] sm:$0xff] %v5201_v60  ;;  %v5209_v62 = vld [vmem:[%s4963_s4 + $0x1e0] sm:$0xff]  ;;  %v5214_v63 = vld [vmem:[%s4963_s4 + $0x1f0] sm:$0xff] }
  0x35   : > { %8000 = vst [vmem:[#allocation17_spill] sm:$0xff] %v5206_v61  ;;  %8001 = vst [vmem:[#allocation18_spill] sm:$0xff] %v5209_v62 }
  0x36   : > { %8002 = vst [vmem:[#allocation19_spill] sm:$0xff] %v5214_v63 }
  0x37   : > { %385 = vperm.xlu1 %4792, %v5014_v13   ;;  %380 = vperm.xlu0 %4791, %v5017_v14  }
  0x3b   : > { %395 = vperm.xlu1 %4792, %v5022_v15   ;;  %390 = vperm.xlu0 %4791, %v5025_v16  }
  0x3f   : > { %405 = vperm.xlu1 %4792, %v5030_v17   ;;  %400 = vperm.xlu0 %4791, %v5033_v18  }
  0x43   : > { %415 = vperm.xlu1 %4792, %v5038_v19   ;;  %410 = vperm.xlu0 %4791, %v5041_v20  }
  0x47   : > { %425 = vperm.xlu1 %4792, %v5046_v21   ;;  %420 = vperm.xlu0 %4791, %v5049_v22  }
  0x4b   : > { %435 = vperm.xlu1 %4792, %v5054_v23   ;;  %430 = vperm.xlu0 %4791, %v5057_v24  }
  0x4f   : > { %445 = vperm.xlu1 %4792, %v5062_v25   ;;  %440 = vperm.xlu0 %4791, %v5065_v26  }
  0x53   : > { %455 = vperm.xlu1 %4792, %v5070_v27   ;;  %450 = vperm.xlu0 %4791, %v5073_v28  }
  0x57   : > { %465 = vperm.xlu1 %4792, %v5078_v29   ;;  %460 = vperm.xlu0 %4791, %v5081_v30  }
  0x5b   : > { %475 = vperm.xlu1 %4792, %v5086_v31   ;;  %470 = vperm.xlu0 %4791, %v5089_v32  }
  0x5f   : > { %485 = vperm.xlu1 %4792, %v5094_v33   ;;  %480 = vperm.xlu0 %4791, %v5097_v34  }
  0x63   : > { %495 = vperm.xlu1 %4792, %v5102_v35   ;;  %490 = vperm.xlu0 %4791, %v5105_v36  }
  0x67   : > { %505 = vperm.xlu1 %4792, %v5110_v37   ;;  %500 = vperm.xlu0 %4791, %v5113_v38  }
  0x6b   : > { %515 = vperm.xlu1 %4792, %v5118_v39   ;;  %510 = vperm.xlu0 %4791, %v5121_v40  }
  0x6f   : > { %525 = vperm.xlu1 %4792, %v5126_v41   ;;  %520 = vperm.xlu0 %4791, %v5129_v42  }
  0x73   : > { %535 = vperm.xlu1 %4792, %v5134_v43   ;;  %530 = vperm.xlu0 %4791, %v5137_v44  }
  0x77   : > { %545 = vperm.xlu1 %4792, %v5142_v45   ;;  %540 = vperm.xlu0 %4791, %v5145_v46  }
  0x7b   : > { %555 = vperm.xlu1 %4792, %v5150_v47   ;;  %550 = vperm.xlu0 %4791, %v5153_v48  }
  0x7f   : > { %565 = vperm.xlu1 %4792, %v5158_v49   ;;  %560 = vperm.xlu0 %4791, %v5161_v50  }
  0x83   : > { %575 = vperm.xlu1 %4792, %v5166_v51   ;;  %570 = vperm.xlu0 %4791, %v5169_v52  }
  0x87   : > { %585 = vperm.xlu1 %4792, %v5174_v53   ;;  %580 = vperm.xlu0 %4791, %v5177_v54   ;;  %v317_v54 = vld [vmem:[%s7967_s2] sm:$0x3] }
  0x8b   : > { %595 = vperm.xlu1 %4792, %v5182_v55   ;;  %590 = vperm.xlu0 %4791, %v5185_v56  }
  0x8f   : > { %605 = vperm.xlu1 %4792, %v5190_v57   ;;  %600 = vperm.xlu0 %4791, %v5193_v58  }
  0x93   : > { %615 = vperm.xlu1 %4792, %v5198_v59   ;;  %610 = vperm.xlu0 %4791, %v5201_v60  }
  0x97   : > { %625 = vperm.xlu1 %4792, %v5206_v61   ;;  %620 = vperm.xlu0 %4791, %v5209_v62  }
  0x9b   : > { %4793 = vset.pattern.permute.xlu1 %v4876_v0  ;;  %630 = vperm.xlu0 %4791, %v5214_v63  }
  0x9c   : > { %916 = vperm.xlu1 %4793, %v4969_v2  }
  0x9e   : > { %v5218_v57 = vpop.permute.xlu1 %330  ;;  %v5220_v59 = vpop.permute.xlu0 %320 }
  0x9f   : > { %4794 = vset.pattern.permute.xlu0 %v4876_v0 }
  0xa0   : > { %924 = vperm.xlu1 %4793, %v4966_v1   ;;  %920 = vperm.xlu0 %4794, %v4977_v4  }
  0xa2   : > { %v5224_v61 = vpop.permute.xlu1 %335  ;;  %v5226_v62 = vpop.permute.xlu0 %325 }
  0xa4   : > { %928 = vperm.xlu1 %4793, %v4974_v3   ;;  %932 = vperm.xlu0 %4794, %v4985_v6  }
  0xa6   : > { %v5230_v63 = vpop.permute.xlu1 %345  ;;  %v5232_v2 = vpop.permute.xlu0 %340 }
  0xa8   : > { %936 = vperm.xlu1 %4793, %v4982_v5   ;;  %940 = vperm.xlu0 %4794, %v4993_v8  }
  0xaa   : > { %v5236_v0 = vpop.permute.xlu1 %355  ;;  %v5238_v1 = vpop.permute.xlu0 %350 }
  0xac   : > { %944 = vperm.xlu1 %4793, %v4990_v7   ;;  %948 = vperm.xlu0 %4794, %v5001_v10  }
  0xae   : > { %v5242_v4 = vpop.permute.xlu1 %365  ;;  %v5244_v3 = vpop.permute.xlu0 %360 }
  0xb0   : > { %952 = vperm.xlu1 %4793, %v4998_v9   ;;  %956 = vperm.xlu0 %4794, %v5009_v12  }
  0xb2   : > { %v5248_v6 = vpop.permute.xlu1 %375  ;;  %v5250_v5 = vpop.permute.xlu0 %370 }
  0xb4   : > { %960 = vperm.xlu1 %4793, %v5006_v11   ;;  %964 = vperm.xlu0 %4794, %v5017_v14  }
  0xb6   : > { %v5254_v8 = vpop.permute.xlu1 %385  ;;  %v5256_v7 = vpop.permute.xlu0 %380 }
  0xb8   : > { %968 = vperm.xlu1 %4793, %v5014_v13   ;;  %972 = vperm.xlu0 %4794, %v5025_v16  }
  0xba   : > { %v5260_v10 = vpop.permute.xlu1 %395  ;;  %v5262_v9 = vpop.permute.xlu0 %390 }
  0xbc   : > { %976 = vperm.xlu1 %4793, %v5022_v15   ;;  %980 = vperm.xlu0 %4794, %v5033_v18   ;;  %v634_v18 = vlaneseq }
  0xbe   : > { %v5266_v12 = vpop.permute.xlu1 %405  ;;  %v5268_v11 = vpop.permute.xlu0 %400  ;;  %v635_v60 = vshrl.u32 %v634_v18, 7 }
  0xc0   : > { %984 = vperm.xlu1 %4793, %v5030_v17   ;;  %988 = vperm.xlu0 %4794, %v5041_v20   ;;  %v636_v58 = vsub.s32 0, %v635_v60 }
  0xc2   : > { %v5272_v14 = vpop.permute.xlu1 %415  ;;  %v5274_v13 = vpop.permute.xlu0 %410  ;;  %v5322_v50 = vrot.slane %v317_v54, %v636_v58 }
  0xc4   : > { %992 = vperm.xlu1 %4793, %v5038_v19   ;;  %996 = vperm.xlu0 %4794, %v5049_v22  }
  0xc6   : > { %v5278_v16 = vpop.permute.xlu1 %425  ;;  %v5280_v15 = vpop.permute.xlu0 %420 }
  0xc8   : > { %1000 = vperm.xlu1 %4793, %v5046_v21   ;;  %1004 = vperm.xlu0 %4794, %v5057_v24   ;;  %v316_v21 = vld [vmem:[%s7966_s1] sm:$0xf]  ;;  %v640_v24 = vsub.s32 2, %v635_v60 }
  0xca   : > { %v5284_v17 = vpop.permute.xlu1 %435  ;;  %v5286_v20 = vpop.permute.xlu0 %430 }
  0xcc   : > { %1008 = vperm.xlu1 %4793, %v5054_v23   ;;  %1012 = vperm.xlu0 %4794, %v5065_v26   ;;  %v637_v23 = vrot.slane %v316_v21, %v636_v58  ;;  %v641_v26 = vrot.slane %v316_v21, %v640_v24 }
  0xce   : > { %v5290_v19 = vpop.permute.xlu1 %445  ;;  %v5292_v22 = vpop.permute.xlu0 %440  ;;  %v5309_v53 = vrot.slane %v637_v23, %v636_v58  ;;  %v5316_v51 = vrot.slane %v641_v26, %v636_v58 }
  0xd0   : > { %1016 = vperm.xlu1 %4793, %v5062_v25   ;;  %1020 = vperm.xlu0 %4794, %v5073_v28   ;;  %v1173_v28 = vsub.s32 3, %v635_v60  ;;  %v652_v23 = vmul.f32 %v5309_v53, %v5220_v59  ;;  %v658_v58 = vmul.f32 %v5309_v53, %v5224_v61 }
  0xd2   : > { %v5299_v55 = vpop.permute.xlu1 %455  ;;  %v5301_v18 = vpop.permute.xlu0 %450  ;;  %v1174_v49 = vrot.slane %v316_v21, %v1173_v28 }
  0xd4   : > { %1024 = vperm.xlu1 %4793, %v5070_v27   ;;  %1028 = vperm.xlu0 %4794, %v5081_v30   ;;  %v785_v27 = vsub.s32 1, %v635_v60  ;;  %v657_v60 = vmul.f32 %v5316_v51, %v5218_v57 }
  0xd6   : > { %v5305_v56 = vpop.permute.xlu1 %465  ;;  %v5307_v25 = vpop.permute.xlu0 %460  ;;  %v1170_v52 = vrot.slane %v316_v21, %v785_v27  ;;  %v653_v21 = vmul.f32 %v5316_v51, %v5220_v59  ;;  %v655_v59 = vmul.f32 %v5316_v51, %v5226_v62 }
  0xd8   : > { %1032 = vperm.xlu1 %4793, %v5078_v29   ;;  %1036 = vperm.xlu0 %4794, %v5089_v32   ;;  %v656_v29 = vmul.f32 %v5309_v53, %v5218_v57  ;;  %v5328_v32 = vrot.slane %v317_v54, %v785_v27  ;;  %v5346_v54 = vrot.slane %v1170_v52, %v785_v27 }
  0xd9   : > { %v5348_v57 = vrot.slane %v1174_v49, %v785_v27  ;;  %v5363_v52 = vadd.f32 %v5322_v50, %v652_v23  ;;  %v663_v49 = vmul.f32 %v5316_v51, %v5230_v63  ;;  %v660_v27 = vmul.f32 %v5309_v53, %v5232_v2 }
  0xda   : > { %v5318_v30 = vpop.permute.xlu1 %475  ;;  %v5320_v24 = vpop.permute.xlu0 %470 }
  0xdb   : > { %8003 = vst [vmem:[#allocation20_spill] sm:$0xff] %v5320_v24  ;;  %v5351_v24 = vadd.f32 %v5322_v50, %v656_v29  ;;  %v5373_v29 = vadd.f32 %v5322_v50, %v658_v58  ;;  %v664_v58 = vmul.f32 %v5309_v53, %v5238_v1 }
  0xdc   : > { %1040 = vperm.xlu1 %4793, %v5086_v31   ;;  %1044 = vperm.xlu0 %4794, %v5097_v34   ;;  %v659_v31 = vmul.f32 %v5316_v51, %v5224_v61  ;;  %v654_v34 = vmul.f32 %v5309_v53, %v5226_v62  ;;  %v5360_v61 = vadd.f32 %v5328_v32, %v657_v60 }
  0xdd   : > { %8005 = vst [vmem:[#allocation22_spill] sm:$0xff] %v5351_v24  ;;  %v5370_v62 = vadd.f32 %v5328_v32, %v653_v21  ;;  %8007 = vst [vmem:[#allocation24_spill] sm:$0xff] %v5373_v29  ;;  %v667_v21 = vmul.f32 %v5316_v51, %v5236_v0  ;;  %v665_v24 = vmul.f32 %v5316_v51, %v5238_v1 }
  0xde   : > { %v5338_v26 = vpop.permute.xlu1 %485  ;;  %v5340_v28 = vpop.permute.xlu0 %480  ;;  %8006 = vst [vmem:[#allocation23_spill] sm:$0xff] %v5360_v61  ;;  %v5387_v61 = vadd.f32 %v5322_v50, %v654_v34  ;;  %v670_v34 = vmul.f32 %v5309_v53, %v5242_v4 }
  0xdf   : > { %8004 = vst [vmem:[#allocation21_spill] sm:$0xff] %v5338_v26  ;;  %v662_v26 = vmul.f32 %v5309_v53, %v5230_v63  ;;  %v5384_v63 = vadd.f32 %v5328_v32, %v659_v31  ;;  %v5404_v31 = vadd.f32 %v5328_v32, %v663_v49 }
  0xe0   : > { %1048 = vperm.xlu1 %4793, %v5094_v33   ;;  %1052 = vperm.xlu0 %4794, %v5105_v36   ;;  %v661_v33 = vmul.f32 %v5316_v51, %v5232_v2  ;;  %v666_v36 = vmul.f32 %v5309_v53, %v5236_v0  ;;  %v5394_v2 = vadd.f32 %v5328_v32, %v655_v59 }
  0xe1   : > { %v5397_v29 = vadd.f32 %v5322_v50, %v662_v26  ;;  %8009 = vst [vmem:[#allocation26_spill] sm:$0xff] %v5404_v31  ;;  %v5407_v0 = vadd.f32 %v5322_v50, %v660_v27  ;;  %v671_v26 = vmul.f32 %v5316_v51, %v5242_v4  ;;  %v5428_v31 = vadd.f32 %v5328_v32, %v667_v21 }
  0xe2   : > { %v5379_v60 = vpop.permute.xlu1 %495  ;;  %v5381_v23 = vpop.permute.xlu0 %490  ;;  %v5414_v59 = vadd.f32 %v5328_v32, %v661_v33  ;;  %v5417_v1 = vadd.f32 %v5322_v50, %v666_v36  ;;  %v5431_v4 = vadd.f32 %v5322_v50, %v664_v58  ;;  %v674_v33 = vmul.f32 %v5309_v53, %v5248_v6 }
  0xe3   : > { %8008 = vst [vmem:[#allocation25_spill] sm:$0xff] %v5397_v29  ;;  %8011 = vst [vmem:[#allocation28_spill] sm:$0xff] %v5428_v31  ;;  %v675_v36 = vmul.f32 %v5316_v51, %v5248_v6  ;;  %v673_v29 = vmul.f32 %v5316_v51, %v5250_v5  ;;  %v5447_v21 = vadd.f32 %v5322_v50, %v670_v34 }
  0xe4   : > { %1056 = vperm.xlu1 %4793, %v5102_v35   ;;  %1060 = vperm.xlu0 %4794, %v5113_v38   ;;  %8010 = vst [vmem:[#allocation27_spill] sm:$0xff] %v5417_v1  ;;  %v668_v35 = vmul.f32 %v5309_v53, %v5244_v3  ;;  %v669_v38 = vmul.f32 %v5316_v51, %v5244_v3 }
  0xe5   : > { %v5438_v1 = vadd.f32 %v5328_v32, %v665_v24  ;;  %v672_v3 = vmul.f32 %v5309_v53, %v5250_v5  ;;  %8012 = vst [vmem:[#allocation29_spill] sm:$0xff] %v5447_v21  ;;  %v5450_v58 = vadd.f32 %v5328_v32, %v671_v26  ;;  %v678_v6 = vmul.f32 %v5309_v53, %v5254_v8 }
  0xe6   : > { %v5423_v49 = vpop.permute.xlu1 %505  ;;  %v5425_v27 = vpop.permute.xlu0 %500  ;;  %v679_v24 = vmul.f32 %v5316_v51, %v5254_v8  ;;  %v5457_v31 = vadd.f32 %v5322_v50, %v668_v35  ;;  %v5460_v5 = vadd.f32 %v5328_v32, %v669_v38  ;;  %v5474_v8 = vadd.f32 %v5328_v32, %v675_v36 }
  0xe7   : > { %8013 = vst [vmem:[#allocation30_spill] sm:$0xff] %v5450_v58  ;;  %v5471_v58 = vadd.f32 %v5322_v50, %v674_v33  ;;  %v682_v35 = vmul.f32 %v5309_v53, %v5260_v10  ;;  %v683_v38 = vmul.f32 %v5316_v51, %v5260_v10  ;;  %v5481_v21 = vadd.f32 %v5322_v50, %v672_v3 }
  0xe8   : > { %1064 = vperm.xlu1 %4793, %v5110_v37   ;;  %1068 = vperm.xlu0 %4794, %v5121_v40   ;;  %8014 = vst [vmem:[#allocation31_spill] sm:$0xff] %v5460_v5  ;;  %v676_v37 = vmul.f32 %v5309_v53, %v5256_v7  ;;  %v677_v40 = vmul.f32 %v5316_v51, %v5256_v7  ;;  %8015 = vst [vmem:[#allocation32_spill] sm:$0xff] %v5474_v8 }
  0xe9   : > { %v5484_v7 = vadd.f32 %v5328_v32, %v673_v29  ;;  %v680_v5 = vmul.f32 %v5309_v53, %v5262_v9  ;;  %v5491_v33 = vadd.f32 %v5322_v50, %v678_v6  ;;  %v5494_v36 = vadd.f32 %v5328_v32, %v679_v24 }
  0xea   : > { %v5466_v34 = vpop.permute.xlu1 %515  ;;  %v5468_v26 = vpop.permute.xlu0 %510  ;;  %v681_v10 = vmul.f32 %v5316_v51, %v5262_v9  ;;  %v686_v29 = vmul.f32 %v5309_v53, %v5266_v12  ;;  %v5501_v3 = vadd.f32 %v5322_v50, %v676_v37  ;;  %v5504_v8 = vadd.f32 %v5328_v32, %v677_v40 }
  0xeb   : > { %8016 = vst [vmem:[#allocation33_spill] sm:$0xff] %v5491_v33  ;;  %8017 = vst [vmem:[#allocation34_spill] sm:$0xff] %v5494_v36  ;;  %v5515_v9 = vadd.f32 %v5322_v50, %v682_v35  ;;  %v5518_v36 = vadd.f32 %v5328_v32, %v683_v38  ;;  %v685_v37 = vmul.f32 %v5316_v51, %v5268_v11 }
  0xec   : > { %1072 = vperm.xlu1 %4793, %v5118_v39   ;;  %1076 = vperm.xlu0 %4794, %v5129_v42   ;;  %8018 = vst [vmem:[#allocation35_spill] sm:$0xff] %v5504_v8  ;;  %v687_v39 = vmul.f32 %v5316_v51, %v5266_v12  ;;  %v684_v42 = vmul.f32 %v5309_v53, %v5268_v11 }
  0xed   : > { %8019 = vst [vmem:[#allocation36_spill] sm:$0xff] %v5518_v36  ;;  %v690_v40 = vmul.f32 %v5309_v53, %v5272_v14  ;;  %v5525_v12 = vadd.f32 %v5322_v50, %v680_v5  ;;  %v691_v33 = vmul.f32 %v5316_v51, %v5272_v14  ;;  %v688_v8 = vmul.f32 %v5309_v53, %v5274_v13 }
  0xee   : > { %v5510_v6 = vpop.permute.xlu1 %525  ;;  %v5512_v24 = vpop.permute.xlu0 %520  ;;  %v5534_v35 = vadd.f32 %v5328_v32, %v681_v10  ;;  %v5537_v11 = vadd.f32 %v5322_v50, %v686_v29  ;;  %v689_v5 = vmul.f32 %v5316_v51, %v5274_v13  ;;  %v694_v38 = vmul.f32 %v5309_v53, %v5278_v16 }
  0xef   : > { %v5544_v14 = vadd.f32 %v5328_v32, %v687_v39  ;;  %v5547_v36 = vadd.f32 %v5322_v50, %v684_v42  ;;  %v5558_v13 = vadd.f32 %v5328_v32, %v685_v37  ;;  %v693_v39 = vmul.f32 %v5316_v51, %v5280_v15 }
  0xf0   : > { %1080 = vperm.xlu1 %4793, %v5126_v41   ;;  %1084 = vperm.xlu0 %4794, %v5137_v44   ;;  %8020 = vst [vmem:[#allocation37_spill] sm:$0xff] %v5537_v11  ;;  %v695_v41 = vmul.f32 %v5316_v51, %v5278_v16  ;;  %v692_v44 = vmul.f32 %v5309_v53, %v5280_v15 }
  0xf1   : > { %8021 = vst [vmem:[#allocation38_spill] sm:$0xff] %v5544_v14  ;;  %8022 = vst [vmem:[#allocation39_spill] sm:$0xff] %v5547_v36  ;;  %v5561_v11 = vadd.f32 %v5322_v50, %v690_v40  ;;  %v698_v42 = vmul.f32 %v5309_v53, %v5284_v17  ;;  %v5568_v16 = vadd.f32 %v5328_v32, %v691_v33 }
  0xf2   : > { %v5553_v10 = vpop.permute.xlu1 %535  ;;  %v5555_v29 = vpop.permute.xlu0 %530  ;;  %v5571_v14 = vadd.f32 %v5322_v50, %v688_v8  ;;  %v699_v36 = vmul.f32 %v5316_v51, %v5284_v17  ;;  %v5578_v37 = vadd.f32 %v5328_v32, %v689_v5  ;;  %v5581_v15 = vadd.f32 %v5322_v50, %v694_v38 }
  0xf3   : > { %v696_v33 = vmul.f32 %v5309_v53, %v5286_v20  ;;  %v697_v8 = vmul.f32 %v5316_v51, %v5286_v20  ;;  %v5588_v40 = vadd.f32 %v5328_v32, %v695_v41  ;;  %v5591_v17 = vadd.f32 %v5322_v50, %v692_v44 }
  0xf4   : > { %1088 = vperm.xlu1 %4793, %v5134_v43   ;;  %1092 = vperm.xlu0 %4794, %v5145_v46   ;;  %8023 = vst [vmem:[#allocation40_spill] sm:$0xff] %v5581_v15  ;;  %v702_v43 = vmul.f32 %v5309_v53, %v5290_v19  ;;  %v703_v46 = vmul.f32 %v5316_v51, %v5290_v19 }
  0xf5   : > { %8024 = vst [vmem:[#allocation41_spill] sm:$0xff] %v5588_v40  ;;  %8025 = vst [vmem:[#allocation42_spill] sm:$0xff] %v5591_v17  ;;  %v5602_v15 = vadd.f32 %v5328_v32, %v693_v39  ;;  %v5605_v20 = vadd.f32 %v5322_v50, %v698_v42  ;;  %v700_v41 = vmul.f32 %v5309_v53, %v5292_v22 }
  0xf6   : > { %v5597_v5 = vpop.permute.xlu1 %545  ;;  %v5599_v38 = vpop.permute.xlu0 %540  ;;  %v701_v44 = vmul.f32 %v5316_v51, %v5292_v22  ;;  %v5612_v40 = vadd.f32 %v5328_v32, %v699_v36  ;;  %v706_v19 = vmul.f32 %v5309_v53, %v5299_v55  ;;  %v707_v17 = vmul.f32 %v5316_v51, %v5299_v55 }
  0xf7   : > { %8026 = vst [vmem:[#allocation43_spill] sm:$0xff] %v5602_v15  ;;  %8027 = vst [vmem:[#allocation44_spill] sm:$0xff] %v5605_v20  ;;  %v5621_v39 = vadd.f32 %v5322_v50, %v696_v33  ;;  %v5624_v42 = vadd.f32 %v5328_v32, %v697_v8  ;;  %v704_v22 = vmul.f32 %v5309_v53, %v5301_v18 }
  0xf8   : > { %8028 = vst [vmem:[#allocation45_spill] sm:$0xff] %v5612_v40  ;;  %1096 = vperm.xlu1 %4793, %v5142_v45   ;;  %1100 = vperm.xlu0 %4794, %v5153_v48   ;;  %v705_v36 = vmul.f32 %v5316_v51, %v5301_v18  ;;  %v5631_v40 = vadd.f32 %v5322_v50, %v702_v43 }
  0xf9   : > { %8029 = vst [vmem:[#allocation46_spill] sm:$0xff] %v5621_v39  ;;  %8030 = vst [vmem:[#allocation47_spill] sm:$0xff] %v5624_v42  ;;  %v5634_v55 = vadd.f32 %v5328_v32, %v703_v46  ;;  %v710_v45 = vmul.f32 %v5309_v53, %v5305_v56  ;;  %v711_v48 = vmul.f32 %v5316_v51, %v5305_v56 }
  0xfa   : > { %8031 = vst [vmem:[#allocation48_spill] sm:$0xff] %v5631_v40  ;;  %v5640_v33 = vpop.permute.xlu1 %555  ;;  %v5642_v8 = vpop.permute.xlu0 %550  ;;  %v5645_v20 = vadd.f32 %v5322_v50, %v700_v41  ;;  %v5648_v18 = vadd.f32 %v5328_v32, %v701_v44  ;;  %v708_v43 = vmul.f32 %v5309_v53, %v5307_v25  ;;  %v709_v46 = vmul.f32 %v5316_v51, %v5307_v25  ;;  %v8037_v41 = vld [vmem:[#allocation6_spill] sm:$0xff] }
  0xfb   : > { %8032 = vst [vmem:[#allocation49_spill] sm:$0xff] %v5634_v55  ;;  %v5655_v55 = vadd.f32 %v5322_v50, %v706_v19  ;;  %v5658_v56 = vadd.f32 %v5328_v32, %v707_v17  ;;  %v714_v40 = vmul.f32 %v5309_v53, %v5318_v30  ;;  %v5665_v44 = vadd.f32 %v5322_v50, %v704_v22  ;;  %v8040_v19 = vld [vmem:[#allocation20_spill] sm:$0xff]  ;;  %v8043_v22 = vld [vmem:[#allocation21_spill] sm:$0xff] }
  0xfc   : > { %8033 = vst [vmem:[#allocation50_spill] sm:$0xff] %v5645_v20  ;;  %8034 = vst [vmem:[#allocation51_spill] sm:$0xff] %v5648_v18  ;;  %1104 = vperm.xlu1 %4793, %v5150_v47   ;;  %1108 = vperm.xlu0 %4794, %v8037_v41   ;;  %v5668_v18 = vadd.f32 %v5328_v32, %v705_v36  ;;  %v715_v25 = vmul.f32 %v5316_v51, %v5318_v30 }
  0xfd   : > { %8035 = vst [vmem:[#allocation52_spill] sm:$0xff] %v5655_v55  ;;  %8036 = vst [vmem:[#allocation53_spill] sm:$0xff] %v5658_v56  ;;  %v712_v17 = vmul.f32 %v5309_v53, %v8040_v19  ;;  %v5675_v56 = vadd.f32 %v5322_v50, %v710_v45  ;;  %v5678_v55 = vadd.f32 %v5328_v32, %v711_v48 }
  0xfe   : > { %8038 = vst [vmem:[#allocation6_spill] sm:$0xff] %v5665_v44  ;;  %8039 = vst [vmem:[#allocation54_spill] sm:$0xff] %v5668_v18  ;;  %v713_v47 = vmul.f32 %v5316_v51, %v8040_v19  ;;  %v718_v41 = vmul.f32 %v5309_v53, %v8043_v22  ;;  %v5684_v36 = vpop.permute.xlu1 %565  ;;  %v5686_v18 = vpop.permute.xlu0 %560  ;;  %v5689_v30 = vadd.f32 %v5322_v50, %v708_v43  ;;  %v8047_v43 = vld [vmem:[#allocation5_spill] sm:$0xff] }
  0xff   : > { %8041 = vst [vmem:[#allocation20_spill] sm:$0xff] %v5675_v56  ;;  %8042 = vst [vmem:[#allocation55_spill] sm:$0xff] %v5678_v55  ;;  %v5692_v44 = vadd.f32 %v5328_v32, %v709_v46  ;;  %v719_v45 = vmul.f32 %v5316_v51, %v8043_v22  ;;  %v716_v48 = vmul.f32 %v5309_v53, %v5340_v28 }
 0x100   : > { %8044 = vst [vmem:[#allocation21_spill] sm:$0xff] %v5689_v30  ;;  %v5699_v19 = vadd.f32 %v5322_v50, %v714_v40  ;;  %v717_v55 = vmul.f32 %v5316_v51, %v5340_v28  ;;  %v722_v56 = vmul.f32 %v5309_v53, %v5379_v60  ;;  %1112 = vperm.xlu1 %4793, %v8047_v43   ;;  %v8048_v30 = vld [vmem:[#allocation8_spill] sm:$0xff] }
 0x101   : > { %8045 = vst [vmem:[#allocation56_spill] sm:$0xff] %v5692_v44  ;;  %1116 = vperm.xlu0 %4794, %v8048_v30   ;;  %v5708_v46 = vadd.f32 %v5328_v32, %v715_v25  ;;  %v5711_v22 = vadd.f32 %v5322_v50, %v712_v17  ;;  %v723_v40 = vmul.f32 %v5316_v51, %v5379_v60 }
 0x102   : > { %8046 = vst [vmem:[#allocation57_spill] sm:$0xff] %v5699_v19  ;;  %v720_v19 = vmul.f32 %v5309_v53, %v5381_v23  ;;  %v5718_v28 = vadd.f32 %v5328_v32, %v713_v47  ;;  %v5721_v44 = vadd.f32 %v5322_v50, %v718_v41  ;;  %v721_v30 = vmul.f32 %v5316_v51, %v5381_v23  ;;  %v5727_v17 = vpop.permute.xlu1 %575  ;;  %v5729_v43 = vpop.permute.xlu0 %570 }
 0x103   : > { %8049 = vst [vmem:[#allocation5_spill] sm:$0xff] %v5708_v46  ;;  %8050 = vst [vmem:[#allocation8_spill] sm:$0xff] %v5711_v22  ;;  %v726_v25 = vmul.f32 %v5309_v53, %v5423_v49  ;;  %v5732_v60 = vadd.f32 %v5328_v32, %v719_v45  ;;  %v5735_v46 = vadd.f32 %v5322_v50, %v716_v48  ;;  %v8057_v45 = vld [vmem:[#allocation7_spill] sm:$0xff] }
 0x104   : > { %8051 = vst [vmem:[#allocation58_spill] sm:$0xff] %v5718_v28  ;;  %8052 = vst [vmem:[#allocation59_spill] sm:$0xff] %v5721_v44  ;;  %v727_v47 = vmul.f32 %v5316_v51, %v5423_v49  ;;  %v724_v41 = vmul.f32 %v5309_v53, %v5425_v27  ;;  %v5742_v23 = vadd.f32 %v5328_v32, %v717_v55  ;;  %1120 = vperm.xlu1 %4793, %v8057_v45  }
 0x105   : > { %8053 = vst [vmem:[#allocation60_spill] sm:$0xff] %v5732_v60  ;;  %8054 = vst [vmem:[#allocation61_spill] sm:$0xff] %v5735_v46  ;;  %v5745_v44 = vadd.f32 %v5322_v50, %v722_v56  ;;  %v725_v28 = vmul.f32 %v5316_v51, %v5425_v27  ;;  %v8058_v60 = vld [vmem:[#allocation10_spill] sm:$0xff]  ;;  %v5752_v48 = vadd.f32 %v5328_v32, %v723_v40 }
 0x106   : > { %8055 = vst [vmem:[#allocation62_spill] sm:$0xff] %v5742_v23  ;;  %1124 = vperm.xlu0 %4794, %v8058_v60   ;;  %v5755_v49 = vadd.f32 %v5322_v50, %v720_v19  ;;  %v730_v55 = vmul.f32 %v5309_v53, %v5466_v34  ;;  %v731_v56 = vmul.f32 %v5316_v51, %v5466_v34  ;;  %v5771_v19 = vpop.permute.xlu1 %585  ;;  %v5773_v45 = vpop.permute.xlu0 %580 }
 0x107   : > { %8056 = vst [vmem:[#allocation63_spill] sm:$0xff] %v5745_v44  ;;  %8059 = vst [vmem:[#allocation7_spill] sm:$0xff] %v5752_v48  ;;  %v5762_v44 = vadd.f32 %v5328_v32, %v721_v30  ;;  %v5765_v27 = vadd.f32 %v5322_v50, %v726_v25  ;;  %v728_v60 = vmul.f32 %v5309_v53, %v5468_v26 }
 0x108   : > { %8060 = vst [vmem:[#allocation10_spill] sm:$0xff] %v5755_v49  ;;  %v729_v40 = vmul.f32 %v5316_v51, %v5468_v26  ;;  %v5776_v48 = vadd.f32 %v5328_v32, %v727_v47  ;;  %v5779_v34 = vadd.f32 %v5322_v50, %v724_v41  ;;  %v734_v30 = vmul.f32 %v5309_v53, %v5510_v6  ;;  %v8066_v47 = vld [vmem:[#allocation9_spill] sm:$0xff] }
 0x109   : > { %8061 = vst [vmem:[#allocation64_spill] sm:$0xff] %v5762_v44  ;;  %8062 = vst [vmem:[#allocation65_spill] sm:$0xff] %v5765_v27  ;;  %v735_v25 = vmul.f32 %v5316_v51, %v5510_v6  ;;  %v5786_v27 = vadd.f32 %v5328_v32, %v725_v28  ;;  %v732_v26 = vmul.f32 %v5309_v53, %v5512_v24  ;;  %1128 = vperm.xlu1 %4793, %v8066_v47  }
 0x10a   : > { %8063 = vst [vmem:[#allocation66_spill] sm:$0xff] %v5776_v48  ;;  %8064 = vst [vmem:[#allocation67_spill] sm:$0xff] %v5779_v34  ;;  %v733_v44 = vmul.f32 %v5316_v51, %v5512_v24  ;;  %v8067_v48 = vld [vmem:[#allocation12_spill] sm:$0xff]  ;;  %v5795_v41 = vadd.f32 %v5322_v50, %v730_v55  ;;  %v5798_v34 = vadd.f32 %v5328_v32, %v731_v56  ;;  %v596_v56 = vpop.permute.xlu1 %595  ;;  %v591_v47 = vpop.permute.xlu0 %590 }
 0x10b   : > { %8065 = vst [vmem:[#allocation68_spill] sm:$0xff] %v5786_v27  ;;  %1132 = vperm.xlu0 %4794, %v8067_v48   ;;  %v738_v6 = vmul.f32 %v5309_v53, %v5553_v10  ;;  %v739_v28 = vmul.f32 %v5316_v51, %v5553_v10  ;;  %v5805_v27 = vadd.f32 %v5322_v50, %v728_v60 }
 0x10c   : > { %8068 = vst [vmem:[#allocation9_spill] sm:$0xff] %v5795_v41  ;;  %8069 = vst [vmem:[#allocation12_spill] sm:$0xff] %v5798_v34  ;;  %v5808_v24 = vadd.f32 %v5328_v32, %v729_v40  ;;  %v736_v48 = vmul.f32 %v5309_v53, %v5555_v29  ;;  %v737_v55 = vmul.f32 %v5316_v51, %v5555_v29 }
 0x10d   : > { %8070 = vst [vmem:[#allocation69_spill] sm:$0xff] %v5805_v27  ;;  %v5815_v34 = vadd.f32 %v5322_v50, %v734_v30  ;;  %v5818_v41 = vadd.f32 %v5328_v32, %v735_v25  ;;  %v742_v10 = vmul.f32 %v5309_v53, %v5597_v5  ;;  %v743_v60 = vmul.f32 %v5316_v51, %v5597_v5  ;;  %v8076_v30 = vld [vmem:[#allocation11_spill] sm:$0xff] }
 0x10e   : > { %8071 = vst [vmem:[#allocation70_spill] sm:$0xff] %v5808_v24  ;;  %v5825_v40 = vadd.f32 %v5322_v50, %v732_v26  ;;  %v5828_v24 = vadd.f32 %v5328_v32, %v733_v44  ;;  %v740_v29 = vmul.f32 %v5309_v53, %v5599_v38  ;;  %1136 = vperm.xlu1 %4793, %v8076_v30   ;;  %v601_v30 = vpop.permute.xlu0 %600 }
 0x10f   : > { %8072 = vst [vmem:[#allocation71_spill] sm:$0xff] %v5815_v34  ;;  %8073 = vst [vmem:[#allocation72_spill] sm:$0xff] %v5818_v41  ;;  %v8077_v34 = vld [vmem:[#allocation14_spill] sm:$0xff]  ;;  %v5835_v25 = vadd.f32 %v5322_v50, %v738_v6  ;;  %v5838_v41 = vadd.f32 %v5328_v32, %v739_v28  ;;  %v741_v5 = vmul.f32 %v5316_v51, %v5599_v38  ;;  %v606_v28 = vpop.permute.xlu1 %605 }
 0x110   : > { %8074 = vst [vmem:[#allocation73_spill] sm:$0xff] %v5825_v40  ;;  %8075 = vst [vmem:[#allocation74_spill] sm:$0xff] %v5828_v24  ;;  %1140 = vperm.xlu0 %4794, %v8077_v34   ;;  %v746_v44 = vmul.f32 %v5309_v53, %v5640_v33  ;;  %v5845_v26 = vadd.f32 %v5322_v50, %v736_v48  ;;  %v5848_v24 = vadd.f32 %v5328_v32, %v737_v55 }
 0x111   : > { %8078 = vst [vmem:[#allocation11_spill] sm:$0xff] %v5835_v25  ;;  %8079 = vst [vmem:[#allocation14_spill] sm:$0xff] %v5838_v41  ;;  %v747_v34 = vmul.f32 %v5316_v51, %v5640_v33  ;;  %v744_v6 = vmul.f32 %v5309_v53, %v5642_v8  ;;  %v5855_v41 = vadd.f32 %v5322_v50, %v742_v10  ;;  %v8085_v10 = vld [vmem:[#allocation13_spill] sm:$0xff] }
 0x112   : > { %8080 = vst [vmem:[#allocation75_spill] sm:$0xff] %v5845_v26  ;;  %8081 = vst [vmem:[#allocation76_spill] sm:$0xff] %v5848_v24  ;;  %v5858_v38 = vadd.f32 %v5328_v32, %v743_v60  ;;  %v745_v48 = vmul.f32 %v5316_v51, %v5642_v8  ;;  %v750_v55 = vmul.f32 %v5309_v53, %v5684_v36  ;;  %1144 = vperm.xlu1 %4793, %v8085_v10   ;;  %v611_v10 = vpop.permute.xlu0 %610 }
 0x113   : > { %8082 = vst [vmem:[#allocation77_spill] sm:$0xff] %v5855_v41  ;;  %v5865_v25 = vadd.f32 %v5322_v50, %v740_v29  ;;  %v751_v33 = vmul.f32 %v5316_v51, %v5684_v36  ;;  %v748_v24 = vmul.f32 %v5309_v53, %v5686_v18  ;;  %v8086_v41 = vld [vmem:[#allocation16_spill] sm:$0xff]  ;;  %v5874_v60 = vadd.f32 %v5328_v32, %v741_v5 }
 0x114   : > { %8083 = vst [vmem:[#allocation78_spill] sm:$0xff] %v5858_v38  ;;  %1148 = vperm.xlu0 %4794, %v8086_v41   ;;  %v5877_v8 = vadd.f32 %v5322_v50, %v746_v44  ;;  %v749_v29 = vmul.f32 %v5316_v51, %v5686_v18  ;;  %v754_v38 = vmul.f32 %v5309_v53, %v5727_v17  ;;  %v616_v44 = vpop.permute.xlu1 %615 }
 0x115   : > { %8084 = vst [vmem:[#allocation79_spill] sm:$0xff] %v5865_v25  ;;  %8087 = vst [vmem:[#allocation13_spill] sm:$0xff] %v5874_v60  ;;  %v5884_v36 = vadd.f32 %v5328_v32, %v747_v34  ;;  %v5887_v25 = vadd.f32 %v5322_v50, %v744_v6  ;;  %v755_v41 = vmul.f32 %v5316_v51, %v5727_v17 }
 0x116   : > { %8088 = vst [vmem:[#allocation16_spill] sm:$0xff] %v5877_v8  ;;  %v752_v5 = vmul.f32 %v5309_v53, %v5729_v43  ;;  %v5894_v8 = vadd.f32 %v5328_v32, %v745_v48  ;;  %v5897_v18 = vadd.f32 %v5322_v50, %v750_v55  ;;  %v753_v34 = vmul.f32 %v5316_v51, %v5729_v43  ;;  %v8095_v48 = vld [vmem:[#allocation15_spill] sm:$0xff] }
 0x117   : > { %8089 = vst [vmem:[#allocation80_spill] sm:$0xff] %v5884_v36  ;;  %8090 = vst [vmem:[#allocation81_spill] sm:$0xff] %v5887_v25  ;;  %v758_v6 = vmul.f32 %v5309_v53, %v5771_v19  ;;  %v5904_v36 = vadd.f32 %v5328_v32, %v751_v33  ;;  %v5907_v17 = vadd.f32 %v5322_v50, %v748_v24  ;;  %1152 = vperm.xlu1 %4793, %v8095_v48  }
 0x118   : > { %8091 = vst [vmem:[#allocation82_spill] sm:$0xff] %v5894_v8  ;;  %8092 = vst [vmem:[#allocation83_spill] sm:$0xff] %v5897_v18  ;;  %v759_v25 = vmul.f32 %v5316_v51, %v5771_v19  ;;  %v8096_v8 = vld [vmem:[#allocation18_spill] sm:$0xff]  ;;  %v5914_v55 = vadd.f32 %v5328_v32, %v749_v29  ;;  %v5917_v43 = vadd.f32 %v5322_v50, %v754_v38  ;;  %v626_v48 = vpop.permute.xlu1 %625  ;;  %v621_v18 = vpop.permute.xlu0 %620 }
 0x119   : > { %8093 = vst [vmem:[#allocation84_spill] sm:$0xff] %v5904_v36  ;;  %8094 = vst [vmem:[#allocation85_spill] sm:$0xff] %v5907_v17  ;;  %1156 = vperm.xlu0 %4794, %v8096_v8   ;;  %v756_v33 = vmul.f32 %v5309_v53, %v5773_v45  ;;  %v757_v24 = vmul.f32 %v5316_v51, %v5773_v45  ;;  %v5924_v36 = vadd.f32 %v5328_v32, %v755_v41 }
 0x11a   : > { %8097 = vst [vmem:[#allocation15_spill] sm:$0xff] %v5914_v55  ;;  %8098 = vst [vmem:[#allocation18_spill] sm:$0xff] %v5917_v43  ;;  %v5927_v19 = vadd.f32 %v5322_v50, %v752_v5  ;;  %v762_v8 = vmul.f32 %v5309_v53, %v596_v56  ;;  %v763_v29 = vmul.f32 %v5316_v51, %v596_v56  ;;  %v8104_v56 = vld [vmem:[#allocation17_spill] sm:$0xff]  ;;  %v8105_v55 = vld [vmem:[#allocation19_spill] sm:$0xff] }
 0x11b   : > { %8099 = vst [vmem:[#allocation86_spill] sm:$0xff] %v5924_v36  ;;  %v5932_v38 = vadd.f32 %v5328_v32, %v753_v34  ;;  %v5935_v43 = vadd.f32 %v5322_v50, %v758_v6  ;;  %v760_v45 = vmul.f32 %v5309_v53, %v591_v47  ;;  %v761_v41 = vmul.f32 %v5316_v51, %v591_v47 }
 0x11c   : > { %8100 = vst [vmem:[#allocation87_spill] sm:$0xff] %v5927_v19  ;;  %v5940_v36 = vadd.f32 %v5328_v32, %v759_v25  ;;  %v766_v5 = vmul.f32 %v5309_v53, %v606_v28  ;;  %v767_v19 = vmul.f32 %v5316_v51, %v606_v28  ;;  %1160 = vperm.xlu1 %4793, %v8104_v56   ;;  %v5962_v56 = vpop.permute.xlu0 %630 }
 0x11d   : > { %8101 = vst [vmem:[#allocation88_spill] sm:$0xff] %v5932_v38  ;;  %8102 = vst [vmem:[#allocation89_spill] sm:$0xff] %v5935_v43  ;;  %1164 = vperm.xlu0 %4794, %v8105_v55   ;;  %v5947_v34 = vadd.f32 %v5322_v50, %v756_v33  ;;  %v5950_v6 = vadd.f32 %v5328_v32, %v757_v24  ;;  %v764_v43 = vmul.f32 %v5309_v53, %v601_v30 }
 0x11e   : > { %8103 = vst [vmem:[#allocation90_spill] sm:$0xff] %v5940_v36  ;;  %v765_v47 = vmul.f32 %v5316_v51, %v601_v30  ;;  %v5955_v25 = vadd.f32 %v5322_v50, %v762_v8  ;;  %v5958_v36 = vadd.f32 %v5328_v32, %v763_v29  ;;  %v770_v28 = vmul.f32 %v5309_v53, %v616_v44 }
 0x11f   : > { %8106 = vst [vmem:[#allocation17_spill] sm:$0xff] %v5947_v34  ;;  %8107 = vst [vmem:[#allocation19_spill] sm:$0xff] %v5950_v6  ;;  %v771_v55 = vmul.f32 %v5316_v51, %v616_v44  ;;  %v5965_v33 = vadd.f32 %v5322_v50, %v760_v45  ;;  %v5968_v24 = vadd.f32 %v5328_v32, %v761_v41 }
 0x120   : > { %8108 = vst [vmem:[#allocation91_spill] sm:$0xff] %v5955_v25  ;;  %8109 = vst [vmem:[#allocation92_spill] sm:$0xff] %v5958_v36  ;;  %v768_v30 = vmul.f32 %v5309_v53, %v611_v10  ;;  %v769_v8 = vmul.f32 %v5316_v51, %v611_v10  ;;  %v917_v25 = vpop.permute.xlu1 %916  ;;  %v5973_v29 = vadd.f32 %v5322_v50, %v766_v5 }
 0x121   : > { %8110 = vst [vmem:[#allocation93_spill] sm:$0xff] %v5965_v33  ;;  %8111 = vst [vmem:[#allocation94_spill] sm:$0xff] %v5968_v24  ;;  %v5976_v36 = vadd.f32 %v5328_v32, %v767_v19  ;;  %v1185_v44 = vmul.f32 %v5346_v54, %v917_v25  ;;  %v1186_v6 = vmul.f32 %v5348_v57, %v917_v25 }
 0x122   : > { %8112 = vst [vmem:[#allocation95_spill] sm:$0xff] %v5973_v29  ;;  %v5981_v45 = vadd.f32 %v5322_v50, %v764_v43  ;;  %v5984_v41 = vadd.f32 %v5328_v32, %v765_v47  ;;  %v774_v24 = vmul.f32 %v5309_v53, %v626_v48  ;;  %v775_v10 = vmul.f32 %v5316_v51, %v626_v48 }
 0x123   : > { %8113 = vst [vmem:[#allocation96_spill] sm:$0xff] %v5976_v36  ;;  %v5989_v5 = vadd.f32 %v5322_v50, %v770_v28  ;;  %v5992_v19 = vadd.f32 %v5328_v32, %v771_v55  ;;  %v1311_v36 = vadd.f32 %v1185_v44, %v5363_v52  ;;  %v1312_v25 = vadd.f32 %v1186_v6, %v5370_v62  ;;  %v921_v28 = vpop.permute.xlu0 %920 }
 0x124   : > { %8114 = vst [vmem:[#allocation97_spill] sm:$0xff] %v5981_v45  ;;  %8115 = vst [vmem:[#allocation98_spill] sm:$0xff] %v5984_v41  ;;  %v5997_v43 = vadd.f32 %v5322_v50, %v768_v30  ;;  %v6000_v47 = vadd.f32 %v5328_v32, %v769_v8  ;;  %v772_v29 = vmul.f32 %v5309_v53, %v621_v18  ;;  %v925_v41 = vpop.permute.xlu1 %924 }
 0x125   : > { %8116 = vst [vmem:[#allocation99_spill] sm:$0xff] %v5989_v5  ;;  %8117 = vst [vmem:[#allocation100_spill] sm:$0xff] %v5992_v19  ;;  %v773_v48 = vmul.f32 %v5316_v51, %v621_v18  ;;  %v1437_v5 = vmul.f32 0.31830987, %v1311_v36  ;;  %v1438_v45 = vmul.f32 0.31830987, %v1312_v25  ;;  %v1189_v55 = vmul.f32 %v5346_v54, %v925_v41 }
 0x126   : > { %8118 = vst [vmem:[#allocation101_spill] sm:$0xff] %v5997_v43  ;;  %8119 = vst [vmem:[#allocation102_spill] sm:$0xff] %v6000_v47  ;;  %v1190_v52 = vmul.f32 %v5348_v57, %v925_v41  ;;  %v6007_v62 = vadd.f32 %v5322_v50, %v774_v24  ;;  %v6010_v6 = vadd.f32 %v5328_v32, %v775_v10  ;;  %v8122_v19 = vld [vmem:[#allocation22_spill] sm:$0xff]  ;;  %v8123_v43 = vld [vmem:[#allocation23_spill] sm:$0xff] }
 0x127   : > { %v1187_v30 = vmul.f32 %v5346_v54, %v921_v28  ;;  %v1188_v8 = vmul.f32 %v5348_v57, %v921_v28  ;;  %v4607_v44 = vround.rtne.f32 %v1437_v5  ;;  %v4608_v18 = vround.rtne.f32 %v1438_v45 }
 0x128   : > { %8120 = vst [vmem:[#allocation103_spill] sm:$0xff] %v6007_v62  ;;  %8121 = vst [vmem:[#allocation104_spill] sm:$0xff] %v6010_v6  ;;  %v1315_v47 = vadd.f32 %v1189_v55, %v8122_v19  ;;  %v1316_v33 = vadd.f32 %v1190_v52, %v8123_v43  ;;  %v6017_v34 = vadd.f32 %v5322_v50, %v772_v29 }
 0x129   : > { %v6020_v41 = vadd.f32 %v5328_v32, %v773_v48  ;;  %v6023_v24 = vadd.f32 %v1187_v30, %v5387_v61  ;;  %v6026_v10 = vadd.f32 %v1188_v8, %v5394_v2  ;;  %v1689_v6 = vmul.f32 3.140625, %v4607_v44 }
 0x12a   : > { %8124 = vst [vmem:[#allocation22_spill] sm:$0xff] %v6017_v34  ;;  %v1690_v28 = vmul.f32 3.140625, %v4608_v18  ;;  %v1941_v5 = vmul.f32 0.0009676536, %v4607_v44  ;;  %v1942_v45 = vmul.f32 0.0009676536, %v4608_v18 }
 0x12b   : > { %8125 = vst [vmem:[#allocation23_spill] sm:$0xff] %v6020_v41  ;;  %v3453_v62 = vmul.f32 0.5, %v4607_v44  ;;  %v3454_v19 = vmul.f32 0.5, %v4608_v18  ;;  %v1441_v55 = vmul.f32 0.31830987, %v1315_v47  ;;  %v1815_v52 = vsub.f32 %v1311_v36, %v1689_v6 }
 0x12c   : > { %v1442_v43 = vmul.f32 0.31830987, %v1316_v33  ;;  %v1816_v29 = vsub.f32 %v1312_v25, %v1690_v28  ;;  %v1439_v34 = vmul.f32 0.31830987, %v6023_v24  ;;  %v1440_v48 = vmul.f32 0.31830987, %v6026_v10 }
 0x12d   : > { %v3579_v41 = vfloor.f32 %v3453_v62  ;;  %v3580_v61 = vfloor.f32 %v3454_v19  ;;  %v4611_v30 = vround.rtne.f32 %v1441_v55  ;;  %v6030_v2 = vsub.f32 %v1815_v52, %v1941_v5 }
 0x12e   : > { %v4612_v38 = vround.rtne.f32 %v1442_v43  ;;  %v6032_v8 = vsub.f32 %v1816_v29, %v1942_v45  ;;  %v6034_v17 = vround.rtne.f32 %v1439_v34  ;;  %v6036_v60 = vround.rtne.f32 %v1440_v48 }
 0x12f   : > { %v3705_v26 = vmul.f32 2.0, %v3579_v41  ;;  %v3706_v40 = vmul.f32 2.0, %v3580_v61  ;;  %v1693_v36 = vmul.f32 3.140625, %v4611_v30  ;;  %v2193_v6 = vmul.f32 %v6030_v2, %v6030_v2 }
 0x130   : > { %v1694_v25 = vmul.f32 3.140625, %v4612_v38  ;;  %v2194_v62 = vmul.f32 %v6032_v8, %v6032_v8  ;;  %v1945_v28 = vmul.f32 0.0009676536, %v4611_v30  ;;  %v1946_v19 = vmul.f32 0.0009676536, %v4612_v38 }
 0x131   : > { %v3831_v5 = vsub.f32 %v4607_v44, %v3705_v26  ;;  %v3832_v55 = vsub.f32 %v4608_v18, %v3706_v40  ;;  %v1819_v45 = vsub.f32 %v1315_v47, %v1693_v36  ;;  %v2319_v34 = vmul.f32 2.7557319e-06, %v2193_v6 }
 0x132   : > { %v1820_v43 = vsub.f32 %v1316_v33, %v1694_v25  ;;  %v2320_v52 = vmul.f32 2.7557319e-06, %v2194_v62  ;;  %v3457_v29 = vmul.f32 0.5, %v4611_v30  ;;  %v3458_v48 = vmul.f32 0.5, %v4612_v38 }
 0x133   : > { %v6042_v41 = vmul.f32 2.0, %v3831_v5  ;;  %v6044_v61 = vmul.f32 2.0, %v3832_v55  ;;  %v6046_v27 = vsub.f32 %v1819_v45, %v1945_v28  ;;  %v2445_v23 = vadd.f32 -0.0001984127, %v2319_v34 }
 0x134   : > { %v6048_v49 = vsub.f32 %v1820_v43, %v1946_v19  ;;  %v2446_v46 = vadd.f32 -0.0001984127, %v2320_v52  ;;  %v3583_v22 = vfloor.f32 %v3457_v29  ;;  %v3584_v20 = vfloor.f32 %v3458_v48 }
 0x135   : > { %v2197_v33 = vmul.f32 %v6046_v27, %v6046_v27  ;;  %v2571_v44 = vmul.f32 %v2445_v23, %v2193_v6  ;;  %v1691_v5 = vmul.f32 3.140625, %v6034_v17  ;;  %v1692_v55 = vmul.f32 3.140625, %v6036_v60 }
 0x136   : > { %v2198_v47 = vmul.f32 %v6048_v49, %v6048_v49  ;;  %v2572_v18 = vmul.f32 %v2446_v46, %v2194_v62  ;;  %v3709_v36 = vmul.f32 2.0, %v3583_v22  ;;  %v3710_v25 = vmul.f32 2.0, %v3584_v20 }
 0x137   : > { %v2323_v28 = vmul.f32 2.7557319e-06, %v2197_v33  ;;  %v2697_v45 = vadd.f32 0.008333334, %v2571_v44  ;;  %v1817_v26 = vsub.f32 %v6023_v24, %v1691_v5  ;;  %v1818_v23 = vsub.f32 %v6026_v10, %v1692_v55 }
 0x138   : > { %v2324_v19 = vmul.f32 2.7557319e-06, %v2198_v47  ;;  %v2698_v43 = vadd.f32 0.008333334, %v2572_v18  ;;  %v3835_v34 = vsub.f32 %v4611_v30, %v3709_v36  ;;  %v3836_v52 = vsub.f32 %v4612_v38, %v3710_v25 }
 0x139   : > { %v2449_v29 = vadd.f32 -0.0001984127, %v2323_v28  ;;  %v2823_v46 = vmul.f32 %v2697_v45, %v2193_v6  ;;  %v1943_v44 = vmul.f32 0.0009676536, %v6034_v17  ;;  %v1944_v38 = vmul.f32 0.0009676536, %v6036_v60 }
 0x13a   : > { %v2450_v48 = vadd.f32 -0.0001984127, %v2324_v19  ;;  %v2824_v22 = vmul.f32 %v2698_v43, %v2194_v62  ;;  %v6060_v20 = vmul.f32 2.0, %v3835_v34  ;;  %v6062_v40 = vmul.f32 2.0, %v3836_v52  ;;  %v929_v34 = vpop.permute.xlu1 %928 }
 0x13b   : > { %v2575_v42 = vmul.f32 %v2449_v29, %v2197_v33  ;;  %v2949_v30 = vadd.f32 -0.16666667, %v2823_v46  ;;  %v6069_v28 = vsub.f32 %v1817_v26, %v1943_v44  ;;  %v6071_v19 = vsub.f32 %v1818_v23, %v1944_v38 }
 0x13c   : > { %v2576_v39 = vmul.f32 %v2450_v48, %v2198_v47  ;;  %v2950_v18 = vadd.f32 -0.16666667, %v2824_v22  ;;  %v4087_v24 = vsub.f32 1.0, %v6060_v20  ;;  %v4088_v10 = vsub.f32 1.0, %v6062_v40 }
 0x13d   : > { %v2701_v36 = vadd.f32 0.008333334, %v2575_v42  ;;  %v3075_v5 = vmul.f32 %v2949_v30, %v2193_v6  ;;  %v3455_v45 = vmul.f32 0.5, %v6034_v17  ;;  %v3456_v43 = vmul.f32 0.5, %v6036_v60 }
 0x13e   : > { %v2702_v25 = vadd.f32 0.008333334, %v2576_v39  ;;  %v3076_v55 = vmul.f32 %v2950_v18, %v2194_v62  ;;  %v2195_v40 = vmul.f32 %v6069_v28, %v6069_v28  ;;  %v6081_v39 = vmul.f32 %v6071_v19, %v6071_v19 }
 0x13f   : > { %v2827_v52 = vmul.f32 %v2701_v36, %v2197_v33  ;;  %v3201_v42 = vmul.f32 %v3075_v5, %v6030_v2  ;;  %v3581_v62 = vfloor.f32 %v3455_v45  ;;  %v3582_v26 = vfloor.f32 %v3456_v43 }
 0x140   : > { %v2828_v29 = vmul.f32 %v2702_v25, %v2198_v47  ;;  %v3202_v6 = vmul.f32 %v3076_v55, %v6032_v8  ;;  %v2321_v46 = vmul.f32 2.7557319e-06, %v2195_v40  ;;  %v1191_v22 = vmul.f32 %v5346_v54, %v929_v34 }
 0x141   : > { %v2953_v48 = vadd.f32 -0.16666667, %v2827_v52  ;;  %v3327_v20 = vadd.f32 %v3201_v42, %v6030_v2  ;;  %v2322_v38 = vmul.f32 2.7557319e-06, %v6081_v39  ;;  %v3707_v30 = vmul.f32 2.0, %v3581_v62 }
 0x142   : > { %v2954_v23 = vadd.f32 -0.16666667, %v2828_v29  ;;  %v3328_v44 = vadd.f32 %v3202_v6, %v6032_v8  ;;  %v2447_v25 = vadd.f32 -0.0001984127, %v2321_v46  ;;  %v3708_v5 = vmul.f32 2.0, %v3582_v26 }
 0x143   : > { %v3079_v18 = vmul.f32 %v2953_v48, %v2197_v33  ;;  %v8126_v55 = vsub.f32 1.0, %v6042_v41  ;;  %v8127_v43 = vsub.f32 1.0, %v6044_v61  ;;  %v2448_v29 = vadd.f32 -0.0001984127, %v2322_v38 }
 0x144   : > { %v3080_v36 = vmul.f32 %v2954_v23, %v2198_v47  ;;  %v3833_v15 = vsub.f32 %v6034_v17, %v3707_v30  ;;  %v2573_v42 = vmul.f32 %v2447_v25, %v2195_v40  ;;  %v3834_v6 = vsub.f32 %v6036_v60, %v3708_v5  ;;  %v8128_v47 = vld [vmem:[#allocation24_spill] sm:$0xff]  ;;  %v933_v23 = vpop.permute.xlu0 %932 }
 0x145   : > { %v4209_v45 = vmul.f32 %v8126_v55, %v3327_v20  ;;  %v4210_v52 = vmul.f32 %v8127_v43, %v3328_v44  ;;  %v3205_v2 = vmul.f32 %v3079_v18, %v6046_v27  ;;  %v2574_v41 = vmul.f32 %v2448_v29, %v6081_v39 }
 0x146   : > { %v3206_v8 = vmul.f32 %v3080_v36, %v6048_v49  ;;  %v3959_v61 = vmul.f32 2.0, %v3833_v15  ;;  %v1192_v33 = vmul.f32 %v5348_v57, %v929_v34  ;;  %v1317_v17 = vadd.f32 %v1191_v22, %v8128_v47  ;;  %v6111_v34 = vpop.permute.xlu1 %936 }
 0x147   : > { %4335 = vst [vmem:[%s6097_s11] sm:$0xff] %v4209_v45  ;;  %4336 = vst [vmem:[%s6097_s11 + $0x8] sm:$0xff] %v4210_v52  ;;  %v3331_v62 = vadd.f32 %v3205_v2, %v6046_v27  ;;  %v2699_v48 = vadd.f32 0.008333334, %v2573_v42  ;;  %v3960_v60 = vmul.f32 2.0, %v3834_v6  ;;  %v6108_v46 = vmul.f32 %v5309_v53, %v5962_v56 }
 0x148   : > { %v3332_v26 = vadd.f32 %v3206_v8, %v6048_v49  ;;  %v2700_v20 = vadd.f32 0.008333334, %v2574_v41  ;;  %v1318_v15 = vadd.f32 %v1192_v33, %v5384_v63  ;;  %v1443_v44 = vmul.f32 0.31830987, %v1317_v17 }
 0x149   : > { %v4213_v22 = vmul.f32 %v4087_v24, %v3331_v62  ;;  %v2825_v27 = vmul.f32 %v2699_v48, %v2195_v40  ;;  %v4085_v30 = vsub.f32 1.0, %v3959_v61  ;;  %v1193_v25 = vmul.f32 %v5346_v54, %v933_v23 }
 0x14a   : > { %v4214_v38 = vmul.f32 %v4088_v10, %v3332_v26  ;;  %v2826_v49 = vmul.f32 %v2700_v20, %v6081_v39  ;;  %v1444_v18 = vmul.f32 0.31830987, %v1318_v15  ;;  %v4613_v36 = vround.rtne.f32 %v1443_v44 }
 0x14b   : > { %4339 = vst [vmem:[%s6097_s11 + $0x20] sm:$0xff] %v4213_v22  ;;  %v2951_v53 = vadd.f32 -0.16666667, %v2825_v27  ;;  %v4086_v5 = vsub.f32 1.0, %v3960_v60  ;;  %v1194_v55 = vmul.f32 %v5348_v57, %v933_v23  ;;  %v1195_v63 = vmul.f32 %v5346_v54, %v6111_v34 }
 0x14c   : > { %4340 = vst [vmem:[%s6097_s11 + $0x28] sm:$0xff] %v4214_v38  ;;  %v2952_v45 = vadd.f32 -0.16666667, %v2826_v49  ;;  %v4614_v24 = vround.rtne.f32 %v1444_v18  ;;  %v1695_v10 = vmul.f32 3.140625, %v4613_v36  ;;  %v1947_v43 = vmul.f32 0.0009676536, %v4613_v36 }
 0x14d   : > { %v3077_v52 = vmul.f32 %v2951_v53, %v2195_v40  ;;  %v3459_v29 = vmul.f32 0.5, %v4613_v36  ;;  %v1319_v2 = vadd.f32 %v1193_v25, %v5407_v0  ;;  %v1320_v8 = vadd.f32 %v1194_v55, %v5414_v59 }
 0x14e   : > { %v3078_v42 = vmul.f32 %v2952_v45, %v6081_v39  ;;  %v1696_v6 = vmul.f32 3.140625, %v4614_v24  ;;  %v1821_v41 = vsub.f32 %v1317_v17, %v1695_v10  ;;  %v1948_v61 = vmul.f32 0.0009676536, %v4614_v24 }
 0x14f   : > { %v3203_v33 = vmul.f32 %v3077_v52, %v6069_v28  ;;  %v3460_v47 = vmul.f32 0.5, %v4614_v24  ;;  %v3585_v62 = vfloor.f32 %v3459_v29  ;;  %v1445_v26 = vmul.f32 0.31830987, %v1319_v2 }
 0x150   : > { %v3204_v48 = vmul.f32 %v3078_v42, %v6071_v19  ;;  %v1822_v60 = vsub.f32 %v1318_v15, %v1696_v6  ;;  %v6125_v23 = vsub.f32 %v1821_v41, %v1947_v43  ;;  %v1446_v40 = vmul.f32 0.31830987, %v1320_v8 }
 0x151   : > { %v3329_v0 = vadd.f32 %v3203_v33, %v6069_v28  ;;  %v3586_v59 = vfloor.f32 %v3460_v47  ;;  %v3711_v20 = vmul.f32 2.0, %v3585_v62  ;;  %v4615_v39 = vround.rtne.f32 %v1445_v26  ;;  %v8129_v26 = vld [vmem:[#allocation25_spill] sm:$0xff] }
 0x152   : > { %v3330_v17 = vadd.f32 %v3204_v48, %v6071_v19  ;;  %v6129_v44 = vsub.f32 %v1822_v60, %v1948_v61  ;;  %v2199_v22 = vmul.f32 %v6125_v23, %v6125_v23  ;;  %v4616_v38 = vround.rtne.f32 %v1446_v40 }
 0x153   : > { %v4211_v27 = vmul.f32 %v4085_v30, %v3329_v0  ;;  %v3712_v15 = vmul.f32 2.0, %v3586_v59  ;;  %v3837_v49 = vsub.f32 %v4613_v36, %v3711_v20  ;;  %v1697_v18 = vmul.f32 3.140625, %v4615_v39 }
 0x154   : > { %v4212_v25 = vmul.f32 %v4086_v5, %v3330_v17  ;;  %v2200_v28 = vmul.f32 %v6129_v44, %v6129_v44  ;;  %v2325_v53 = vmul.f32 2.7557319e-06, %v2199_v22  ;;  %v1698_v55 = vmul.f32 3.140625, %v4616_v38  ;;  %v8130_v17 = vld [vmem:[#allocation26_spill] sm:$0xff] }
 0x155   : > { %4337 = vst [vmem:[%s6097_s11 + $0x10] sm:$0xff] %v4211_v27  ;;  %v3838_v45 = vsub.f32 %v4614_v24, %v3712_v15  ;;  %v6136_v19 = vmul.f32 2.0, %v3837_v49  ;;  %v1823_v10 = vsub.f32 %v1319_v2, %v1697_v18  ;;  %v1949_v43 = vmul.f32 0.0009676536, %v4615_v39 }
 0x156   : > { %4338 = vst [vmem:[%s6097_s11 + $0x18] sm:$0xff] %v4212_v25  ;;  %v2326_v52 = vmul.f32 2.7557319e-06, %v2200_v28  ;;  %v2451_v29 = vadd.f32 -0.0001984127, %v2325_v53  ;;  %v1824_v42 = vsub.f32 %v1320_v8, %v1698_v55  ;;  %v3461_v5 = vmul.f32 0.5, %v4615_v39 }
 0x157   : > { %v1950_v30 = vmul.f32 0.0009676536, %v4616_v38  ;;  %v6139_v6 = vmul.f32 2.0, %v3838_v45  ;;  %v6141_v36 = vsub.f32 %v1823_v10, %v1949_v43  ;;  %v1196_v41 = vmul.f32 %v5348_v57, %v6111_v34 }
 0x158   : > { %v2452_v61 = vadd.f32 -0.0001984127, %v2326_v52  ;;  %v2577_v33 = vmul.f32 %v2451_v29, %v2199_v22  ;;  %v3462_v47 = vmul.f32 0.5, %v4616_v38  ;;  %v4089_v2 = vsub.f32 1.0, %v6136_v19 }
 0x159   : > { %v6145_v24 = vsub.f32 %v1824_v42, %v1950_v30  ;;  %v2201_v62 = vmul.f32 %v6141_v36, %v6141_v36  ;;  %v3587_v8 = vfloor.f32 %v3461_v5  ;;  %v1321_v48 = vadd.f32 %v1195_v63, %v8129_v26 }
 0x15a   : > { %v2578_v60 = vmul.f32 %v2452_v61, %v2200_v28  ;;  %v2703_v40 = vadd.f32 0.008333334, %v2577_v33  ;;  %v3588_v59 = vfloor.f32 %v3462_v47  ;;  %v1322_v27 = vadd.f32 %v1196_v41, %v8130_v17 }
 0x15b   : > { %v2202_v0 = vmul.f32 %v6145_v24, %v6145_v24  ;;  %v2327_v34 = vmul.f32 2.7557319e-06, %v2201_v62  ;;  %v3713_v20 = vmul.f32 2.0, %v3587_v8  ;;  %v1447_v15 = vmul.f32 0.31830987, %v1321_v48 }
 0x15c   : > { %v2704_v49 = vadd.f32 0.008333334, %v2578_v60  ;;  %v2829_v18 = vmul.f32 %v2703_v40, %v2199_v22  ;;  %v3714_v53 = vmul.f32 2.0, %v3588_v59  ;;  %v1448_v19 = vmul.f32 0.31830987, %v1322_v27 }
 0x15d   : > { %v2328_v25 = vmul.f32 2.7557319e-06, %v2202_v0  ;;  %v2453_v55 = vadd.f32 -0.0001984127, %v2327_v34  ;;  %v3839_v45 = vsub.f32 %v4615_v39, %v3713_v20  ;;  %v6154_v10 = vround.rtne.f32 %v1447_v15 }
 0x15e   : > { %v2830_v63 = vmul.f32 %v2704_v49, %v2200_v28  ;;  %v2955_v43 = vadd.f32 -0.16666667, %v2829_v18  ;;  %v3840_v29 = vsub.f32 %v4616_v38, %v3714_v53  ;;  %v6156_v5 = vround.rtne.f32 %v1448_v19 }
 0x15f   : > { %v2454_v52 = vadd.f32 -0.0001984127, %v2328_v25  ;;  %v2579_v42 = vmul.f32 %v2453_v55, %v2201_v62  ;;  %v3965_v30 = vmul.f32 2.0, %v3839_v45  ;;  %v1699_v41 = vmul.f32 3.140625, %v6154_v10 }
 0x160   : > { %v2956_v61 = vadd.f32 -0.16666667, %v2830_v63  ;;  %v3081_v33 = vmul.f32 %v2955_v43, %v2199_v22  ;;  %v4090_v47 = vsub.f32 1.0, %v6139_v6  ;;  %v3966_v39 = vmul.f32 2.0, %v3840_v29 }
 0x161   : > { %v2580_v8 = vmul.f32 %v2454_v52, %v2202_v0  ;;  %v2705_v26 = vadd.f32 0.008333334, %v2579_v42  ;;  %v1700_v60 = vmul.f32 3.140625, %v6156_v5  ;;  %v1825_v40 = vsub.f32 %v1321_v48, %v1699_v41 }
 0x162   : > { %v3082_v59 = vmul.f32 %v2956_v61, %v2200_v28  ;;  %v3207_v34 = vmul.f32 %v3081_v33, %v6125_v23  ;;  %v4091_v20 = vsub.f32 1.0, %v3965_v30  ;;  %v1951_v49 = vmul.f32 0.0009676536, %v6154_v10 }
 0x163   : > { %v2706_v38 = vadd.f32 0.008333334, %v2580_v8  ;;  %v2831_v17 = vmul.f32 %v2705_v26, %v2201_v62  ;;  %v1826_v15 = vsub.f32 %v1322_v27, %v1700_v60  ;;  %v1952_v18 = vmul.f32 0.0009676536, %v6156_v5  ;;  %v941_v27 = vpop.permute.xlu0 %940 }
 0x164   : > { %v3208_v22 = vmul.f32 %v3082_v59, %v6129_v44  ;;  %v3333_v6 = vadd.f32 %v3207_v34, %v6125_v23  ;;  %v3463_v53 = vmul.f32 0.5, %v6154_v10  ;;  %v6167_v28 = vsub.f32 %v1825_v40, %v1951_v49 }
 0x165   : > { %v2832_v25 = vmul.f32 %v2706_v38, %v2202_v0  ;;  %v2957_v48 = vadd.f32 -0.16666667, %v2831_v17  ;;  %v6169_v55 = vsub.f32 %v1826_v15, %v1952_v18  ;;  %v3464_v45 = vmul.f32 0.5, %v6156_v5 }
 0x166   : > { %v3334_v19 = vadd.f32 %v3208_v22, %v6129_v44  ;;  %v4215_v63 = vmul.f32 %v4089_v2, %v3333_v6  ;;  %v3589_v52 = vfloor.f32 %v3463_v53  ;;  %v2203_v23 = vmul.f32 %v6167_v28, %v6167_v28  ;;  %v945_v6 = vpop.permute.xlu1 %944 }
 0x167   : > { %v2958_v43 = vadd.f32 -0.16666667, %v2832_v25  ;;  %v3083_v29 = vmul.f32 %v2957_v48, %v2201_v62  ;;  %v2204_v42 = vmul.f32 %v6169_v55, %v6169_v55  ;;  %v3590_v30 = vfloor.f32 %v3464_v45 }
 0x168   : > { %v4216_v41 = vmul.f32 %v4090_v47, %v3334_v19  ;;  %4341 = vst [vmem:[%s6097_s11 + $0x30] sm:$0xff] %v4215_v63  ;;  %v3715_v33 = vmul.f32 2.0, %v3589_v52  ;;  %v1197_v8 = vmul.f32 %v5346_v54, %v941_v27  ;;  %v2329_v2 = vmul.f32 2.7557319e-06, %v2203_v23 }
 0x169   : > { %v3084_v61 = vmul.f32 %v2958_v43, %v2202_v0  ;;  %v3209_v44 = vmul.f32 %v3083_v29, %v6141_v36  ;;  %v2330_v26 = vmul.f32 2.7557319e-06, %v2204_v42  ;;  %v3716_v60 = vmul.f32 2.0, %v3590_v30  ;;  %v8131_v29 = vld [vmem:[#allocation27_spill] sm:$0xff] }
 0x16a   : > { %4342 = vst [vmem:[%s6097_s11 + $0x38] sm:$0xff] %v4216_v41  ;;  %v3841_v40 = vsub.f32 %v6154_v10, %v3715_v33  ;;  %v1198_v59 = vmul.f32 %v5348_v57, %v941_v27  ;;  %v1323_v34 = vadd.f32 %v1197_v8, %v5431_v4  ;;  %v2455_v0 = vadd.f32 -0.0001984127, %v2329_v2 }
 0x16b   : > { %v3210_v62 = vmul.f32 %v3084_v61, %v6145_v24  ;;  %v3335_v47 = vadd.f32 %v3209_v44, %v6141_v36  ;;  %v2456_v38 = vadd.f32 -0.0001984127, %v2330_v26  ;;  %v3842_v17 = vsub.f32 %v6156_v5, %v3716_v60  ;;  %v8132_v60 = vld [vmem:[#allocation28_spill] sm:$0xff] }
 0x16c   : > { %v4092_v49 = vsub.f32 1.0, %v3966_v39  ;;  %v1324_v18 = vadd.f32 %v1198_v59, %v5438_v1  ;;  %v1449_v22 = vmul.f32 0.31830987, %v1323_v34  ;;  %v6191_v10 = vmul.f32 %v5316_v51, %v5962_v56 }
 0x16d   : > { %v3336_v15 = vadd.f32 %v3210_v62, %v6145_v24  ;;  %v4217_v4 = vmul.f32 %v4091_v20, %v3335_v47  ;;  %v2581_v25 = vmul.f32 %v2455_v0, %v2203_v23  ;;  %v2582_v36 = vmul.f32 %v2456_v38, %v2204_v42 }
 0x16e   : > { %v3967_v48 = vmul.f32 2.0, %v3841_v40  ;;  %v1450_v45 = vmul.f32 0.31830987, %v1324_v18  ;;  %v4619_v27 = vround.rtne.f32 %v1449_v22  ;;  %v3968_v39 = vmul.f32 2.0, %v3842_v17 }
 0x16f   : > { %v4218_v53 = vmul.f32 %v4092_v49, %v3336_v15  ;;  %4343 = vst [vmem:[%s6097_s11 + $0x40] sm:$0xff] %v4217_v4  ;;  %v2707_v5 = vadd.f32 0.008333334, %v2581_v25  ;;  %v2708_v24 = vadd.f32 0.008333334, %v2582_v36  ;;  %v1199_v1 = vmul.f32 %v5346_v54, %v945_v6 }
 0x170   : > { %v6196_v19 = vround.rtne.f32 %v1450_v45  ;;  %v1701_v63 = vmul.f32 3.140625, %v4619_v27  ;;  %v1953_v43 = vmul.f32 0.0009676536, %v4619_v27  ;;  %v3465_v51 = vmul.f32 0.5, %v4619_v27 }
 0x171   : > { %4344 = vst [vmem:[%s6097_s11 + $0x48] sm:$0xff] %v4218_v53  ;;  %v2833_v56 = vmul.f32 %v2707_v5, %v2203_v23  ;;  %v2834_v20 = vmul.f32 %v2708_v24, %v2204_v42  ;;  %v1200_v52 = vmul.f32 %v5348_v57, %v945_v6  ;;  %v1325_v30 = vadd.f32 %v1199_v1, %v8131_v29 }
 0x172   : > { %v1702_v41 = vmul.f32 3.140625, %v6196_v19  ;;  %v1827_v61 = vsub.f32 %v1323_v34, %v1701_v63  ;;  %v1954_v33 = vmul.f32 0.0009676536, %v6196_v19  ;;  %v3466_v8 = vmul.f32 0.5, %v6196_v19 }
 0x173   : > { %v2959_v44 = vadd.f32 -0.16666667, %v2833_v56  ;;  %v2960_v2 = vadd.f32 -0.16666667, %v2834_v20  ;;  %v3591_v26 = vfloor.f32 %v3465_v51  ;;  %v1326_v62 = vadd.f32 %v1200_v52, %v8132_v60  ;;  %v949_v52 = vpop.permute.xlu0 %948 }
 0x174   : > { %v1828_v40 = vsub.f32 %v1324_v18, %v1702_v41  ;;  %v6204_v59 = vsub.f32 %v1827_v61, %v1953_v43  ;;  %v3592_v47 = vfloor.f32 %v3466_v8  ;;  %v1451_v0 = vmul.f32 0.31830987, %v1325_v30 }
 0x175   : > { %v3085_v38 = vmul.f32 %v2959_v44, %v2203_v23  ;;  %v3086_v17 = vmul.f32 %v2960_v2, %v2204_v42  ;;  %v3717_v15 = vmul.f32 2.0, %v3591_v26  ;;  %v1452_v49 = vmul.f32 0.31830987, %v1326_v62 }
 0x176   : > { %v4093_v22 = vsub.f32 1.0, %v3967_v48  ;;  %v6206_v34 = vsub.f32 %v1828_v40, %v1954_v33  ;;  %v2205_v6 = vmul.f32 %v6204_v59, %v6204_v59  ;;  %v6210_v4 = vround.rtne.f32 %v1451_v0 }
 0x177   : > { %v3211_v25 = vmul.f32 %v3085_v38, %v6167_v28  ;;  %v3212_v18 = vmul.f32 %v3086_v17, %v6169_v55  ;;  %v3718_v36 = vmul.f32 2.0, %v3592_v47  ;;  %v6214_v53 = vround.rtne.f32 %v1452_v49 }
 0x178   : > { %v2206_v23 = vmul.f32 %v6206_v34, %v6206_v34  ;;  %v2331_v42 = vmul.f32 2.7557319e-06, %v2205_v6  ;;  %v3843_v45 = vsub.f32 %v4619_v27, %v3717_v15  ;;  %v1703_v48 = vmul.f32 3.140625, %v6210_v4  ;;  %v8133_v15 = vld [vmem:[#allocation31_spill] sm:$0xff] }
 0x179   : > { %v3337_v5 = vadd.f32 %v3211_v25, %v6167_v28  ;;  %v3338_v24 = vadd.f32 %v3212_v18, %v6169_v55  ;;  %v4094_v1 = vsub.f32 1.0, %v3968_v39  ;;  %v1704_v63 = vmul.f32 3.140625, %v6214_v53 }
 0x17a   : > { %v6224_v43 = vadd.f32 %v5322_v50, %v6108_v46  ;;  %v2332_v51 = vmul.f32 2.7557319e-06, %v2206_v23  ;;  %v2457_v56 = vadd.f32 -0.0001984127, %v2331_v42  ;;  %v1829_v20 = vsub.f32 %v1325_v30, %v1703_v48 }
 0x17b   : > { %v4219_v27 = vmul.f32 %v4093_v22, %v3337_v5  ;;  %v4220_v29 = vmul.f32 %v4094_v1, %v3338_v24  ;;  %v3844_v41 = vsub.f32 %v6196_v19, %v3718_v36  ;;  %v1830_v28 = vsub.f32 %v1326_v62, %v1704_v63 }
 0x17c   : > { %v2458_v61 = vadd.f32 -0.0001984127, %v2332_v51  ;;  %v2583_v55 = vmul.f32 %v2457_v56, %v2205_v6  ;;  %v3969_v33 = vmul.f32 2.0, %v3843_v45  ;;  %v1955_v39 = vmul.f32 0.0009676536, %v6210_v4 }
 0x17d   : > { %4345 = vst [vmem:[%s6097_s11 + $0x50] sm:$0xff] %v4219_v27  ;;  %4346 = vst [vmem:[%s6097_s11 + $0x58] sm:$0xff] %v4220_v29  ;;  %v1956_v8 = vmul.f32 0.0009676536, %v6214_v53  ;;  %v3467_v50 = vmul.f32 0.5, %v6210_v4  ;;  %v3468_v46 = vmul.f32 0.5, %v6214_v53  ;;  %v1201_v30 = vmul.f32 %v5346_v54, %v949_v52 }
 0x17e   : > { %v2584_v44 = vmul.f32 %v2458_v61, %v2206_v23  ;;  %v2709_v2 = vadd.f32 0.008333334, %v2583_v55  ;;  %v6234_v26 = vsub.f32 %v1829_v20, %v1955_v39  ;;  %v1202_v19 = vmul.f32 %v5348_v57, %v949_v52 }
 0x17f   : > { %v6237_v60 = vsub.f32 %v1830_v28, %v1956_v8  ;;  %v3593_v62 = vfloor.f32 %v3467_v50  ;;  %v3594_v40 = vfloor.f32 %v3468_v46  ;;  %v1327_v47 = vadd.f32 %v1201_v30, %v5457_v31  ;;  %v953_v50 = vpop.permute.xlu1 %952 }
 0x180   : > { %v2710_v0 = vadd.f32 0.008333334, %v2584_v44  ;;  %v2835_v38 = vmul.f32 %v2709_v2, %v2205_v6  ;;  %v2207_v17 = vmul.f32 %v6234_v26, %v6234_v26  ;;  %v1328_v49 = vadd.f32 %v1202_v19, %v8133_v15 }
 0x181   : > { %v3970_v22 = vmul.f32 2.0, %v3844_v41  ;;  %v2208_v25 = vmul.f32 %v6237_v60, %v6237_v60  ;;  %v3719_v18 = vmul.f32 2.0, %v3593_v62  ;;  %v1453_v36 = vmul.f32 0.31830987, %v1327_v47 }
 0x182   : > { %v2836_v42 = vmul.f32 %v2710_v0, %v2206_v23  ;;  %v2961_v45 = vadd.f32 -0.16666667, %v2835_v38  ;;  %v2333_v48 = vmul.f32 2.7557319e-06, %v2207_v17  ;;  %v1454_v5 = vmul.f32 0.31830987, %v1328_v49 }
 0x183   : > { %v2334_v24 = vmul.f32 2.7557319e-06, %v2208_v25  ;;  %v3720_v1 = vmul.f32 2.0, %v3594_v40  ;;  %v3845_v31 = vsub.f32 %v6210_v4, %v3719_v18  ;;  %v6246_v63 = vround.rtne.f32 %v1453_v36 }
 0x184   : > { %v2962_v51 = vadd.f32 -0.16666667, %v2836_v42  ;;  %v3087_v56 = vmul.f32 %v2961_v45, %v2205_v6  ;;  %v2459_v20 = vadd.f32 -0.0001984127, %v2333_v48  ;;  %v6248_v52 = vround.rtne.f32 %v1454_v5 }
 0x185   : > { %v4095_v27 = vsub.f32 1.0, %v3969_v33  ;;  %v4096_v29 = vsub.f32 1.0, %v3970_v22  ;;  %v2460_v41 = vadd.f32 -0.0001984127, %v2334_v24  ;;  %v1705_v28 = vmul.f32 3.140625, %v6246_v63 }
 0x186   : > { %v3088_v61 = vmul.f32 %v2962_v51, %v2206_v23  ;;  %v3213_v55 = vmul.f32 %v3087_v56, %v6204_v59  ;;  %v2585_v39 = vmul.f32 %v2459_v20, %v2207_v17  ;;  %v1706_v8 = vmul.f32 3.140625, %v6248_v52  ;;  %v8134_v56 = vld [vmem:[#allocation29_spill] sm:$0xff] }
 0x187   : > { %v2586_v4 = vmul.f32 %v2460_v41, %v2208_v25  ;;  %v3846_v46 = vsub.f32 %v6214_v53, %v3720_v1  ;;  %v3971_v30 = vmul.f32 2.0, %v3845_v31  ;;  %v1831_v6 = vsub.f32 %v1327_v47, %v1705_v28 }
 0x188   : > { %v3214_v44 = vmul.f32 %v3088_v61, %v6206_v34  ;;  %v3339_v33 = vadd.f32 %v3213_v55, %v6204_v59  ;;  %v2711_v2 = vadd.f32 0.008333334, %v2585_v39  ;;  %v1832_v19 = vsub.f32 %v1328_v49, %v1706_v8 }
 0x189   : > { %v2712_v62 = vadd.f32 0.008333334, %v2586_v4  ;;  %v1957_v23 = vmul.f32 0.0009676536, %v6246_v63  ;;  %v1958_v40 = vmul.f32 0.0009676536, %v6248_v52  ;;  %v1203_v0 = vmul.f32 %v5346_v54, %v953_v50 }
 0x18a   : > { %v3340_v38 = vadd.f32 %v3214_v44, %v6206_v34  ;;  %v4221_v15 = vmul.f32 %v4095_v27, %v3339_v33  ;;  %v2837_v53 = vmul.f32 %v2711_v2, %v2207_v17  ;;  %v3469_v47 = vmul.f32 0.5, %v6246_v63  ;;  %v8135_v27 = vld [vmem:[#allocation30_spill] sm:$0xff] }
 0x18b   : > { %v2838_v22 = vmul.f32 %v2712_v62, %v2208_v25  ;;  %v6261_v18 = vsub.f32 %v1831_v6, %v1957_v23  ;;  %v6263_v59 = vsub.f32 %v1832_v19, %v1958_v40  ;;  %v3470_v49 = vmul.f32 0.5, %v6248_v52 }
 0x18c   : > { %v4222_v36 = vmul.f32 %v4096_v29, %v3340_v38  ;;  %4347 = vst [vmem:[%s6097_s11 + $0x60] sm:$0xff] %v4221_v15  ;;  %v2963_v42 = vadd.f32 -0.16666667, %v2837_v53  ;;  %v3595_v45 = vfloor.f32 %v3469_v47  ;;  %v1204_v48 = vmul.f32 %v5348_v57, %v953_v50 }
 0x18d   : > { %v2964_v5 = vadd.f32 -0.16666667, %v2838_v22  ;;  %v2209_v34 = vmul.f32 %v6261_v18, %v6261_v18  ;;  %v2210_v24 = vmul.f32 %v6263_v59, %v6263_v59  ;;  %v3596_v1 = vfloor.f32 %v3470_v49  ;;  %v957_v49 = vpop.permute.xlu0 %956 }
 0x18e   : > { %4348 = vst [vmem:[%s6097_s11 + $0x68] sm:$0xff] %v4222_v36  ;;  %v3089_v31 = vmul.f32 %v2963_v42, %v2207_v17  ;;  %v3721_v51 = vmul.f32 2.0, %v3595_v45  ;;  %v1329_v20 = vadd.f32 %v1203_v0, %v8134_v56  ;;  %v1330_v29 = vadd.f32 %v1204_v48, %v8135_v27 }
 0x18f   : > { %v3090_v41 = vmul.f32 %v2964_v5, %v2208_v25  ;;  %v3972_v28 = vmul.f32 2.0, %v3846_v46  ;;  %v2335_v61 = vmul.f32 2.7557319e-06, %v2209_v34  ;;  %v2336_v55 = vmul.f32 2.7557319e-06, %v2210_v24 }
 0x190   : > { %v3215_v39 = vmul.f32 %v3089_v31, %v6234_v26  ;;  %v3722_v8 = vmul.f32 2.0, %v3596_v1  ;;  %v1455_v50 = vmul.f32 0.31830987, %v1329_v20  ;;  %v1456_v4 = vmul.f32 0.31830987, %v1330_v29 }
 0x191   : > { %v3216_v6 = vmul.f32 %v3090_v41, %v6237_v60  ;;  %v2461_v44 = vadd.f32 -0.0001984127, %v2335_v61  ;;  %v2462_v33 = vadd.f32 -0.0001984127, %v2336_v55  ;;  %v3847_v17 = vsub.f32 %v6246_v63, %v3721_v51 }
 0x192   : > { %v3341_v2 = vadd.f32 %v3215_v39, %v6234_v26  ;;  %v4097_v19 = vsub.f32 1.0, %v3971_v30  ;;  %v6279_v62 = vround.rtne.f32 %v1455_v50  ;;  %v6281_v25 = vround.rtne.f32 %v1456_v4 }
 0x193   : > { %v3342_v46 = vadd.f32 %v3216_v6, %v6237_v60  ;;  %v4098_v23 = vsub.f32 1.0, %v3972_v28  ;;  %v2587_v40 = vmul.f32 %v2461_v44, %v2209_v34  ;;  %v2588_v0 = vmul.f32 %v2462_v33, %v2210_v24 }
 0x194   : > { %v4223_v38 = vmul.f32 %v4097_v19, %v3341_v2  ;;  %v3848_v15 = vsub.f32 %v6248_v52, %v3722_v8  ;;  %v1707_v53 = vmul.f32 3.140625, %v6279_v62  ;;  %v1708_v63 = vmul.f32 3.140625, %v6281_v25 }
 0x195   : > { %v4224_v26 = vmul.f32 %v4098_v23, %v3342_v46  ;;  %v2713_v30 = vadd.f32 0.008333334, %v2587_v40  ;;  %v2714_v47 = vadd.f32 0.008333334, %v2588_v0  ;;  %v3973_v22 = vmul.f32 2.0, %v3847_v17  ;;  %v961_v46 = vpop.permute.xlu1 %960 }
 0x196   : > { %4349 = vst [vmem:[%s6097_s11 + $0x70] sm:$0xff] %v4223_v38  ;;  %v1833_v36 = vsub.f32 %v1329_v20, %v1707_v53  ;;  %v1834_v42 = vsub.f32 %v1330_v29, %v1708_v63  ;;  %v1959_v60 = vmul.f32 0.0009676536, %v6279_v62  ;;  %v1960_v45 = vmul.f32 0.0009676536, %v6281_v25 }
 0x197   : > { %4350 = vst [vmem:[%s6097_s11 + $0x78] sm:$0xff] %v4224_v26  ;;  %v2839_v48 = vmul.f32 %v2713_v30, %v2209_v34  ;;  %v2840_v5 = vmul.f32 %v2714_v47, %v2210_v24  ;;  %v3471_v52 = vmul.f32 0.5, %v6279_v62  ;;  %v3472_v1 = vmul.f32 0.5, %v6281_v25 }
 0x198   : > { %v6293_v31 = vsub.f32 %v1833_v36, %v1959_v60  ;;  %v6295_v51 = vsub.f32 %v1834_v42, %v1960_v45  ;;  %v1205_v56 = vmul.f32 %v5346_v54, %v957_v49  ;;  %v1206_v20 = vmul.f32 %v5348_v57, %v957_v49 }
 0x199   : > { %v2965_v27 = vadd.f32 -0.16666667, %v2839_v48  ;;  %v2966_v29 = vadd.f32 -0.16666667, %v2840_v5  ;;  %v3597_v41 = vfloor.f32 %v3471_v52  ;;  %v3598_v28 = vfloor.f32 %v3472_v1 }
 0x19a   : > { %v2211_v61 = vmul.f32 %v6293_v31, %v6293_v31  ;;  %v2212_v55 = vmul.f32 %v6295_v51, %v6295_v51  ;;  %v1331_v39 = vadd.f32 %v1205_v56, %v5481_v21  ;;  %v1332_v8 = vadd.f32 %v1206_v20, %v5484_v7 }
 0x19b   : > { %v3091_v50 = vmul.f32 %v2965_v27, %v2209_v34  ;;  %v3092_v4 = vmul.f32 %v2966_v29, %v2210_v24  ;;  %v3974_v6 = vmul.f32 2.0, %v3848_v15  ;;  %v4099_v44 = vsub.f32 1.0, %v3973_v22 }
 0x19c   : > { %v6307_v33 = vadd.f32 %v5328_v32, %v6191_v10  ;;  %v2337_v17 = vmul.f32 2.7557319e-06, %v2211_v61  ;;  %v2338_v2 = vmul.f32 2.7557319e-06, %v2212_v55  ;;  %v1457_v19 = vmul.f32 0.31830987, %v1331_v39 }
 0x19d   : > { %v3217_v23 = vmul.f32 %v3091_v50, %v6261_v18  ;;  %v3218_v40 = vmul.f32 %v3092_v4, %v6263_v59  ;;  %v3723_v0 = vmul.f32 2.0, %v3597_v41  ;;  %v3724_v21 = vmul.f32 2.0, %v3598_v28 }
 0x19e   : > { %v2463_v38 = vadd.f32 -0.0001984127, %v2337_v17  ;;  %v2464_v7 = vadd.f32 -0.0001984127, %v2338_v2  ;;  %v1458_v34 = vmul.f32 0.31830987, %v1332_v8  ;;  %v6311_v24 = vround.rtne.f32 %v1457_v19 }
 0x19f   : > { %v3343_v15 = vadd.f32 %v3217_v23, %v6261_v18  ;;  %v3344_v32 = vadd.f32 %v3218_v40, %v6263_v59  ;;  %v4100_v10 = vsub.f32 1.0, %v3974_v6  ;;  %v1207_v53 = vmul.f32 %v5346_v54, %v961_v46  ;;  %v8136_v6 = vld [vmem:[#allocation32_spill] sm:$0xff] }
 0x1a0   : > { %v2589_v63 = vmul.f32 %v2463_v38, %v2211_v61  ;;  %v2590_v26 = vmul.f32 %v2464_v7, %v2212_v55  ;;  %v6316_v30 = vround.rtne.f32 %v1458_v34  ;;  %v1709_v47 = vmul.f32 3.140625, %v6311_v24 }
 0x1a1   : > { %v4225_v22 = vmul.f32 %v4099_v44, %v3343_v15  ;;  %v4226_v49 = vmul.f32 %v4100_v10, %v3344_v32  ;;  %v3849_v36 = vsub.f32 %v6279_v62, %v3723_v0  ;;  %v3850_v42 = vsub.f32 %v6281_v25, %v3724_v21 }
 0x1a2   : > { %v2715_v18 = vadd.f32 0.008333334, %v2589_v63  ;;  %v2716_v60 = vadd.f32 0.008333334, %v2590_v26  ;;  %v1710_v59 = vmul.f32 3.140625, %v6316_v30  ;;  %v1835_v45 = vsub.f32 %v1331_v39, %v1709_v47 }
 0x1a3   : > { %4351 = vst [vmem:[%s6097_s11 + $0x80] sm:$0xff] %v4225_v22  ;;  %4352 = vst [vmem:[%s6097_s11 + $0x88] sm:$0xff] %v4226_v49  ;;  %v1961_v48 = vmul.f32 0.0009676536, %v6311_v24  ;;  %v1962_v5 = vmul.f32 0.0009676536, %v6316_v30  ;;  %v1208_v25 = vmul.f32 %v5348_v57, %v961_v46  ;;  %v1333_v28 = vadd.f32 %v1207_v53, %v5471_v58 }
 0x1a4   : > { %v3473_v52 = vmul.f32 0.5, %v6311_v24  ;;  %v3474_v1 = vmul.f32 0.5, %v6316_v30  ;;  %v2841_v56 = vmul.f32 %v2715_v18, %v2211_v61  ;;  %v2842_v20 = vmul.f32 %v2716_v60, %v2212_v55 }
 0x1a5   : > { %v1836_v62 = vsub.f32 %v1332_v8, %v1710_v59  ;;  %v6329_v27 = vsub.f32 %v1835_v45, %v1961_v48  ;;  %v1334_v44 = vadd.f32 %v1208_v25, %v8136_v6  ;;  %v3975_v17 = vmul.f32 2.0, %v3849_v36  ;;  %v965_v36 = vpop.permute.xlu0 %964 }
 0x1a6   : > { %v3599_v29 = vfloor.f32 %v3473_v52  ;;  %v3600_v41 = vfloor.f32 %v3474_v1  ;;  %v2967_v39 = vadd.f32 -0.16666667, %v2841_v56  ;;  %v2968_v50 = vadd.f32 -0.16666667, %v2842_v20 }
 0x1a7   : > { %v6332_v4 = vsub.f32 %v1836_v62, %v1962_v5  ;;  %v3976_v2 = vmul.f32 2.0, %v3850_v42  ;;  %v2213_v19 = vmul.f32 %v6329_v27, %v6329_v27  ;;  %v1459_v8 = vmul.f32 0.31830987, %v1333_v28 }
 0x1a8   : > { %v3093_v23 = vmul.f32 %v2967_v39, %v2211_v61  ;;  %v3094_v46 = vmul.f32 %v2968_v50, %v2212_v55  ;;  %v1460_v0 = vmul.f32 0.31830987, %v1334_v44  ;;  %v3725_v58 = vmul.f32 2.0, %v3599_v29 }
 0x1a9   : > { %v2214_v40 = vmul.f32 %v6332_v4, %v6332_v4  ;;  %v2339_v21 = vmul.f32 2.7557319e-06, %v2213_v19  ;;  %v3726_v38 = vmul.f32 2.0, %v3600_v41  ;;  %v6339_v7 = vround.rtne.f32 %v1459_v8 }
 0x1aa   : > { %v3219_v34 = vmul.f32 %v3093_v23, %v6293_v31  ;;  %v3220_v15 = vmul.f32 %v3094_v46, %v6295_v51  ;;  %v6343_v10 = vround.rtne.f32 %v1460_v0  ;;  %v4101_v53 = vsub.f32 1.0, %v3975_v17 }
 0x1ab   : > { %v2340_v32 = vmul.f32 2.7557319e-06, %v2214_v40  ;;  %v4102_v63 = vsub.f32 1.0, %v3976_v2  ;;  %v2465_v61 = vadd.f32 -0.0001984127, %v2339_v21  ;;  %v1711_v55 = vmul.f32 3.140625, %v6339_v7 }
 0x1ac   : > { %v3345_v26 = vadd.f32 %v3219_v34, %v6293_v31  ;;  %v3346_v47 = vadd.f32 %v3220_v15, %v6295_v51  ;;  %v1712_v49 = vmul.f32 3.140625, %v6343_v10  ;;  %v3851_v18 = vsub.f32 %v6311_v24, %v3725_v58 }
 0x1ad   : > { %v2466_v22 = vadd.f32 -0.0001984127, %v2340_v32  ;;  %v2591_v42 = vmul.f32 %v2465_v61, %v2213_v19  ;;  %v3852_v60 = vsub.f32 %v6316_v30, %v3726_v38  ;;  %v1837_v59 = vsub.f32 %v1333_v28, %v1711_v55 }
 0x1ae   : > { %v4227_v45 = vmul.f32 %v4101_v53, %v3345_v26  ;;  %v4228_v48 = vmul.f32 %v4102_v63, %v3346_v47  ;;  %v1838_v52 = vsub.f32 %v1334_v44, %v1712_v49  ;;  %v1963_v31 = vmul.f32 0.0009676536, %v6339_v7  ;;  %v8137_v44 = vld [vmem:[#allocation35_spill] sm:$0xff] }
 0x1af   : > { %v2592_v5 = vmul.f32 %v2466_v22, %v2214_v40  ;;  %v2717_v1 = vadd.f32 0.008333334, %v2591_v42  ;;  %v1964_v51 = vmul.f32 0.0009676536, %v6343_v10  ;;  %v1209_v56 = vmul.f32 %v5346_v54, %v965_v36 }
 0x1b0   : > { %4353 = vst [vmem:[%s6097_s11 + $0x90] sm:$0xff] %v4227_v45  ;;  %4354 = vst [vmem:[%s6097_s11 + $0x98] sm:$0xff] %v4228_v48  ;;  %v3475_v62 = vmul.f32 0.5, %v6339_v7  ;;  %v3476_v24 = vmul.f32 0.5, %v6343_v10  ;;  %v1210_v30 = vmul.f32 %v5348_v57, %v965_v36  ;;  %v6359_v29 = vsub.f32 %v1837_v59, %v1963_v31  ;;  %v969_v31 = vpop.permute.xlu1 %968 }
 0x1b1   : > { %v2718_v20 = vadd.f32 0.008333334, %v2592_v5  ;;  %v2843_v25 = vmul.f32 %v2717_v1, %v2213_v19  ;;  %v6361_v41 = vsub.f32 %v1838_v52, %v1964_v51  ;;  %v1335_v28 = vadd.f32 %v1209_v56, %v5501_v3 }
 0x1b2   : > { %v3601_v50 = vfloor.f32 %v3475_v62  ;;  %v3602_v6 = vfloor.f32 %v3476_v24  ;;  %v1336_v17 = vadd.f32 %v1210_v30, %v8137_v44  ;;  %v2215_v8 = vmul.f32 %v6359_v29, %v6359_v29 }
 0x1b3   : > { %v2844_v39 = vmul.f32 %v2718_v20, %v2214_v40  ;;  %v2969_v2 = vadd.f32 -0.16666667, %v2843_v25  ;;  %v2216_v23 = vmul.f32 %v6361_v41, %v6361_v41  ;;  %v1461_v46 = vmul.f32 0.31830987, %v1335_v28 }
 0x1b4   : > { %v3977_v21 = vmul.f32 2.0, %v3851_v18  ;;  %v3978_v58 = vmul.f32 2.0, %v3852_v60  ;;  %v1462_v38 = vmul.f32 0.31830987, %v1336_v17  ;;  %v2341_v15 = vmul.f32 2.7557319e-06, %v2215_v8 }
 0x1b5   : > { %v2970_v0 = vadd.f32 -0.16666667, %v2844_v39  ;;  %v3095_v34 = vmul.f32 %v2969_v2, %v2213_v19  ;;  %v2342_v3 = vmul.f32 2.7557319e-06, %v2216_v23  ;;  %v6369_v32 = vround.rtne.f32 %v1461_v46 }
 0x1b6   : > { %v3727_v63 = vmul.f32 2.0, %v3601_v50  ;;  %v3728_v61 = vmul.f32 2.0, %v3602_v6  ;;  %v6371_v55 = vround.rtne.f32 %v1462_v38  ;;  %v2467_v47 = vadd.f32 -0.0001984127, %v2341_v15  ;;  %v8139_v15 = vld [vmem:[#allocation34_spill] sm:$0xff] }
 0x1b7   : > { %v3096_v53 = vmul.f32 %v2970_v0, %v2214_v40  ;;  %v3221_v26 = vmul.f32 %v3095_v34, %v6329_v27  ;;  %v2468_v22 = vadd.f32 -0.0001984127, %v2342_v3  ;;  %v1713_v49 = vmul.f32 3.140625, %v6369_v32  ;;  %v8138_v0 = vld [vmem:[#allocation33_spill] sm:$0xff] }
 0x1b8   : > { %v4103_v42 = vsub.f32 1.0, %v3977_v21  ;;  %v4104_v18 = vsub.f32 1.0, %v3978_v58  ;;  %v1714_v19 = vmul.f32 3.140625, %v6371_v55  ;;  %v2593_v59 = vmul.f32 %v2467_v47, %v2215_v8 }
 0x1b9   : > { %v3222_v36 = vmul.f32 %v3096_v53, %v6332_v4  ;;  %v3347_v60 = vadd.f32 %v3221_v26, %v6329_v27  ;;  %v2594_v40 = vmul.f32 %v2468_v22, %v2216_v23  ;;  %v1839_v45 = vsub.f32 %v1335_v28, %v1713_v49 }
 0x1ba   : > { %v3853_v5 = vsub.f32 %v6339_v7, %v3727_v63  ;;  %v3854_v52 = vsub.f32 %v6343_v10, %v3728_v61  ;;  %v1840_v1 = vsub.f32 %v1336_v17, %v1714_v19  ;;  %v2719_v56 = vadd.f32 0.008333334, %v2593_v59 }
 0x1bb   : > { %v3348_v48 = vadd.f32 %v3222_v36, %v6332_v4  ;;  %v4229_v51 = vmul.f32 %v4103_v42, %v3347_v60  ;;  %v2720_v20 = vadd.f32 0.008333334, %v2594_v40  ;;  %v1965_v62 = vmul.f32 0.0009676536, %v6369_v32 }
 0x1bc   : > { %v1966_v27 = vmul.f32 0.0009676536, %v6371_v55  ;;  %v3477_v30 = vmul.f32 0.5, %v6369_v32  ;;  %v3478_v25 = vmul.f32 0.5, %v6371_v55  ;;  %v2845_v4 = vmul.f32 %v2719_v56, %v2215_v8 }
 0x1bd   : > { %v4230_v24 = vmul.f32 %v4104_v18, %v3348_v48  ;;  %4355 = vst [vmem:[%s6097_s11 + $0xa0] sm:$0xff] %v4229_v51  ;;  %v2846_v7 = vmul.f32 %v2720_v20, %v2216_v23  ;;  %v6386_v28 = vsub.f32 %v1839_v45, %v1965_v62  ;;  %v1211_v10 = vmul.f32 %v5346_v54, %v969_v31  ;;  %v973_v20 = vpop.permute.xlu0 %972 }
 0x1be   : > { %v6390_v39 = vsub.f32 %v1840_v1, %v1966_v27  ;;  %v3603_v50 = vfloor.f32 %v3477_v30  ;;  %v3604_v6 = vfloor.f32 %v3478_v25  ;;  %v1212_v44 = vmul.f32 %v5348_v57, %v969_v31 }
 0x1bf   : > { %4356 = vst [vmem:[%s6097_s11 + $0xa8] sm:$0xff] %v4230_v24  ;;  %v2971_v17 = vadd.f32 -0.16666667, %v2845_v4  ;;  %v2972_v2 = vadd.f32 -0.16666667, %v2846_v7  ;;  %v2217_v46 = vmul.f32 %v6386_v28, %v6386_v28  ;;  %v1337_v21 = vadd.f32 %v1211_v10, %v8138_v0 }
 0x1c0   : > { %v3979_v58 = vmul.f32 2.0, %v3853_v5  ;;  %v3980_v38 = vmul.f32 2.0, %v3854_v52  ;;  %v2218_v34 = vmul.f32 %v6390_v39, %v6390_v39  ;;  %v1338_v3 = vadd.f32 %v1212_v44, %v8139_v15 }
 0x1c1   : > { %v3097_v53 = vmul.f32 %v2971_v17, %v2215_v8  ;;  %v3098_v63 = vmul.f32 %v2972_v2, %v2216_v23  ;;  %v2343_v61 = vmul.f32 2.7557319e-06, %v2217_v46  ;;  %v1463_v26 = vmul.f32 0.31830987, %v1337_v21 }
 0x1c2   : > { %v2344_v47 = vmul.f32 2.7557319e-06, %v2218_v34  ;;  %v3729_v22 = vmul.f32 2.0, %v3603_v50  ;;  %v3730_v49 = vmul.f32 2.0, %v3604_v6  ;;  %v1464_v36 = vmul.f32 0.31830987, %v1338_v3 }
 0x1c3   : > { %v3223_v42 = vmul.f32 %v3097_v53, %v6359_v29  ;;  %v3224_v18 = vmul.f32 %v3098_v63, %v6361_v41  ;;  %v2469_v19 = vadd.f32 -0.0001984127, %v2343_v61  ;;  %v6401_v60 = vround.rtne.f32 %v1463_v26 }
 0x1c4   : > { %v4105_v59 = vsub.f32 1.0, %v3979_v58  ;;  %v4106_v40 = vsub.f32 1.0, %v3980_v38  ;;  %v2470_v45 = vadd.f32 -0.0001984127, %v2344_v47  ;;  %v6403_v48 = vround.rtne.f32 %v1464_v36 }
 0x1c5   : > { %v3349_v8 = vadd.f32 %v3223_v42, %v6359_v29  ;;  %v3350_v23 = vadd.f32 %v3224_v18, %v6361_v41  ;;  %v2595_v5 = vmul.f32 %v2469_v19, %v2217_v46  ;;  %v1715_v52 = vmul.f32 3.140625, %v6401_v60 }
 0x1c6   : > { %v2596_v1 = vmul.f32 %v2470_v45, %v2218_v34  ;;  %v3855_v31 = vsub.f32 %v6369_v32, %v3729_v22  ;;  %v3856_v51 = vsub.f32 %v6371_v55, %v3730_v49  ;;  %v1716_v56 = vmul.f32 3.140625, %v6403_v48 }
 0x1c7   : > { %v4231_v62 = vmul.f32 %v4105_v59, %v3349_v8  ;;  %v4232_v24 = vmul.f32 %v4106_v40, %v3350_v23  ;;  %v2721_v27 = vadd.f32 0.008333334, %v2595_v5  ;;  %v1841_v30 = vsub.f32 %v1337_v21, %v1715_v52 }
 0x1c8   : > { %v2722_v29 = vadd.f32 0.008333334, %v2596_v1  ;;  %v1842_v25 = vsub.f32 %v1338_v3, %v1716_v56  ;;  %v1967_v41 = vmul.f32 0.0009676536, %v6401_v60  ;;  %v1968_v4 = vmul.f32 0.0009676536, %v6403_v48 }
 0x1c9   : > { %4357 = vst [vmem:[%s6097_s11 + $0xb0] sm:$0xff] %v4231_v62  ;;  %4358 = vst [vmem:[%s6097_s11 + $0xb8] sm:$0xff] %v4232_v24  ;;  %v2847_v7 = vmul.f32 %v2721_v27, %v2217_v46  ;;  %v3479_v32 = vmul.f32 0.5, %v6401_v60  ;;  %v3480_v55 = vmul.f32 0.5, %v6403_v48  ;;  %v1213_v10 = vmul.f32 %v5346_v54, %v973_v20  ;;  %v977_v27 = vpop.permute.xlu1 %976 }
 0x1ca   : > { %v2848_v50 = vmul.f32 %v2722_v29, %v2218_v34  ;;  %v6418_v6 = vsub.f32 %v1841_v30, %v1967_v41  ;;  %v6420_v44 = vsub.f32 %v1842_v25, %v1968_v4  ;;  %v1214_v17 = vmul.f32 %v5348_v57, %v973_v20 }
 0x1cb   : > { %v2973_v2 = vadd.f32 -0.16666667, %v2847_v7  ;;  %v3605_v0 = vfloor.f32 %v3479_v32  ;;  %v3606_v21 = vfloor.f32 %v3480_v55  ;;  %v1339_v58 = vadd.f32 %v1213_v10, %v5525_v12 }
 0x1cc   : > { %v2974_v38 = vadd.f32 -0.16666667, %v2848_v50  ;;  %v2219_v15 = vmul.f32 %v6418_v6, %v6418_v6  ;;  %v2220_v3 = vmul.f32 %v6420_v44, %v6420_v44  ;;  %v1340_v53 = vadd.f32 %v1214_v17, %v5534_v35 }
 0x1cd   : > { %v3099_v63 = vmul.f32 %v2973_v2, %v2217_v46  ;;  %v3981_v61 = vmul.f32 2.0, %v3855_v31  ;;  %v3982_v26 = vmul.f32 2.0, %v3856_v51  ;;  %v1465_v47 = vmul.f32 0.31830987, %v1339_v58 }
 0x1ce   : > { %v3100_v22 = vmul.f32 %v2974_v38, %v2218_v34  ;;  %v2345_v49 = vmul.f32 2.7557319e-06, %v2219_v15  ;;  %v2346_v36 = vmul.f32 2.7557319e-06, %v2220_v3  ;;  %v1466_v42 = vmul.f32 0.31830987, %v1340_v53 }
 0x1cf   : > { %v3225_v18 = vmul.f32 %v3099_v63, %v6386_v28  ;;  %v3731_v12 = vmul.f32 2.0, %v3605_v0  ;;  %v3732_v19 = vmul.f32 2.0, %v3606_v21  ;;  %v6430_v59 = vround.rtne.f32 %v1465_v47  ;;  %v8140_v38 = vld [vmem:[#allocation36_spill] sm:$0xff] }
 0x1d0   : > { %v3226_v40 = vmul.f32 %v3100_v22, %v6390_v39  ;;  %v2471_v45 = vadd.f32 -0.0001984127, %v2345_v49  ;;  %v2472_v8 = vadd.f32 -0.0001984127, %v2346_v36  ;;  %v6433_v23 = vround.rtne.f32 %v1466_v42 }
 0x1d1   : > { %v3351_v35 = vadd.f32 %v3225_v18, %v6386_v28  ;;  %v4107_v46 = vsub.f32 1.0, %v3981_v61  ;;  %v4108_v34 = vsub.f32 1.0, %v3982_v26  ;;  %v1717_v5 = vmul.f32 3.140625, %v6430_v59 }
 0x1d2   : > { %v3352_v52 = vadd.f32 %v3226_v40, %v6390_v39  ;;  %v2597_v1 = vmul.f32 %v2471_v45, %v2219_v15  ;;  %v2598_v31 = vmul.f32 %v2472_v8, %v2220_v3  ;;  %v1718_v51 = vmul.f32 3.140625, %v6433_v23 }
 0x1d3   : > { %v4233_v56 = vmul.f32 %v4107_v46, %v3351_v35  ;;  %v3857_v20 = vsub.f32 %v6401_v60, %v3731_v12  ;;  %v3858_v62 = vsub.f32 %v6403_v48, %v3732_v19  ;;  %v1843_v24 = vsub.f32 %v1339_v58, %v1717_v5 }
 0x1d4   : > { %v4234_v28 = vmul.f32 %v4108_v34, %v3352_v52  ;;  %v2723_v30 = vadd.f32 0.008333334, %v2597_v1  ;;  %v2724_v29 = vadd.f32 0.008333334, %v2598_v31  ;;  %v1844_v25 = vsub.f32 %v1340_v53, %v1718_v51  ;;  %v981_v51 = vpop.permute.xlu0 %980 }
 0x1d5   : > { %4359 = vst [vmem:[%s6097_s11 + $0xc0] sm:$0xff] %v4233_v56  ;;  %v1969_v41 = vmul.f32 0.0009676536, %v6430_v59  ;;  %v1970_v39 = vmul.f32 0.0009676536, %v6433_v23  ;;  %v3481_v4 = vmul.f32 0.5, %v6430_v59  ;;  %v1215_v48 = vmul.f32 %v5346_v54, %v977_v27 }
 0x1d6   : > { %v3482_v7 = vmul.f32 0.5, %v6433_v23  ;;  %4360 = vst [vmem:[%s6097_s11 + $0xc8] sm:$0xff] %v4234_v28  ;;  %v2849_v32 = vmul.f32 %v2723_v30, %v2219_v15  ;;  %v2850_v60 = vmul.f32 %v2724_v29, %v2220_v3  ;;  %v1216_v55 = vmul.f32 %v5348_v57, %v977_v27 }
 0x1d7   : > { %v6449_v10 = vsub.f32 %v1843_v24, %v1969_v41  ;;  %v6451_v50 = vsub.f32 %v1844_v25, %v1970_v39  ;;  %v3607_v17 = vfloor.f32 %v3481_v4  ;;  %v1341_v58 = vadd.f32 %v1215_v48, %v5515_v9  ;;  %v8141_v48 = vld [vmem:[#allocation39_spill] sm:$0xff] }
 0x1d8   : > { %v3608_v2 = vfloor.f32 %v3482_v7  ;;  %v2975_v0 = vadd.f32 -0.16666667, %v2849_v32  ;;  %v2976_v21 = vadd.f32 -0.16666667, %v2850_v60  ;;  %v1342_v53 = vadd.f32 %v1216_v55, %v8140_v38 }
 0x1d9   : > { %v3983_v63 = vmul.f32 2.0, %v3857_v20  ;;  %v3984_v61 = vmul.f32 2.0, %v3858_v62  ;;  %v2221_v26 = vmul.f32 %v6449_v10, %v6449_v10  ;;  %v2222_v47 = vmul.f32 %v6451_v50, %v6451_v50 }
 0x1da   : > { %v3101_v22 = vmul.f32 %v2975_v0, %v2219_v15  ;;  %v3102_v49 = vmul.f32 %v2976_v21, %v2220_v3  ;;  %v1467_v36 = vmul.f32 0.31830987, %v1341_v58  ;;  %v1468_v42 = vmul.f32 0.31830987, %v1342_v53 }
 0x1db   : > { %v2347_v18 = vmul.f32 2.7557319e-06, %v2221_v26  ;;  %v2348_v12 = vmul.f32 2.7557319e-06, %v2222_v47  ;;  %v3733_v19 = vmul.f32 2.0, %v3607_v17  ;;  %v3734_v40 = vmul.f32 2.0, %v3608_v2 }
 0x1dc   : > { %v3227_v9 = vmul.f32 %v3101_v22, %v6418_v6  ;;  %v3228_v45 = vmul.f32 %v3102_v49, %v6420_v44  ;;  %v6461_v8 = vround.rtne.f32 %v1467_v36  ;;  %v6463_v35 = vround.rtne.f32 %v1468_v42 }
 0x1dd   : > { %v4109_v46 = vsub.f32 1.0, %v3983_v63  ;;  %v4110_v34 = vsub.f32 1.0, %v3984_v61  ;;  %v2473_v5 = vadd.f32 -0.0001984127, %v2347_v18  ;;  %v2474_v52 = vadd.f32 -0.0001984127, %v2348_v12 }
 0x1de   : > { %v3353_v15 = vadd.f32 %v3227_v9, %v6418_v6  ;;  %v3354_v3 = vadd.f32 %v3228_v45, %v6420_v44  ;;  %v1719_v1 = vmul.f32 3.140625, %v6461_v8  ;;  %v1720_v31 = vmul.f32 3.140625, %v6463_v35 }
 0x1df   : > { %v2599_v56 = vmul.f32 %v2473_v5, %v2221_v26  ;;  %v2600_v20 = vmul.f32 %v2474_v52, %v2222_v47  ;;  %v3859_v62 = vsub.f32 %v6430_v59, %v3733_v19  ;;  %v3860_v24 = vsub.f32 %v6433_v23, %v3734_v40 }
 0x1e0   : > { %v4235_v27 = vmul.f32 %v4109_v46, %v3353_v15  ;;  %v4236_v28 = vmul.f32 %v4110_v34, %v3354_v3  ;;  %v1845_v30 = vsub.f32 %v1341_v58, %v1719_v1  ;;  %v1846_v29 = vsub.f32 %v1342_v53, %v1720_v31 }
 0x1e1   : > { %v2725_v6 = vadd.f32 0.008333334, %v2599_v56  ;;  %v2726_v25 = vadd.f32 0.008333334, %v2600_v20  ;;  %v1971_v44 = vmul.f32 0.0009676536, %v6461_v8  ;;  %v1217_v41 = vmul.f32 %v5346_v54, %v981_v51 }
 0x1e2   : > { %4361 = vst [vmem:[%s6097_s11 + $0xd0] sm:$0xff] %v4235_v27  ;;  %4362 = vst [vmem:[%s6097_s11 + $0xd8] sm:$0xff] %v4236_v28  ;;  %v1972_v39 = vmul.f32 0.0009676536, %v6463_v35  ;;  %v3483_v4 = vmul.f32 0.5, %v6461_v8  ;;  %v3484_v59 = vmul.f32 0.5, %v6463_v35  ;;  %v1218_v23 = vmul.f32 %v5348_v57, %v981_v51  ;;  %v985_v28 = vpop.permute.xlu1 %984 }
 0x1e3   : > { %v2851_v7 = vmul.f32 %v2725_v6, %v2221_v26  ;;  %v2852_v32 = vmul.f32 %v2726_v25, %v2222_v47  ;;  %v6479_v60 = vsub.f32 %v1845_v30, %v1971_v44  ;;  %v1343_v55 = vadd.f32 %v1217_v41, %v8141_v48 }
 0x1e4   : > { %v6482_v17 = vsub.f32 %v1846_v29, %v1972_v39  ;;  %v3609_v2 = vfloor.f32 %v3483_v4  ;;  %v3610_v0 = vfloor.f32 %v3484_v59  ;;  %v1344_v21 = vadd.f32 %v1218_v23, %v5558_v13 }
 0x1e5   : > { %v2977_v58 = vadd.f32 -0.16666667, %v2851_v7  ;;  %v2978_v38 = vadd.f32 -0.16666667, %v2852_v32  ;;  %v2223_v53 = vmul.f32 %v6479_v60, %v6479_v60  ;;  %v1469_v63 = vmul.f32 0.31830987, %v1343_v55 }
 0x1e6   : > { %v3985_v61 = vmul.f32 2.0, %v3859_v62  ;;  %v3986_v22 = vmul.f32 2.0, %v3860_v24  ;;  %v2224_v49 = vmul.f32 %v6482_v17, %v6482_v17  ;;  %v1470_v36 = vmul.f32 0.31830987, %v1344_v21 }
 0x1e7   : > { %v3103_v42 = vmul.f32 %v2977_v58, %v2221_v26  ;;  %v3104_v18 = vmul.f32 %v2978_v38, %v2222_v47  ;;  %v2349_v12 = vmul.f32 2.7557319e-06, %v2223_v53  ;;  %v6489_v19 = vround.rtne.f32 %v1469_v63 }
 0x1e8   : > { %v2350_v40 = vmul.f32 2.7557319e-06, %v2224_v49  ;;  %v3735_v9 = vmul.f32 2.0, %v3609_v2  ;;  %v3736_v13 = vmul.f32 2.0, %v3610_v0  ;;  %v6491_v45 = vround.rtne.f32 %v1470_v36  ;;  %v8142_v2 = vld [vmem:[#allocation37_spill] sm:$0xff] }
 0x1e9   : > { %v3229_v46 = vmul.f32 %v3103_v42, %v6449_v10  ;;  %v3230_v34 = vmul.f32 %v3104_v18, %v6451_v50  ;;  %v2475_v5 = vadd.f32 -0.0001984127, %v2349_v12  ;;  %v1721_v52 = vmul.f32 3.140625, %v6489_v19 }
 0x1ea   : > { %v4111_v15 = vsub.f32 1.0, %v3985_v61  ;;  %v4112_v3 = vsub.f32 1.0, %v3986_v22  ;;  %v2476_v1 = vadd.f32 -0.0001984127, %v2350_v40  ;;  %v1722_v26 = vmul.f32 3.140625, %v6491_v45 }
 0x1eb   : > { %v3355_v47 = vadd.f32 %v3229_v46, %v6449_v10  ;;  %v3356_v31 = vadd.f32 %v3230_v34, %v6451_v50  ;;  %v2601_v51 = vmul.f32 %v2475_v5, %v2223_v53  ;;  %v1847_v56 = vsub.f32 %v1343_v55, %v1721_v52 }
 0x1ec   : > { %v2602_v20 = vmul.f32 %v2476_v1, %v2224_v49  ;;  %v3861_v62 = vsub.f32 %v6461_v8, %v3735_v9  ;;  %v3862_v24 = vsub.f32 %v6463_v35, %v3736_v13  ;;  %v1848_v27 = vsub.f32 %v1344_v21, %v1722_v26  ;;  %v8143_v21 = vld [vmem:[#allocation38_spill] sm:$0xff] }
 0x1ed   : > { %v4237_v30 = vmul.f32 %v4111_v15, %v3355_v47  ;;  %v4238_v29 = vmul.f32 %v4112_v3, %v3356_v31  ;;  %v2727_v6 = vadd.f32 0.008333334, %v2601_v51  ;;  %v1973_v25 = vmul.f32 0.0009676536, %v6489_v19 }
 0x1ee   : > { %v2728_v44 = vadd.f32 0.008333334, %v2602_v20  ;;  %v1974_v10 = vmul.f32 0.0009676536, %v6491_v45  ;;  %v3485_v50 = vmul.f32 0.5, %v6489_v19  ;;  %v3486_v41 = vmul.f32 0.5, %v6491_v45 }
 0x1ef   : > { %4363 = vst [vmem:[%s6097_s11 + $0xe0] sm:$0xff] %v4237_v30  ;;  %4364 = vst [vmem:[%s6097_s11 + $0xe8] sm:$0xff] %v4238_v29  ;;  %v2853_v39 = vmul.f32 %v2727_v6, %v2223_v53  ;;  %v6507_v8 = vsub.f32 %v1847_v56, %v1973_v25  ;;  %v1219_v35 = vmul.f32 %v5346_v54, %v985_v28  ;;  %v3987_v63 = vmul.f32 2.0, %v3861_v62 }
 0x1f0   : > { %v1220_v4 = vmul.f32 %v5348_v57, %v985_v28  ;;  %v2854_v59 = vmul.f32 %v2728_v44, %v2224_v49  ;;  %v6511_v23 = vsub.f32 %v1848_v27, %v1974_v10  ;;  %v3611_v7 = vfloor.f32 %v3485_v50  ;;  %v989_v27 = vpop.permute.xlu0 %988 }
 0x1f1   : > { %v3612_v32 = vfloor.f32 %v3486_v41  ;;  %v2979_v48 = vadd.f32 -0.16666667, %v2853_v39  ;;  %v2225_v55 = vmul.f32 %v6507_v8, %v6507_v8  ;;  %v1345_v0 = vadd.f32 %v1219_v35, %v8142_v2 }
 0x1f2   : > { %v1346_v58 = vadd.f32 %v1220_v4, %v8143_v21  ;;  %v2980_v38 = vadd.f32 -0.16666667, %v2854_v59  ;;  %v3988_v61 = vmul.f32 2.0, %v3862_v24  ;;  %v2226_v22 = vmul.f32 %v6511_v23, %v6511_v23 }
 0x1f3   : > { %v3105_v36 = vmul.f32 %v2979_v48, %v2223_v53  ;;  %v2351_v42 = vmul.f32 2.7557319e-06, %v2225_v55  ;;  %v1471_v18 = vmul.f32 0.31830987, %v1345_v0  ;;  %v3737_v13 = vmul.f32 2.0, %v3611_v7 }
 0x1f4   : > { %v1472_v12 = vmul.f32 0.31830987, %v1346_v58  ;;  %v3106_v40 = vmul.f32 %v2980_v38, %v2224_v49  ;;  %v2352_v9 = vmul.f32 2.7557319e-06, %v2226_v22  ;;  %v3738_v46 = vmul.f32 2.0, %v3612_v32 }
 0x1f5   : > { %v3231_v34 = vmul.f32 %v3105_v36, %v6479_v60  ;;  %v2477_v5 = vadd.f32 -0.0001984127, %v2351_v42  ;;  %v6520_v52 = vround.rtne.f32 %v1471_v18  ;;  %v4113_v1 = vsub.f32 1.0, %v3987_v63 }
 0x1f6   : > { %v6522_v15 = vround.rtne.f32 %v1472_v12  ;;  %v3232_v3 = vmul.f32 %v3106_v40, %v6482_v17  ;;  %v4114_v26 = vsub.f32 1.0, %v3988_v61  ;;  %v2478_v47 = vadd.f32 -0.0001984127, %v2352_v9 }
 0x1f7   : > { %v3357_v53 = vadd.f32 %v3231_v34, %v6479_v60  ;;  %v2603_v31 = vmul.f32 %v2477_v5, %v2225_v55  ;;  %v1723_v49 = vmul.f32 3.140625, %v6520_v52  ;;  %v3863_v62 = vsub.f32 %v6489_v19, %v3737_v13 }
 0x1f8   : > { %v1724_v51 = vmul.f32 3.140625, %v6522_v15  ;;  %v3358_v56 = vadd.f32 %v3232_v3, %v6482_v17  ;;  %v2604_v20 = vmul.f32 %v2478_v47, %v2226_v22  ;;  %v3864_v24 = vsub.f32 %v6491_v45, %v3738_v46 }
 0x1f9   : > { %v4239_v28 = vmul.f32 %v4113_v1, %v3357_v53  ;;  %v2729_v30 = vadd.f32 0.008333334, %v2603_v31  ;;  %v1849_v29 = vsub.f32 %v1345_v0, %v1723_v49  ;;  %v1975_v44 = vmul.f32 0.0009676536, %v6520_v52 }
 0x1fa   : > { %v1850_v6 = vsub.f32 %v1346_v58, %v1724_v51  ;;  %v4240_v60 = vmul.f32 %v4114_v26, %v3358_v56  ;;  %v2730_v25 = vadd.f32 0.008333334, %v2604_v20  ;;  %v1976_v10 = vmul.f32 0.0009676536, %v6522_v15 }
 0x1fb   : > { %4365 = vst [vmem:[%s6097_s11 + $0xf0] sm:$0xff] %v4239_v28  ;;  %v2855_v50 = vmul.f32 %v2729_v30, %v2225_v55  ;;  %v3487_v17 = vmul.f32 0.5, %v6520_v52  ;;  %v3488_v19 = vmul.f32 0.5, %v6522_v15  ;;  %v1221_v41 = vmul.f32 %v5346_v54, %v989_v27 }
 0x1fc   : > { %4366 = vst [vmem:[%s6097_s11 + $0xf8] sm:$0xff] %v4240_v60  ;;  %v2856_v45 = vmul.f32 %v2730_v25, %v2226_v22  ;;  %v6538_v39 = vsub.f32 %v1849_v29, %v1975_v44  ;;  %v6540_v35 = vsub.f32 %v1850_v6, %v1976_v10  ;;  %v1222_v4 = vmul.f32 %v5348_v57, %v989_v27 }
 0x1fd   : > { %v2981_v59 = vadd.f32 -0.16666667, %v2855_v50  ;;  %v3613_v7 = vfloor.f32 %v3487_v17  ;;  %v3614_v32 = vfloor.f32 %v3488_v19  ;;  %v1347_v48 = vadd.f32 %v1221_v41, %v5571_v14 }
 0x1fe   : > { %v2982_v2 = vadd.f32 -0.16666667, %v2856_v45  ;;  %v2227_v0 = vmul.f32 %v6538_v39, %v6538_v39  ;;  %v2228_v21 = vmul.f32 %v6540_v35, %v6540_v35  ;;  %v1348_v58 = vadd.f32 %v1222_v4, %v5578_v37 }
 0x1ff   : > { %v3107_v38 = vmul.f32 %v2981_v59, %v2225_v55  ;;  %v3989_v63 = vmul.f32 2.0, %v3863_v62  ;;  %v3990_v61 = vmul.f32 2.0, %v3864_v24  ;;  %v1473_v36 = vmul.f32 0.31830987, %v1347_v48  ;;  %v993_v24 = vpop.permute.xlu1 %992 }
 0x200   : > { %v3108_v42 = vmul.f32 %v2982_v2, %v2226_v22  ;;  %v2353_v18 = vmul.f32 2.7557319e-06, %v2227_v0  ;;  %v2354_v12 = vmul.f32 2.7557319e-06, %v2228_v21  ;;  %v1474_v40 = vmul.f32 0.31830987, %v1348_v58 }
 0x201   : > { %v3233_v9 = vmul.f32 %v3107_v38, %v6507_v8  ;;  %v3739_v14 = vmul.f32 2.0, %v3613_v7  ;;  %v3740_v13 = vmul.f32 2.0, %v3614_v32  ;;  %v6550_v46 = vround.rtne.f32 %v1473_v36 }
 0x202   : > { %v3234_v34 = vmul.f32 %v3108_v42, %v6511_v23  ;;  %v2479_v5 = vadd.f32 -0.0001984127, %v2353_v18  ;;  %v2480_v3 = vadd.f32 -0.0001984127, %v2354_v12  ;;  %v6553_v1 = vround.rtne.f32 %v1474_v40 }
 0x203   : > { %v3359_v37 = vadd.f32 %v3233_v9, %v6507_v8  ;;  %v4115_v55 = vsub.f32 1.0, %v3989_v63  ;;  %v4116_v22 = vsub.f32 1.0, %v3990_v61  ;;  %v1725_v26 = vmul.f32 3.140625, %v6550_v46 }
 0x204   : > { %v3360_v47 = vadd.f32 %v3234_v34, %v6511_v23  ;;  %v2605_v53 = vmul.f32 %v2479_v5, %v2227_v0  ;;  %v2606_v31 = vmul.f32 %v2480_v3, %v2228_v21  ;;  %v1726_v49 = vmul.f32 3.140625, %v6553_v1 }
 0x205   : > { %v4241_v51 = vmul.f32 %v4115_v55, %v3359_v37  ;;  %v3865_v56 = vsub.f32 %v6520_v52, %v3739_v14  ;;  %v3866_v20 = vsub.f32 %v6522_v15, %v3740_v13  ;;  %v1851_v62 = vsub.f32 %v1347_v48, %v1725_v26  ;;  %v997_v55 = vpop.permute.xlu0 %996 }
 0x206   : > { %v4242_v8 = vmul.f32 %v4116_v22, %v3360_v47  ;;  %v2731_v27 = vadd.f32 0.008333334, %v2605_v53  ;;  %v2732_v28 = vadd.f32 0.008333334, %v2606_v31  ;;  %v1852_v30 = vsub.f32 %v1348_v58, %v1726_v49 }
 0x207   : > { %4367 = vst [vmem:[%s6097_s11 + $0x100] sm:$0xff] %v4241_v51  ;;  %v1977_v29 = vmul.f32 0.0009676536, %v6550_v46  ;;  %v1978_v23 = vmul.f32 0.0009676536, %v6553_v1  ;;  %v3489_v6 = vmul.f32 0.5, %v6550_v46  ;;  %v1223_v15 = vmul.f32 %v5346_v54, %v993_v24 }
 0x208   : > { %v3490_v60 = vmul.f32 0.5, %v6553_v1  ;;  %4368 = vst [vmem:[%s6097_s11 + $0x108] sm:$0xff] %v4242_v8  ;;  %v2857_v25 = vmul.f32 %v2731_v27, %v2227_v0  ;;  %v2858_v52 = vmul.f32 %v2732_v28, %v2228_v21  ;;  %v1224_v44 = vmul.f32 %v5348_v57, %v993_v24 }
 0x209   : > { %v6569_v10 = vsub.f32 %v1851_v62, %v1977_v29  ;;  %v6571_v50 = vsub.f32 %v1852_v30, %v1978_v23  ;;  %v3615_v17 = vfloor.f32 %v3489_v6  ;;  %v1349_v4 = vadd.f32 %v1223_v15, %v5561_v11  ;;  %v8144_v29 = vld [vmem:[#allocation42_spill] sm:$0xff] }
 0x20a   : > { %v3616_v19 = vfloor.f32 %v3490_v60  ;;  %v2983_v41 = vadd.f32 -0.16666667, %v2857_v25  ;;  %v2984_v45 = vadd.f32 -0.16666667, %v2858_v52  ;;  %v1350_v59 = vadd.f32 %v1224_v44, %v5568_v16  ;;  %v8145_v52 = vld [vmem:[#allocation43_spill] sm:$0xff] }
 0x20b   : > { %v3991_v7 = vmul.f32 2.0, %v3865_v56  ;;  %v3992_v32 = vmul.f32 2.0, %v3866_v20  ;;  %v2229_v48 = vmul.f32 %v6569_v10, %v6569_v10  ;;  %v2230_v2 = vmul.f32 %v6571_v50, %v6571_v50 }
 0x20c   : > { %v3109_v58 = vmul.f32 %v2983_v41, %v2227_v0  ;;  %v3110_v38 = vmul.f32 %v2984_v45, %v2228_v21  ;;  %v1475_v63 = vmul.f32 0.31830987, %v1349_v4  ;;  %v1476_v61 = vmul.f32 0.31830987, %v1350_v59 }
 0x20d   : > { %v2355_v36 = vmul.f32 2.7557319e-06, %v2229_v48  ;;  %v2356_v42 = vmul.f32 2.7557319e-06, %v2230_v2  ;;  %v3741_v18 = vmul.f32 2.0, %v3615_v17  ;;  %v3742_v12 = vmul.f32 2.0, %v3616_v19 }
 0x20e   : > { %v3235_v11 = vmul.f32 %v3109_v58, %v6538_v39  ;;  %v3236_v16 = vmul.f32 %v3110_v38, %v6540_v35  ;;  %v6581_v40 = vround.rtne.f32 %v1475_v63  ;;  %v6583_v9 = vround.rtne.f32 %v1476_v61 }
 0x20f   : > { %v4117_v14 = vsub.f32 1.0, %v3991_v7  ;;  %v4118_v13 = vsub.f32 1.0, %v3992_v32  ;;  %v2481_v34 = vadd.f32 -0.0001984127, %v2355_v36  ;;  %v2482_v5 = vadd.f32 -0.0001984127, %v2356_v42 }
 0x210   : > { %v3361_v0 = vadd.f32 %v3235_v11, %v6538_v39  ;;  %v3362_v21 = vadd.f32 %v3236_v16, %v6540_v35  ;;  %v1727_v3 = vmul.f32 3.140625, %v6581_v40  ;;  %v1728_v37 = vmul.f32 3.140625, %v6583_v9 }
 0x211   : > { %v2607_v22 = vmul.f32 %v2481_v34, %v2229_v48  ;;  %v2608_v26 = vmul.f32 %v2482_v5, %v2230_v2  ;;  %v3867_v47 = vsub.f32 %v6550_v46, %v3741_v18  ;;  %v3868_v53 = vsub.f32 %v6553_v1, %v3742_v12 }
 0x212   : > { %v4243_v31 = vmul.f32 %v4117_v14, %v3361_v0  ;;  %v4244_v49 = vmul.f32 %v4118_v13, %v3362_v21  ;;  %v1853_v51 = vsub.f32 %v1349_v4, %v1727_v3  ;;  %v1854_v56 = vsub.f32 %v1350_v59, %v1728_v37 }
 0x213   : > { %v2733_v39 = vadd.f32 0.008333334, %v2607_v22  ;;  %v2734_v20 = vadd.f32 0.008333334, %v2608_v26  ;;  %v1979_v35 = vmul.f32 0.0009676536, %v6581_v40  ;;  %v1225_v62 = vmul.f32 %v5346_v54, %v997_v55 }
 0x214   : > { %4369 = vst [vmem:[%s6097_s11 + $0x110] sm:$0xff] %v4243_v31  ;;  %4370 = vst [vmem:[%s6097_s11 + $0x118] sm:$0xff] %v4244_v49  ;;  %v1980_v24 = vmul.f32 0.0009676536, %v6583_v9  ;;  %v3491_v8 = vmul.f32 0.5, %v6581_v40  ;;  %v3492_v46 = vmul.f32 0.5, %v6583_v9  ;;  %v1226_v1 = vmul.f32 %v5348_v57, %v997_v55 }
 0x215   : > { %v2859_v27 = vmul.f32 %v2733_v39, %v2229_v48  ;;  %v2860_v28 = vmul.f32 %v2734_v20, %v2230_v2  ;;  %v6599_v30 = vsub.f32 %v1853_v51, %v1979_v35  ;;  %v1351_v23 = vadd.f32 %v1225_v62, %v8144_v29 }
 0x216   : > { %v6602_v6 = vsub.f32 %v1854_v56, %v1980_v24  ;;  %v3617_v60 = vfloor.f32 %v3491_v8  ;;  %v3618_v25 = vfloor.f32 %v3492_v46  ;;  %v1352_v15 = vadd.f32 %v1226_v1, %v8145_v52 }
 0x217   : > { %v2985_v44 = vadd.f32 -0.16666667, %v2859_v27  ;;  %v2986_v17 = vadd.f32 -0.16666667, %v2860_v28  ;;  %v2231_v19 = vmul.f32 %v6599_v30, %v6599_v30  ;;  %v1477_v41 = vmul.f32 0.31830987, %v1351_v23 }
 0x218   : > { %v3993_v45 = vmul.f32 2.0, %v3867_v47  ;;  %v3994_v4 = vmul.f32 2.0, %v3868_v53  ;;  %v2232_v59 = vmul.f32 %v6602_v6, %v6602_v6  ;;  %v1478_v7 = vmul.f32 0.31830987, %v1352_v15  ;;  %v1001_v47 = vpop.permute.xlu1 %1000  ;;  %v8146_v28 = vld [vmem:[#allocation40_spill] sm:$0xff] }
 0x219   : > { %v3111_v32 = vmul.f32 %v2985_v44, %v2229_v48  ;;  %v3112_v58 = vmul.f32 %v2986_v17, %v2230_v2  ;;  %v2357_v38 = vmul.f32 2.7557319e-06, %v2231_v19  ;;  %v6609_v63 = vround.rtne.f32 %v1477_v41 }
 0x21a   : > { %v2358_v61 = vmul.f32 2.7557319e-06, %v2232_v59  ;;  %v3743_v36 = vmul.f32 2.0, %v3617_v60  ;;  %v3744_v42 = vmul.f32 2.0, %v3618_v25  ;;  %v6611_v18 = vround.rtne.f32 %v1478_v7 }
 0x21b   : > { %v3237_v12 = vmul.f32 %v3111_v32, %v6569_v10  ;;  %v3238_v11 = vmul.f32 %v3112_v58, %v6571_v50  ;;  %v2483_v16 = vadd.f32 -0.0001984127, %v2357_v38  ;;  %v1729_v14 = vmul.f32 3.140625, %v6609_v63 }
 0x21c   : > { %v4119_v13 = vsub.f32 1.0, %v3993_v45  ;;  %v4120_v34 = vsub.f32 1.0, %v3994_v4  ;;  %v2484_v5 = vadd.f32 -0.0001984127, %v2358_v61  ;;  %v1730_v48 = vmul.f32 3.140625, %v6611_v18 }
 0x21d   : > { %v3363_v2 = vadd.f32 %v3237_v12, %v6569_v10  ;;  %v3364_v0 = vadd.f32 %v3238_v11, %v6571_v50  ;;  %v2609_v21 = vmul.f32 %v2483_v16, %v2231_v19  ;;  %v1855_v3 = vsub.f32 %v1351_v23, %v1729_v14  ;;  %v8147_v23 = vld [vmem:[#allocation41_spill] sm:$0xff] }
 0x21e   : > { %v2610_v37 = vmul.f32 %v2484_v5, %v2232_v59  ;;  %v3869_v55 = vsub.f32 %v6581_v40, %v3743_v36  ;;  %v3870_v22 = vsub.f32 %v6583_v9, %v3744_v42  ;;  %v1856_v26 = vsub.f32 %v1352_v15, %v1730_v48 }
 0x21f   : > { %v4245_v53 = vmul.f32 %v4119_v13, %v3363_v2  ;;  %v4246_v31 = vmul.f32 %v4120_v34, %v3364_v0  ;;  %v2735_v49 = vadd.f32 0.008333334, %v2609_v21  ;;  %v1981_v51 = vmul.f32 0.0009676536, %v6609_v63 }
 0x220   : > { %v2736_v56 = vadd.f32 0.008333334, %v2610_v37  ;;  %v1982_v10 = vmul.f32 0.0009676536, %v6611_v18  ;;  %v3493_v50 = vmul.f32 0.5, %v6609_v63  ;;  %v3494_v39 = vmul.f32 0.5, %v6611_v18 }
 0x221   : > { %4371 = vst [vmem:[%s6097_s11 + $0x120] sm:$0xff] %v4245_v53  ;;  %4372 = vst [vmem:[%s6097_s11 + $0x128] sm:$0xff] %v4246_v31  ;;  %v2861_v20 = vmul.f32 %v2735_v49, %v2231_v19  ;;  %v6627_v40 = vsub.f32 %v1855_v3, %v1981_v51  ;;  %v1227_v9 = vmul.f32 %v5346_v54, %v1001_v47  ;;  %v3995_v52 = vmul.f32 2.0, %v3869_v55  ;;  %v1005_v3 = vpop.permute.xlu0 %1004 }
 0x222   : > { %v1228_v35 = vmul.f32 %v5348_v57, %v1001_v47  ;;  %v2862_v62 = vmul.f32 %v2736_v56, %v2232_v59  ;;  %v6631_v24 = vsub.f32 %v1856_v26, %v1982_v10  ;;  %v3619_v8 = vfloor.f32 %v3493_v50 }
 0x223   : > { %v3620_v46 = vfloor.f32 %v3494_v39  ;;  %v2987_v1 = vadd.f32 -0.16666667, %v2861_v20  ;;  %v2233_v27 = vmul.f32 %v6627_v40, %v6627_v40  ;;  %v1353_v29 = vadd.f32 %v1227_v9, %v8146_v28  ;;  %v8149_v28 = vld [vmem:[#allocation47_spill] sm:$0xff] }
 0x224   : > { %v1354_v60 = vadd.f32 %v1228_v35, %v8147_v23  ;;  %v2988_v25 = vadd.f32 -0.16666667, %v2862_v62  ;;  %v3996_v15 = vmul.f32 2.0, %v3870_v22  ;;  %v2234_v44 = vmul.f32 %v6631_v24, %v6631_v24  ;;  %v8148_v35 = vld [vmem:[#allocation46_spill] sm:$0xff] }
 0x225   : > { %v3113_v17 = vmul.f32 %v2987_v1, %v2231_v19  ;;  %v2359_v41 = vmul.f32 2.7557319e-06, %v2233_v27  ;;  %v1479_v45 = vmul.f32 0.31830987, %v1353_v29  ;;  %v3745_v58 = vmul.f32 2.0, %v3619_v8 }
 0x226   : > { %v1480_v4 = vmul.f32 0.31830987, %v1354_v60  ;;  %v3114_v7 = vmul.f32 %v2988_v25, %v2232_v59  ;;  %v2360_v32 = vmul.f32 2.7557319e-06, %v2234_v44  ;;  %v3746_v38 = vmul.f32 2.0, %v3620_v46 }
 0x227   : > { %v3239_v61 = vmul.f32 %v3113_v17, %v6599_v30  ;;  %v2485_v36 = vadd.f32 -0.0001984127, %v2359_v41  ;;  %v6640_v42 = vround.rtne.f32 %v1479_v45  ;;  %v4121_v16 = vsub.f32 1.0, %v3995_v52 }
 0x228   : > { %v6642_v12 = vround.rtne.f32 %v1480_v4  ;;  %v3240_v11 = vmul.f32 %v3114_v7, %v6602_v6  ;;  %v4122_v14 = vsub.f32 1.0, %v3996_v15  ;;  %v2486_v13 = vadd.f32 -0.0001984127, %v2360_v32 }
 0x229   : > { %v3365_v19 = vadd.f32 %v3239_v61, %v6599_v30  ;;  %v2611_v34 = vmul.f32 %v2485_v36, %v2233_v27  ;;  %v1731_v59 = vmul.f32 3.140625, %v6640_v42  ;;  %v3871_v0 = vsub.f32 %v6609_v63, %v3745_v58 }
 0x22a   : > { %v1732_v5 = vmul.f32 3.140625, %v6642_v12  ;;  %v3366_v48 = vadd.f32 %v3240_v11, %v6602_v6  ;;  %v2612_v2 = vmul.f32 %v2486_v13, %v2234_v44  ;;  %v3872_v21 = vsub.f32 %v6611_v18, %v3746_v38 }
 0x22b   : > { %v4247_v37 = vmul.f32 %v4121_v16, %v3365_v19  ;;  %v2737_v55 = vadd.f32 0.008333334, %v2611_v34  ;;  %v1857_v22 = vsub.f32 %v1353_v29, %v1731_v59  ;;  %v1983_v53 = vmul.f32 0.0009676536, %v6640_v42 }
 0x22c   : > { %v1858_v26 = vsub.f32 %v1354_v60, %v1732_v5  ;;  %v4248_v30 = vmul.f32 %v4122_v14, %v3366_v48  ;;  %v2738_v47 = vadd.f32 0.008333334, %v2612_v2  ;;  %v1984_v31 = vmul.f32 0.0009676536, %v6642_v12 }
 0x22d   : > { %4373 = vst [vmem:[%s6097_s11 + $0x130] sm:$0xff] %v4247_v37  ;;  %v2863_v49 = vmul.f32 %v2737_v55, %v2233_v27  ;;  %v3495_v6 = vmul.f32 0.5, %v6640_v42  ;;  %v3496_v63 = vmul.f32 0.5, %v6642_v12  ;;  %v1229_v51 = vmul.f32 %v5346_v54, %v1005_v3 }
 0x22e   : > { %4374 = vst [vmem:[%s6097_s11 + $0x138] sm:$0xff] %v4248_v30  ;;  %v2864_v18 = vmul.f32 %v2738_v47, %v2234_v44  ;;  %v6658_v56 = vsub.f32 %v1857_v22, %v1983_v53  ;;  %v6660_v10 = vsub.f32 %v1858_v26, %v1984_v31  ;;  %v1230_v50 = vmul.f32 %v5348_v57, %v1005_v3 }
 0x22f   : > { %v2989_v39 = vadd.f32 -0.16666667, %v2863_v49  ;;  %v3621_v20 = vfloor.f32 %v3495_v6  ;;  %v3622_v9 = vfloor.f32 %v3496_v63  ;;  %v1355_v62 = vadd.f32 %v1229_v51, %v8148_v35 }
 0x230   : > { %v2990_v8 = vadd.f32 -0.16666667, %v2864_v18  ;;  %v2235_v46 = vmul.f32 %v6658_v56, %v6658_v56  ;;  %v2236_v1 = vmul.f32 %v6660_v10, %v6660_v10  ;;  %v1356_v29 = vadd.f32 %v1230_v50, %v8149_v28  ;;  %v8150_v50 = vld [vmem:[#allocation44_spill] sm:$0xff] }
 0x231   : > { %v3115_v23 = vmul.f32 %v2989_v39, %v2233_v27  ;;  %v3997_v60 = vmul.f32 2.0, %v3871_v0  ;;  %v3998_v25 = vmul.f32 2.0, %v3872_v21  ;;  %v1481_v52 = vmul.f32 0.31830987, %v1355_v62  ;;  %v1009_v21 = vpop.permute.xlu1 %1008 }
 0x232   : > { %v3116_v15 = vmul.f32 %v2990_v8, %v2234_v44  ;;  %v2361_v17 = vmul.f32 2.7557319e-06, %v2235_v46  ;;  %v2362_v41 = vmul.f32 2.7557319e-06, %v2236_v1  ;;  %v1482_v45 = vmul.f32 0.31830987, %v1356_v29 }
 0x233   : > { %v3241_v4 = vmul.f32 %v3115_v23, %v6627_v40  ;;  %v3747_v7 = vmul.f32 2.0, %v3621_v20  ;;  %v3748_v32 = vmul.f32 2.0, %v3622_v9  ;;  %v6670_v58 = vround.rtne.f32 %v1481_v52  ;;  %v8151_v20 = vld [vmem:[#allocation45_spill] sm:$0xff] }
 0x234   : > { %v3242_v38 = vmul.f32 %v3116_v15, %v6631_v24  ;;  %v2487_v61 = vadd.f32 -0.0001984127, %v2361_v17  ;;  %v2488_v36 = vadd.f32 -0.0001984127, %v2362_v41  ;;  %v6673_v11 = vround.rtne.f32 %v1482_v45 }
 0x235   : > { %v3367_v27 = vadd.f32 %v3241_v4, %v6627_v40  ;;  %v4123_v16 = vsub.f32 1.0, %v3997_v60  ;;  %v4124_v44 = vsub.f32 1.0, %v3998_v25  ;;  %v1733_v14 = vmul.f32 3.140625, %v6670_v58 }
 0x236   : > { %v3368_v13 = vadd.f32 %v3242_v38, %v6631_v24  ;;  %v2613_v19 = vmul.f32 %v2487_v61, %v2235_v46  ;;  %v2614_v34 = vmul.f32 %v2488_v36, %v2236_v1  ;;  %v1734_v59 = vmul.f32 3.140625, %v6673_v11 }
 0x237   : > { %v4249_v5 = vmul.f32 %v4123_v16, %v3367_v27  ;;  %v3873_v48 = vsub.f32 %v6640_v42, %v3747_v7  ;;  %v3874_v2 = vsub.f32 %v6642_v12, %v3748_v32  ;;  %v1859_v0 = vsub.f32 %v1355_v62, %v1733_v14  ;;  %v1013_v14 = vpop.permute.xlu0 %1012 }
 0x238   : > { %v4250_v40 = vmul.f32 %v4124_v44, %v3368_v13  ;;  %v2739_v3 = vadd.f32 0.008333334, %v2613_v19  ;;  %v2740_v37 = vadd.f32 0.008333334, %v2614_v34  ;;  %v1860_v55 = vsub.f32 %v1356_v29, %v1734_v59 }
 0x239   : > { %4375 = vst [vmem:[%s6097_s11 + $0x140] sm:$0xff] %v4249_v5  ;;  %v1985_v22 = vmul.f32 0.0009676536, %v6670_v58  ;;  %v1986_v24 = vmul.f32 0.0009676536, %v6673_v11  ;;  %v3497_v26 = vmul.f32 0.5, %v6670_v58  ;;  %v1231_v12 = vmul.f32 %v5346_v54, %v1009_v21 }
 0x23a   : > { %v3498_v30 = vmul.f32 0.5, %v6673_v11  ;;  %4376 = vst [vmem:[%s6097_s11 + $0x148] sm:$0xff] %v4250_v40  ;;  %v2865_v47 = vmul.f32 %v2739_v3, %v2235_v46  ;;  %v2866_v42 = vmul.f32 %v2740_v37, %v2236_v1  ;;  %v1232_v53 = vmul.f32 %v5348_v57, %v1009_v21 }
 0x23b   : > { %v6689_v31 = vsub.f32 %v1859_v0, %v1985_v22  ;;  %v6691_v49 = vsub.f32 %v1860_v55, %v1986_v24  ;;  %v3623_v6 = vfloor.f32 %v3497_v26  ;;  %v1357_v39 = vadd.f32 %v1231_v12, %v8150_v50  ;;  %v8152_v26 = vld [vmem:[#allocation50_spill] sm:$0xff] }
 0x23c   : > { %v3624_v63 = vfloor.f32 %v3498_v30  ;;  %v2991_v51 = vadd.f32 -0.16666667, %v2865_v47  ;;  %v2992_v18 = vadd.f32 -0.16666667, %v2866_v42  ;;  %v1358_v9 = vadd.f32 %v1232_v53, %v8151_v20  ;;  %v8153_v53 = vld [vmem:[#allocation51_spill] sm:$0xff] }
 0x23d   : > { %v3999_v35 = vmul.f32 2.0, %v3873_v48  ;;  %v4000_v62 = vmul.f32 2.0, %v3874_v2  ;;  %v2237_v8 = vmul.f32 %v6689_v31, %v6689_v31  ;;  %v2238_v28 = vmul.f32 %v6691_v49, %v6691_v49 }
 0x23e   : > { %v3117_v29 = vmul.f32 %v2991_v51, %v2235_v46  ;;  %v3118_v23 = vmul.f32 %v2992_v18, %v2236_v1  ;;  %v1483_v60 = vmul.f32 0.31830987, %v1357_v39  ;;  %v1484_v25 = vmul.f32 0.31830987, %v1358_v9 }
 0x23f   : > { %v2363_v52 = vmul.f32 2.7557319e-06, %v2237_v8  ;;  %v2364_v15 = vmul.f32 2.7557319e-06, %v2238_v28  ;;  %v3749_v17 = vmul.f32 2.0, %v3623_v6  ;;  %v3750_v41 = vmul.f32 2.0, %v3624_v63 }
 0x240   : > { %v3243_v45 = vmul.f32 %v3117_v29, %v6658_v56  ;;  %v3244_v4 = vmul.f32 %v3118_v23, %v6660_v10  ;;  %v6701_v7 = vround.rtne.f32 %v1483_v60  ;;  %v6703_v32 = vround.rtne.f32 %v1484_v25 }
 0x241   : > { %v4125_v38 = vsub.f32 1.0, %v3999_v35  ;;  %v4126_v61 = vsub.f32 1.0, %v4000_v62  ;;  %v2489_v36 = vadd.f32 -0.0001984127, %v2363_v52  ;;  %v2490_v27 = vadd.f32 -0.0001984127, %v2364_v15 }
 0x242   : > { %v3369_v46 = vadd.f32 %v3243_v45, %v6658_v56  ;;  %v3370_v1 = vadd.f32 %v3244_v4, %v6660_v10  ;;  %v1735_v16 = vmul.f32 3.140625, %v6701_v7  ;;  %v1736_v44 = vmul.f32 3.140625, %v6703_v32 }
 0x243   : > { %v2615_v13 = vmul.f32 %v2489_v36, %v2237_v8  ;;  %v2616_v19 = vmul.f32 %v2490_v27, %v2238_v28  ;;  %v3875_v34 = vsub.f32 %v6670_v58, %v3749_v17  ;;  %v3876_v59 = vsub.f32 %v6673_v11, %v3750_v41 }
 0x244   : > { %v4251_v5 = vmul.f32 %v4125_v38, %v3369_v46  ;;  %v4252_v48 = vmul.f32 %v4126_v61, %v3370_v1  ;;  %v1861_v2 = vsub.f32 %v1357_v39, %v1735_v16  ;;  %v1862_v0 = vsub.f32 %v1358_v9, %v1736_v44 }
 0x245   : > { %v2741_v56 = vadd.f32 0.008333334, %v2615_v13  ;;  %v2742_v21 = vadd.f32 0.008333334, %v2616_v19  ;;  %v1987_v10 = vmul.f32 0.0009676536, %v6701_v7  ;;  %v1233_v40 = vmul.f32 %v5346_v54, %v1013_v14 }
 0x246   : > { %4377 = vst [vmem:[%s6097_s11 + $0x150] sm:$0xff] %v4251_v5  ;;  %4378 = vst [vmem:[%s6097_s11 + $0x158] sm:$0xff] %v4252_v48  ;;  %v1988_v3 = vmul.f32 0.0009676536, %v6703_v32  ;;  %v3499_v37 = vmul.f32 0.5, %v6701_v7  ;;  %v3500_v58 = vmul.f32 0.5, %v6703_v32  ;;  %v1234_v11 = vmul.f32 %v5348_v57, %v1013_v14 }
 0x247   : > { %v2867_v55 = vmul.f32 %v2741_v56, %v2237_v8  ;;  %v2868_v22 = vmul.f32 %v2742_v21, %v2238_v28  ;;  %v6719_v24 = vsub.f32 %v1861_v2, %v1987_v10  ;;  %v1359_v30 = vadd.f32 %v1233_v40, %v8152_v26 }
 0x248   : > { %v6722_v47 = vsub.f32 %v1862_v0, %v1988_v3  ;;  %v3625_v42 = vfloor.f32 %v3499_v37  ;;  %v3626_v12 = vfloor.f32 %v3500_v58  ;;  %v1360_v6 = vadd.f32 %v1234_v11, %v8153_v53 }
 0x249   : > { %v2993_v63 = vadd.f32 -0.16666667, %v2867_v55  ;;  %v2994_v51 = vadd.f32 -0.16666667, %v2868_v22  ;;  %v2239_v18 = vmul.f32 %v6719_v24, %v6719_v24  ;;  %v1485_v50 = vmul.f32 0.31830987, %v1359_v30 }
 0x24a   : > { %v4001_v39 = vmul.f32 2.0, %v3875_v34  ;;  %v4002_v20 = vmul.f32 2.0, %v3876_v59  ;;  %v2240_v9 = vmul.f32 %v6722_v47, %v6722_v47  ;;  %v1486_v35 = vmul.f32 0.31830987, %v1360_v6  ;;  %v1017_v34 = vpop.permute.xlu1 %1016  ;;  %v8154_v22 = vld [vmem:[#allocation48_spill] sm:$0xff] }
 0x24b   : > { %v3119_v62 = vmul.f32 %v2993_v63, %v2237_v8  ;;  %v3120_v29 = vmul.f32 %v2994_v51, %v2238_v28  ;;  %v2365_v23 = vmul.f32 2.7557319e-06, %v2239_v18  ;;  %v6729_v60 = vround.rtne.f32 %v1485_v50 }
 0x24c   : > { %v2366_v25 = vmul.f32 2.7557319e-06, %v2240_v9  ;;  %v3751_v52 = vmul.f32 2.0, %v3625_v42  ;;  %v3752_v15 = vmul.f32 2.0, %v3626_v12  ;;  %v6731_v17 = vround.rtne.f32 %v1486_v35 }
 0x24d   : > { %v3245_v41 = vmul.f32 %v3119_v62, %v6689_v31  ;;  %v3246_v45 = vmul.f32 %v3120_v29, %v6691_v49  ;;  %v2491_v4 = vadd.f32 -0.0001984127, %v2365_v23  ;;  %v1737_v38 = vmul.f32 3.140625, %v6729_v60 }
 0x24e   : > { %v4127_v61 = vsub.f32 1.0, %v4001_v39  ;;  %v4128_v36 = vsub.f32 1.0, %v4002_v20  ;;  %v2492_v27 = vadd.f32 -0.0001984127, %v2366_v25  ;;  %v1738_v8 = vmul.f32 3.140625, %v6731_v17 }
 0x24f   : > { %v3371_v28 = vadd.f32 %v3245_v41, %v6689_v31  ;;  %v3372_v46 = vadd.f32 %v3246_v45, %v6691_v49  ;;  %v2617_v1 = vmul.f32 %v2491_v4, %v2239_v18  ;;  %v1863_v16 = vsub.f32 %v1359_v30, %v1737_v38  ;;  %v8155_v30 = vld [vmem:[#allocation49_spill] sm:$0xff] }
 0x250   : > { %v2618_v44 = vmul.f32 %v2492_v27, %v2240_v9  ;;  %v3877_v14 = vsub.f32 %v6701_v7, %v3751_v52  ;;  %v3878_v13 = vsub.f32 %v6703_v32, %v3752_v15  ;;  %v1864_v19 = vsub.f32 %v1360_v6, %v1738_v8 }
 0x251   : > { %v4253_v59 = vmul.f32 %v4127_v61, %v3371_v28  ;;  %v4254_v5 = vmul.f32 %v4128_v36, %v3372_v46  ;;  %v2743_v48 = vadd.f32 0.008333334, %v2617_v1  ;;  %v1989_v2 = vmul.f32 0.0009676536, %v6729_v60 }
 0x252   : > { %v2744_v0 = vadd.f32 0.008333334, %v2618_v44  ;;  %v1990_v31 = vmul.f32 0.0009676536, %v6731_v17  ;;  %v3501_v49 = vmul.f32 0.5, %v6729_v60  ;;  %v3502_v56 = vmul.f32 0.5, %v6731_v17 }
 0x253   : > { %4379 = vst [vmem:[%s6097_s11 + $0x160] sm:$0xff] %v4253_v59  ;;  %4380 = vst [vmem:[%s6097_s11 + $0x168] sm:$0xff] %v4254_v5  ;;  %v2869_v21 = vmul.f32 %v2743_v48, %v2239_v18  ;;  %v6747_v7 = vsub.f32 %v1863_v16, %v1989_v2  ;;  %v1235_v32 = vmul.f32 %v5346_v54, %v1017_v34  ;;  %v4003_v53 = vmul.f32 2.0, %v3877_v14  ;;  %v1021_v16 = vpop.permute.xlu0 %1020 }
 0x254   : > { %v1236_v10 = vmul.f32 %v5348_v57, %v1017_v34  ;;  %v2870_v40 = vmul.f32 %v2744_v0, %v2240_v9  ;;  %v6751_v3 = vsub.f32 %v1864_v19, %v1990_v31  ;;  %v3627_v37 = vfloor.f32 %v3501_v49 }
 0x255   : > { %v3628_v58 = vfloor.f32 %v3502_v56  ;;  %v2995_v11 = vadd.f32 -0.16666667, %v2869_v21  ;;  %v2241_v55 = vmul.f32 %v6747_v7, %v6747_v7  ;;  %v1361_v26 = vadd.f32 %v1235_v32, %v8154_v22  ;;  %v8157_v22 = vld [vmem:[#allocation54_spill] sm:$0xff] }
 0x256   : > { %v1362_v42 = vadd.f32 %v1236_v10, %v8155_v30  ;;  %v2996_v12 = vadd.f32 -0.16666667, %v2870_v40  ;;  %v4004_v6 = vmul.f32 2.0, %v3878_v13  ;;  %v2242_v63 = vmul.f32 %v6751_v3, %v6751_v3  ;;  %v8156_v10 = vld [vmem:[#allocation6_spill] sm:$0xff] }
 0x257   : > { %v3121_v51 = vmul.f32 %v2995_v11, %v2239_v18  ;;  %v2367_v50 = vmul.f32 2.7557319e-06, %v2241_v55  ;;  %v1487_v39 = vmul.f32 0.31830987, %v1361_v26  ;;  %v3753_v29 = vmul.f32 2.0, %v3627_v37 }
 0x258   : > { %v1488_v20 = vmul.f32 0.31830987, %v1362_v42  ;;  %v3122_v35 = vmul.f32 %v2996_v12, %v2240_v9  ;;  %v2368_v62 = vmul.f32 2.7557319e-06, %v2242_v63  ;;  %v3754_v23 = vmul.f32 2.0, %v3628_v58 }
 0x259   : > { %v3247_v25 = vmul.f32 %v3121_v51, %v6719_v24  ;;  %v2493_v52 = vadd.f32 -0.0001984127, %v2367_v50  ;;  %v6760_v15 = vround.rtne.f32 %v1487_v39  ;;  %v4129_v4 = vsub.f32 1.0, %v4003_v53 }
 0x25a   : > { %v6762_v41 = vround.rtne.f32 %v1488_v20  ;;  %v3248_v45 = vmul.f32 %v3122_v35, %v6722_v47  ;;  %v4130_v38 = vsub.f32 1.0, %v4004_v6  ;;  %v2494_v61 = vadd.f32 -0.0001984127, %v2368_v62 }
 0x25b   : > { %v3373_v18 = vadd.f32 %v3247_v25, %v6719_v24  ;;  %v2619_v36 = vmul.f32 %v2493_v52, %v2241_v55  ;;  %v1739_v9 = vmul.f32 3.140625, %v6760_v15  ;;  %v3879_v46 = vsub.f32 %v6729_v60, %v3753_v29 }
 0x25c   : > { %v1740_v27 = vmul.f32 3.140625, %v6762_v41  ;;  %v3374_v8 = vadd.f32 %v3248_v45, %v6722_v47  ;;  %v2620_v28 = vmul.f32 %v2494_v61, %v2242_v63  ;;  %v3880_v1 = vsub.f32 %v6731_v17, %v3754_v23 }
 0x25d   : > { %v4255_v44 = vmul.f32 %v4129_v4, %v3373_v18  ;;  %v2745_v14 = vadd.f32 0.008333334, %v2619_v36  ;;  %v1865_v13 = vsub.f32 %v1361_v26, %v1739_v9  ;;  %v1991_v59 = vmul.f32 0.0009676536, %v6760_v15 }
 0x25e   : > { %v1866_v19 = vsub.f32 %v1362_v42, %v1740_v27  ;;  %v4256_v24 = vmul.f32 %v4130_v38, %v3374_v8  ;;  %v2746_v34 = vadd.f32 0.008333334, %v2620_v28  ;;  %v1992_v5 = vmul.f32 0.0009676536, %v6762_v41 }
 0x25f   : > { %4381 = vst [vmem:[%s6097_s11 + $0x170] sm:$0xff] %v4255_v44  ;;  %v2871_v48 = vmul.f32 %v2745_v14, %v2241_v55  ;;  %v3503_v47 = vmul.f32 0.5, %v6760_v15  ;;  %v3504_v60 = vmul.f32 0.5, %v6762_v41  ;;  %v1237_v2 = vmul.f32 %v5346_v54, %v1021_v16 }
 0x260   : > { %4382 = vst [vmem:[%s6097_s11 + $0x178] sm:$0xff] %v4256_v24  ;;  %v2872_v17 = vmul.f32 %v2746_v34, %v2242_v63  ;;  %v6778_v0 = vsub.f32 %v1865_v13, %v1991_v59  ;;  %v6780_v31 = vsub.f32 %v1866_v19, %v1992_v5  ;;  %v1238_v49 = vmul.f32 %v5348_v57, %v1021_v16 }
 0x261   : > { %v2997_v56 = vadd.f32 -0.16666667, %v2871_v48  ;;  %v3629_v21 = vfloor.f32 %v3503_v47  ;;  %v3630_v32 = vfloor.f32 %v3504_v60  ;;  %v1363_v40 = vadd.f32 %v1237_v2, %v8156_v10 }
 0x262   : > { %v2998_v37 = vadd.f32 -0.16666667, %v2872_v17  ;;  %v2243_v58 = vmul.f32 %v6778_v0, %v6778_v0  ;;  %v2244_v11 = vmul.f32 %v6780_v31, %v6780_v31  ;;  %v1364_v26 = vadd.f32 %v1238_v49, %v8157_v22  ;;  %v8158_v49 = vld [vmem:[#allocation52_spill] sm:$0xff] }
 0x263   : > { %v3123_v30 = vmul.f32 %v2997_v56, %v2241_v55  ;;  %v4005_v42 = vmul.f32 2.0, %v3879_v46  ;;  %v4006_v12 = vmul.f32 2.0, %v3880_v1  ;;  %v1489_v53 = vmul.f32 0.31830987, %v1363_v40  ;;  %v1025_v1 = vpop.permute.xlu1 %1024 }
 0x264   : > { %v3124_v6 = vmul.f32 %v2998_v37, %v2242_v63  ;;  %v2369_v51 = vmul.f32 2.7557319e-06, %v2243_v58  ;;  %v2370_v50 = vmul.f32 2.7557319e-06, %v2244_v11  ;;  %v1490_v39 = vmul.f32 0.31830987, %v1364_v26 }
 0x265   : > { %v3249_v20 = vmul.f32 %v3123_v30, %v6747_v7  ;;  %v3755_v35 = vmul.f32 2.0, %v3629_v21  ;;  %v3756_v62 = vmul.f32 2.0, %v3630_v32  ;;  %v6790_v29 = vround.rtne.f32 %v1489_v53  ;;  %v8159_v21 = vld [vmem:[#allocation53_spill] sm:$0xff] }
 0x266   : > { %v3250_v23 = vmul.f32 %v3124_v6, %v6751_v3  ;;  %v2495_v25 = vadd.f32 -0.0001984127, %v2369_v51  ;;  %v2496_v52 = vadd.f32 -0.0001984127, %v2370_v50  ;;  %v6793_v45 = vround.rtne.f32 %v1490_v39 }
 0x267   : > { %v3375_v55 = vadd.f32 %v3249_v20, %v6747_v7  ;;  %v4131_v4 = vsub.f32 1.0, %v4005_v42  ;;  %v4132_v63 = vsub.f32 1.0, %v4006_v12  ;;  %v1741_v38 = vmul.f32 3.140625, %v6790_v29 }
 0x268   : > { %v3376_v61 = vadd.f32 %v3250_v23, %v6751_v3  ;;  %v2621_v18 = vmul.f32 %v2495_v25, %v2243_v58  ;;  %v2622_v36 = vmul.f32 %v2496_v52, %v2244_v11  ;;  %v1742_v9 = vmul.f32 3.140625, %v6793_v45 }
 0x269   : > { %v4257_v27 = vmul.f32 %v4131_v4, %v3375_v55  ;;  %v3881_v8 = vsub.f32 %v6760_v15, %v3755_v35  ;;  %v3882_v28 = vsub.f32 %v6762_v41, %v3756_v62  ;;  %v1867_v46 = vsub.f32 %v1363_v40, %v1741_v38  ;;  %v1029_v38 = vpop.permute.xlu0 %1028 }
 0x26a   : > { %v4258_v7 = vmul.f32 %v4132_v63, %v3376_v61  ;;  %v2747_v16 = vadd.f32 0.008333334, %v2621_v18  ;;  %v2748_v44 = vadd.f32 0.008333334, %v2622_v36  ;;  %v1868_v14 = vsub.f32 %v1364_v26, %v1742_v9 }
 0x26b   : > { %4383 = vst [vmem:[%s6097_s11 + $0x180] sm:$0xff] %v4257_v27  ;;  %v1993_v13 = vmul.f32 0.0009676536, %v6790_v29  ;;  %v1994_v3 = vmul.f32 0.0009676536, %v6793_v45  ;;  %v3505_v19 = vmul.f32 0.5, %v6790_v29  ;;  %v1239_v41 = vmul.f32 %v5346_v54, %v1025_v1 }
 0x26c   : > { %v3506_v24 = vmul.f32 0.5, %v6793_v45  ;;  %4384 = vst [vmem:[%s6097_s11 + $0x188] sm:$0xff] %v4258_v7  ;;  %v2873_v34 = vmul.f32 %v2747_v16, %v2243_v58  ;;  %v2874_v15 = vmul.f32 %v2748_v44, %v2244_v11  ;;  %v1240_v59 = vmul.f32 %v5348_v57, %v1025_v1 }
 0x26d   : > { %v6809_v5 = vsub.f32 %v1867_v46, %v1993_v13  ;;  %v6811_v48 = vsub.f32 %v1868_v14, %v1994_v3  ;;  %v3631_v47 = vfloor.f32 %v3505_v19  ;;  %v1365_v56 = vadd.f32 %v1239_v41, %v8158_v49  ;;  %v8160_v19 = vld [vmem:[#allocation21_spill] sm:$0xff] }
 0x26e   : > { %v3632_v60 = vfloor.f32 %v3506_v24  ;;  %v2999_v2 = vadd.f32 -0.16666667, %v2873_v34  ;;  %v3000_v17 = vadd.f32 -0.16666667, %v2874_v15  ;;  %v1366_v32 = vadd.f32 %v1240_v59, %v8159_v21  ;;  %v8161_v59 = vld [vmem:[#allocation56_spill] sm:$0xff] }
 0x26f   : > { %v4007_v10 = vmul.f32 2.0, %v3881_v8  ;;  %v4008_v40 = vmul.f32 2.0, %v3882_v28  ;;  %v2245_v37 = vmul.f32 %v6809_v5, %v6809_v5  ;;  %v2246_v22 = vmul.f32 %v6811_v48, %v6811_v48 }
 0x270   : > { %v3125_v26 = vmul.f32 %v2999_v2, %v2243_v58  ;;  %v3126_v30 = vmul.f32 %v3000_v17, %v2244_v11  ;;  %v1491_v42 = vmul.f32 0.31830987, %v1365_v56  ;;  %v1492_v12 = vmul.f32 0.31830987, %v1366_v32 }
 0x271   : > { %v2371_v53 = vmul.f32 2.7557319e-06, %v2245_v37  ;;  %v2372_v6 = vmul.f32 2.7557319e-06, %v2246_v22  ;;  %v3757_v51 = vmul.f32 2.0, %v3631_v47  ;;  %v3758_v50 = vmul.f32 2.0, %v3632_v60 }
 0x272   : > { %v3251_v39 = vmul.f32 %v3125_v26, %v6778_v0  ;;  %v3252_v20 = vmul.f32 %v3126_v30, %v6780_v31  ;;  %v6821_v35 = vround.rtne.f32 %v1491_v42  ;;  %v6823_v62 = vround.rtne.f32 %v1492_v12 }
 0x273   : > { %v4133_v23 = vsub.f32 1.0, %v4007_v10  ;;  %v4134_v25 = vsub.f32 1.0, %v4008_v40  ;;  %v2497_v52 = vadd.f32 -0.0001984127, %v2371_v53  ;;  %v2498_v55 = vadd.f32 -0.0001984127, %v2372_v6 }
 0x274   : > { %v3377_v58 = vadd.f32 %v3251_v39, %v6778_v0  ;;  %v3378_v11 = vadd.f32 %v3252_v20, %v6780_v31  ;;  %v1743_v4 = vmul.f32 3.140625, %v6821_v35  ;;  %v1744_v63 = vmul.f32 3.140625, %v6823_v62 }
 0x275   : > { %v2623_v61 = vmul.f32 %v2497_v52, %v2245_v37  ;;  %v2624_v18 = vmul.f32 %v2498_v55, %v2246_v22  ;;  %v3883_v36 = vsub.f32 %v6790_v29, %v3757_v51  ;;  %v3884_v9 = vsub.f32 %v6793_v45, %v3758_v50 }
 0x276   : > { %v4259_v27 = vmul.f32 %v4133_v23, %v3377_v58  ;;  %v4260_v8 = vmul.f32 %v4134_v25, %v3378_v11  ;;  %v1869_v28 = vsub.f32 %v1365_v56, %v1743_v4  ;;  %v1870_v46 = vsub.f32 %v1366_v32, %v1744_v63 }
 0x277   : > { %v2749_v0 = vadd.f32 0.008333334, %v2623_v61  ;;  %v2750_v1 = vadd.f32 0.008333334, %v2624_v18  ;;  %v1995_v31 = vmul.f32 0.0009676536, %v6821_v35  ;;  %v1241_v7 = vmul.f32 %v5346_v54, %v1029_v38 }
 0x278   : > { %4385 = vst [vmem:[%s6097_s11 + $0x190] sm:$0xff] %v4259_v27  ;;  %4386 = vst [vmem:[%s6097_s11 + $0x198] sm:$0xff] %v4260_v8  ;;  %v1996_v16 = vmul.f32 0.0009676536, %v6823_v62  ;;  %v3507_v44 = vmul.f32 0.5, %v6821_v35  ;;  %v3508_v29 = vmul.f32 0.5, %v6823_v62  ;;  %v1242_v45 = vmul.f32 %v5348_v57, %v1029_v38 }
 0x279   : > { %v2875_v14 = vmul.f32 %v2749_v0, %v2245_v37  ;;  %v2876_v13 = vmul.f32 %v2750_v1, %v2246_v22  ;;  %v6839_v3 = vsub.f32 %v1869_v28, %v1995_v31  ;;  %v1367_v24 = vadd.f32 %v1241_v7, %v8160_v19 }
 0x27a   : > { %v6842_v34 = vsub.f32 %v1870_v46, %v1996_v16  ;;  %v3633_v15 = vfloor.f32 %v3507_v44  ;;  %v3634_v41 = vfloor.f32 %v3508_v29  ;;  %v1368_v47 = vadd.f32 %v1242_v45, %v8161_v59 }
 0x27b   : > { %v3001_v60 = vadd.f32 -0.16666667, %v2875_v14  ;;  %v3002_v2 = vadd.f32 -0.16666667, %v2876_v13  ;;  %v2247_v17 = vmul.f32 %v6839_v3, %v6839_v3  ;;  %v1493_v49 = vmul.f32 0.31830987, %v1367_v24 }
 0x27c   : > { %v4009_v56 = vmul.f32 2.0, %v3883_v36  ;;  %v4010_v21 = vmul.f32 2.0, %v3884_v9  ;;  %v2248_v32 = vmul.f32 %v6842_v34, %v6842_v34  ;;  %v1494_v10 = vmul.f32 0.31830987, %v1368_v47  ;;  %v1033_v36 = vpop.permute.xlu1 %1032  ;;  %v8162_v13 = vld [vmem:[#allocation20_spill] sm:$0xff] }
 0x27d   : > { %v3127_v40 = vmul.f32 %v3001_v60, %v2245_v37  ;;  %v3128_v26 = vmul.f32 %v3002_v2, %v2246_v22  ;;  %v2373_v30 = vmul.f32 2.7557319e-06, %v2247_v17  ;;  %v6849_v42 = vround.rtne.f32 %v1493_v49 }
 0x27e   : > { %v2374_v12 = vmul.f32 2.7557319e-06, %v2248_v32  ;;  %v3759_v53 = vmul.f32 2.0, %v3633_v15  ;;  %v3760_v6 = vmul.f32 2.0, %v3634_v41  ;;  %v6851_v51 = vround.rtne.f32 %v1494_v10 }
 0x27f   : > { %v3253_v50 = vmul.f32 %v3127_v40, %v6809_v5  ;;  %v3254_v39 = vmul.f32 %v3128_v26, %v6811_v48  ;;  %v2499_v20 = vadd.f32 -0.0001984127, %v2373_v30  ;;  %v1745_v23 = vmul.f32 3.140625, %v6849_v42 }
 0x280   : > { %v4135_v25 = vsub.f32 1.0, %v4009_v56  ;;  %v4136_v52 = vsub.f32 1.0, %v4010_v21  ;;  %v2500_v55 = vadd.f32 -0.0001984127, %v2374_v12  ;;  %v1746_v37 = vmul.f32 3.140625, %v6851_v51 }
 0x281   : > { %v3379_v22 = vadd.f32 %v3253_v50, %v6809_v5  ;;  %v3380_v58 = vadd.f32 %v3254_v39, %v6811_v48  ;;  %v2625_v11 = vmul.f32 %v2499_v20, %v2247_v17  ;;  %v1871_v4 = vsub.f32 %v1367_v24, %v1745_v23  ;;  %v8163_v24 = vld [vmem:[#allocation55_spill] sm:$0xff] }
 0x282   : > { %v2626_v63 = vmul.f32 %v2500_v55, %v2248_v32  ;;  %v3885_v38 = vsub.f32 %v6821_v35, %v3759_v53  ;;  %v3886_v61 = vsub.f32 %v6823_v62, %v3760_v6  ;;  %v1872_v18 = vsub.f32 %v1368_v47, %v1746_v37 }
 0x283   : > { %v4261_v9 = vmul.f32 %v4135_v25, %v3379_v22  ;;  %v4262_v27 = vmul.f32 %v4136_v52, %v3380_v58  ;;  %v2751_v8 = vadd.f32 0.008333334, %v2625_v11  ;;  %v1997_v28 = vmul.f32 0.0009676536, %v6849_v42 }
 0x284   : > { %v2752_v46 = vadd.f32 0.008333334, %v2626_v63  ;;  %v1998_v5 = vmul.f32 0.0009676536, %v6851_v51  ;;  %v3509_v48 = vmul.f32 0.5, %v6849_v42  ;;  %v3510_v0 = vmul.f32 0.5, %v6851_v51 }
 0x285   : > { %4387 = vst [vmem:[%s6097_s11 + $0x1a0] sm:$0xff] %v4261_v9  ;;  %4388 = vst [vmem:[%s6097_s11 + $0x1a8] sm:$0xff] %v4262_v27  ;;  %v2877_v1 = vmul.f32 %v2751_v8, %v2247_v17  ;;  %v6867_v35 = vsub.f32 %v1871_v4, %v1997_v28  ;;  %v1243_v62 = vmul.f32 %v5346_v54, %v1033_v36  ;;  %v4011_v59 = vmul.f32 2.0, %v3885_v38  ;;  %v1037_v4 = vpop.permute.xlu0 %1036 }
 0x286   : > { %v1244_v31 = vmul.f32 %v5348_v57, %v1033_v36  ;;  %v2878_v7 = vmul.f32 %v2752_v46, %v2248_v32  ;;  %v6871_v16 = vsub.f32 %v1872_v18, %v1998_v5  ;;  %v3635_v44 = vfloor.f32 %v3509_v48 }
 0x287   : > { %v3636_v29 = vfloor.f32 %v3510_v0  ;;  %v3003_v45 = vadd.f32 -0.16666667, %v2877_v1  ;;  %v2249_v14 = vmul.f32 %v6867_v35, %v6867_v35  ;;  %v1369_v19 = vadd.f32 %v1243_v62, %v8162_v13  ;;  %v8165_v13 = vld [vmem:[#allocation58_spill] sm:$0xff] }
 0x288   : > { %v1370_v15 = vadd.f32 %v1244_v31, %v8163_v24  ;;  %v3004_v41 = vadd.f32 -0.16666667, %v2878_v7  ;;  %v4012_v47 = vmul.f32 2.0, %v3886_v61  ;;  %v2250_v60 = vmul.f32 %v6871_v16, %v6871_v16  ;;  %v8164_v31 = vld [vmem:[#allocation8_spill] sm:$0xff] }
 0x289   : > { %v3129_v2 = vmul.f32 %v3003_v45, %v2247_v17  ;;  %v2375_v49 = vmul.f32 2.7557319e-06, %v2249_v14  ;;  %v1495_v56 = vmul.f32 0.31830987, %v1369_v19  ;;  %v3761_v26 = vmul.f32 2.0, %v3635_v44 }
 0x28a   : > { %v1496_v21 = vmul.f32 0.31830987, %v1370_v15  ;;  %v3130_v10 = vmul.f32 %v3004_v41, %v2248_v32  ;;  %v2376_v40 = vmul.f32 2.7557319e-06, %v2250_v60  ;;  %v3762_v30 = vmul.f32 2.0, %v3636_v29 }
 0x28b   : > { %v3255_v12 = vmul.f32 %v3129_v2, %v6839_v3  ;;  %v2501_v53 = vadd.f32 -0.0001984127, %v2375_v49  ;;  %v6880_v6 = vround.rtne.f32 %v1495_v56  ;;  %v4137_v20 = vsub.f32 1.0, %v4011_v59 }
 0x28c   : > { %v6882_v50 = vround.rtne.f32 %v1496_v21  ;;  %v3256_v39 = vmul.f32 %v3130_v10, %v6842_v34  ;;  %v4138_v23 = vsub.f32 1.0, %v4012_v47  ;;  %v2502_v25 = vadd.f32 -0.0001984127, %v2376_v40 }
 0x28d   : > { %v3381_v17 = vadd.f32 %v3255_v12, %v6839_v3  ;;  %v2627_v52 = vmul.f32 %v2501_v53, %v2249_v14  ;;  %v1747_v32 = vmul.f32 3.140625, %v6880_v6  ;;  %v3887_v58 = vsub.f32 %v6849_v42, %v3761_v26 }
 0x28e   : > { %v1748_v55 = vmul.f32 3.140625, %v6882_v50  ;;  %v3382_v37 = vadd.f32 %v3256_v39, %v6842_v34  ;;  %v2628_v22 = vmul.f32 %v2502_v25, %v2250_v60  ;;  %v3888_v11 = vsub.f32 %v6851_v51, %v3762_v30 }
 0x28f   : > { %v4263_v63 = vmul.f32 %v4137_v20, %v3381_v17  ;;  %v2753_v38 = vadd.f32 0.008333334, %v2627_v52  ;;  %v1873_v61 = vsub.f32 %v1369_v19, %v1747_v32  ;;  %v1999_v9 = vmul.f32 0.0009676536, %v6880_v6 }
 0x290   : > { %v1874_v18 = vsub.f32 %v1370_v15, %v1748_v55  ;;  %v4264_v3 = vmul.f32 %v4138_v23, %v3382_v37  ;;  %v2754_v36 = vadd.f32 0.008333334, %v2628_v22  ;;  %v2000_v27 = vmul.f32 0.0009676536, %v6882_v50 }
 0x291   : > { %4389 = vst [vmem:[%s6097_s11 + $0x1b0] sm:$0xff] %v4263_v63  ;;  %v2879_v8 = vmul.f32 %v2753_v38, %v2249_v14  ;;  %v3511_v34 = vmul.f32 0.5, %v6880_v6  ;;  %v3512_v42 = vmul.f32 0.5, %v6882_v50  ;;  %v1245_v28 = vmul.f32 %v5346_v54, %v1037_v4 }
 0x292   : > { %4390 = vst [vmem:[%s6097_s11 + $0x1b8] sm:$0xff] %v4264_v3  ;;  %v2880_v51 = vmul.f32 %v2754_v36, %v2250_v60  ;;  %v6898_v46 = vsub.f32 %v1873_v61, %v1999_v9  ;;  %v6900_v5 = vsub.f32 %v1874_v18, %v2000_v27  ;;  %v1246_v48 = vmul.f32 %v5348_v57, %v1037_v4 }
 0x293   : > { %v3005_v0 = vadd.f32 -0.16666667, %v2879_v8  ;;  %v3637_v1 = vfloor.f32 %v3511_v34  ;;  %v3638_v62 = vfloor.f32 %v3512_v42  ;;  %v1371_v7 = vadd.f32 %v1245_v28, %v8164_v31 }
 0x294   : > { %v3006_v44 = vadd.f32 -0.16666667, %v2880_v51  ;;  %v2251_v29 = vmul.f32 %v6898_v46, %v6898_v46  ;;  %v2252_v45 = vmul.f32 %v6900_v5, %v6900_v5  ;;  %v1372_v19 = vadd.f32 %v1246_v48, %v8165_v13  ;;  %v8166_v48 = vld [vmem:[#allocation57_spill] sm:$0xff] }
 0x295   : > { %v3131_v24 = vmul.f32 %v3005_v0, %v2249_v14  ;;  %v4013_v15 = vmul.f32 2.0, %v3887_v58  ;;  %v4014_v41 = vmul.f32 2.0, %v3888_v11  ;;  %v1497_v59 = vmul.f32 0.31830987, %v1371_v7  ;;  %v1041_v11 = vpop.permute.xlu1 %1040 }
 0x296   : > { %v3132_v47 = vmul.f32 %v3006_v44, %v2250_v60  ;;  %v2377_v2 = vmul.f32 2.7557319e-06, %v2251_v29  ;;  %v2378_v49 = vmul.f32 2.7557319e-06, %v2252_v45  ;;  %v1498_v56 = vmul.f32 0.31830987, %v1372_v19 }
 0x297   : > { %v3257_v21 = vmul.f32 %v3131_v24, %v6867_v35  ;;  %v3763_v10 = vmul.f32 2.0, %v3637_v1  ;;  %v3764_v40 = vmul.f32 2.0, %v3638_v62  ;;  %v6910_v26 = vround.rtne.f32 %v1497_v59  ;;  %v8167_v1 = vld [vmem:[#allocation5_spill] sm:$0xff] }
 0x298   : > { %v3258_v30 = vmul.f32 %v3132_v47, %v6871_v16  ;;  %v2503_v12 = vadd.f32 -0.0001984127, %v2377_v2  ;;  %v2504_v53 = vadd.f32 -0.0001984127, %v2378_v49  ;;  %v6913_v39 = vround.rtne.f32 %v1498_v56 }
 0x299   : > { %v3383_v14 = vadd.f32 %v3257_v21, %v6867_v35  ;;  %v4139_v20 = vsub.f32 1.0, %v4013_v15  ;;  %v4140_v60 = vsub.f32 1.0, %v4014_v41  ;;  %v1749_v23 = vmul.f32 3.140625, %v6910_v26 }
 0x29a   : > { %v3384_v25 = vadd.f32 %v3258_v30, %v6871_v16  ;;  %v2629_v17 = vmul.f32 %v2503_v12, %v2251_v29  ;;  %v2630_v52 = vmul.f32 %v2504_v53, %v2252_v45  ;;  %v1750_v32 = vmul.f32 3.140625, %v6913_v39 }
 0x29b   : > { %v4265_v55 = vmul.f32 %v4139_v20, %v3383_v14  ;;  %v3889_v37 = vsub.f32 %v6880_v6, %v3763_v10  ;;  %v3890_v22 = vsub.f32 %v6882_v50, %v3764_v40  ;;  %v1875_v58 = vsub.f32 %v1371_v7, %v1749_v23  ;;  %v1045_v23 = vpop.permute.xlu0 %1044 }
 0x29c   : > { %v4266_v35 = vmul.f32 %v4140_v60, %v3384_v25  ;;  %v2755_v4 = vadd.f32 0.008333334, %v2629_v17  ;;  %v2756_v63 = vadd.f32 0.008333334, %v2630_v52  ;;  %v1876_v38 = vsub.f32 %v1372_v19, %v1750_v32 }
 0x29d   : > { %4391 = vst [vmem:[%s6097_s11 + $0x1c0] sm:$0xff] %v4265_v55  ;;  %v2001_v61 = vmul.f32 0.0009676536, %v6910_v26  ;;  %v2002_v16 = vmul.f32 0.0009676536, %v6913_v39  ;;  %v3513_v18 = vmul.f32 0.5, %v6910_v26  ;;  %v1247_v50 = vmul.f32 %v5346_v54, %v1041_v11 }
 0x29e   : > { %v3514_v3 = vmul.f32 0.5, %v6913_v39  ;;  %4392 = vst [vmem:[%s6097_s11 + $0x1c8] sm:$0xff] %v4266_v35  ;;  %v2881_v36 = vmul.f32 %v2755_v4, %v2251_v29  ;;  %v2882_v6 = vmul.f32 %v2756_v63, %v2252_v45  ;;  %v1248_v9 = vmul.f32 %v5348_v57, %v1041_v11 }
 0x29f   : > { %v6929_v27 = vsub.f32 %v1875_v58, %v2001_v61  ;;  %v6931_v8 = vsub.f32 %v1876_v38, %v2002_v16  ;;  %v3639_v34 = vfloor.f32 %v3513_v18  ;;  %v1373_v0 = vadd.f32 %v1247_v50, %v8166_v48  ;;  %v8168_v18 = vld [vmem:[#allocation61_spill] sm:$0xff] }
 0x2a0   : > { %v3640_v42 = vfloor.f32 %v3514_v3  ;;  %v3007_v28 = vadd.f32 -0.16666667, %v2881_v36  ;;  %v3008_v51 = vadd.f32 -0.16666667, %v2882_v6  ;;  %v1374_v62 = vadd.f32 %v1248_v9, %v8167_v1  ;;  %v8169_v9 = vld [vmem:[#allocation62_spill] sm:$0xff] }
 0x2a1   : > { %v4015_v31 = vmul.f32 2.0, %v3889_v37  ;;  %v4016_v7 = vmul.f32 2.0, %v3890_v22  ;;  %v2253_v44 = vmul.f32 %v6929_v27, %v6929_v27  ;;  %v2254_v13 = vmul.f32 %v6931_v8, %v6931_v8 }
 0x2a2   : > { %v3133_v19 = vmul.f32 %v3007_v28, %v2251_v29  ;;  %v3134_v24 = vmul.f32 %v3008_v51, %v2252_v45  ;;  %v1499_v15 = vmul.f32 0.31830987, %v1373_v0  ;;  %v1500_v41 = vmul.f32 0.31830987, %v1374_v62 }
 0x2a3   : > { %v2379_v59 = vmul.f32 2.7557319e-06, %v2253_v44  ;;  %v2380_v47 = vmul.f32 2.7557319e-06, %v2254_v13  ;;  %v3765_v2 = vmul.f32 2.0, %v3639_v34  ;;  %v3766_v49 = vmul.f32 2.0, %v3640_v42 }
 0x2a4   : > { %v3259_v56 = vmul.f32 %v3133_v19, %v6898_v46  ;;  %v3260_v21 = vmul.f32 %v3134_v24, %v6900_v5  ;;  %v6941_v10 = vround.rtne.f32 %v1499_v15  ;;  %v6943_v40 = vround.rtne.f32 %v1500_v41 }
 0x2a5   : > { %v4141_v30 = vsub.f32 1.0, %v4015_v31  ;;  %v4142_v12 = vsub.f32 1.0, %v4016_v7  ;;  %v2505_v53 = vadd.f32 -0.0001984127, %v2379_v59  ;;  %v2506_v14 = vadd.f32 -0.0001984127, %v2380_v47 }
 0x2a6   : > { %v3385_v29 = vadd.f32 %v3259_v56, %v6898_v46  ;;  %v3386_v45 = vadd.f32 %v3260_v21, %v6900_v5  ;;  %v1751_v20 = vmul.f32 3.140625, %v6941_v10  ;;  %v1752_v60 = vmul.f32 3.140625, %v6943_v40 }
 0x2a7   : > { %v2631_v25 = vmul.f32 %v2505_v53, %v2253_v44  ;;  %v2632_v17 = vmul.f32 %v2506_v14, %v2254_v13  ;;  %v3891_v52 = vsub.f32 %v6910_v26, %v3765_v2  ;;  %v3892_v32 = vsub.f32 %v6913_v39, %v3766_v49 }
 0x2a8   : > { %v4267_v55 = vmul.f32 %v4141_v30, %v3385_v29  ;;  %v4268_v37 = vmul.f32 %v4142_v12, %v3386_v45  ;;  %v1877_v22 = vsub.f32 %v1373_v0, %v1751_v20  ;;  %v1878_v58 = vsub.f32 %v1374_v62, %v1752_v60 }
 0x2a9   : > { %v2757_v46 = vadd.f32 0.008333334, %v2631_v25  ;;  %v2758_v11 = vadd.f32 0.008333334, %v2632_v17  ;;  %v2003_v5 = vmul.f32 0.0009676536, %v6941_v10  ;;  %v1249_v35 = vmul.f32 %v5346_v54, %v1045_v23 }
 0x2aa   : > { %4393 = vst [vmem:[%s6097_s11 + $0x1d0] sm:$0xff] %v4267_v55  ;;  %4394 = vst [vmem:[%s6097_s11 + $0x1d8] sm:$0xff] %v4268_v37  ;;  %v2004_v4 = vmul.f32 0.0009676536, %v6943_v40  ;;  %v3515_v63 = vmul.f32 0.5, %v6941_v10  ;;  %v3516_v26 = vmul.f32 0.5, %v6943_v40  ;;  %v1250_v39 = vmul.f32 %v5348_v57, %v1045_v23 }
 0x2ab   : > { %v2883_v38 = vmul.f32 %v2757_v46, %v2253_v44  ;;  %v2884_v61 = vmul.f32 %v2758_v11, %v2254_v13  ;;  %v6959_v16 = vsub.f32 %v1877_v22, %v2003_v5  ;;  %v1375_v3 = vadd.f32 %v1249_v35, %v8168_v18 }
 0x2ac   : > { %v6962_v36 = vsub.f32 %v1878_v58, %v2004_v4  ;;  %v3641_v6 = vfloor.f32 %v3515_v63  ;;  %v3642_v50 = vfloor.f32 %v3516_v26  ;;  %v1376_v34 = vadd.f32 %v1250_v39, %v8169_v9 }
 0x2ad   : > { %v3009_v42 = vadd.f32 -0.16666667, %v2883_v38  ;;  %v3010_v28 = vadd.f32 -0.16666667, %v2884_v61  ;;  %v2255_v51 = vmul.f32 %v6959_v16, %v6959_v16  ;;  %v1501_v48 = vmul.f32 0.31830987, %v1375_v3 }
 0x2ae   : > { %v4017_v0 = vmul.f32 2.0, %v3891_v52  ;;  %v4018_v1 = vmul.f32 2.0, %v3892_v32  ;;  %v2256_v62 = vmul.f32 %v6962_v36, %v6962_v36  ;;  %v1502_v31 = vmul.f32 0.31830987, %v1376_v34  ;;  %v1049_v52 = vpop.permute.xlu1 %1048  ;;  %v8170_v61 = vld [vmem:[#allocation59_spill] sm:$0xff] }
 0x2af   : > { %v3135_v7 = vmul.f32 %v3009_v42, %v2253_v44  ;;  %v3136_v19 = vmul.f32 %v3010_v28, %v2254_v13  ;;  %v2381_v24 = vmul.f32 2.7557319e-06, %v2255_v51  ;;  %v6969_v15 = vround.rtne.f32 %v1501_v48 }
 0x2b0   : > { %v2382_v41 = vmul.f32 2.7557319e-06, %v2256_v62  ;;  %v3767_v59 = vmul.f32 2.0, %v3641_v6  ;;  %v3768_v47 = vmul.f32 2.0, %v3642_v50  ;;  %v6971_v2 = vround.rtne.f32 %v1502_v31 }
 0x2b1   : > { %v3261_v49 = vmul.f32 %v3135_v7, %v6929_v27  ;;  %v3262_v56 = vmul.f32 %v3136_v19, %v6931_v8  ;;  %v2507_v21 = vadd.f32 -0.0001984127, %v2381_v24  ;;  %v1753_v30 = vmul.f32 3.140625, %v6969_v15 }
 0x2b2   : > { %v4143_v12 = vsub.f32 1.0, %v4017_v0  ;;  %v4144_v53 = vsub.f32 1.0, %v4018_v1  ;;  %v2508_v14 = vadd.f32 -0.0001984127, %v2382_v41  ;;  %v1754_v44 = vmul.f32 3.140625, %v6971_v2 }
 0x2b3   : > { %v3387_v13 = vadd.f32 %v3261_v49, %v6929_v27  ;;  %v3388_v29 = vadd.f32 %v3262_v56, %v6931_v8  ;;  %v2633_v45 = vmul.f32 %v2507_v21, %v2255_v51  ;;  %v1879_v20 = vsub.f32 %v1375_v3, %v1753_v30  ;;  %v8171_v3 = vld [vmem:[#allocation60_spill] sm:$0xff] }
 0x2b4   : > { %v2634_v60 = vmul.f32 %v2508_v14, %v2256_v62  ;;  %v3893_v23 = vsub.f32 %v6941_v10, %v3767_v59  ;;  %v3894_v25 = vsub.f32 %v6943_v40, %v3768_v47  ;;  %v1880_v17 = vsub.f32 %v1376_v34, %v1754_v44 }
 0x2b5   : > { %v4269_v32 = vmul.f32 %v4143_v12, %v3387_v13  ;;  %v4270_v55 = vmul.f32 %v4144_v53, %v3388_v29  ;;  %v2759_v37 = vadd.f32 0.008333334, %v2633_v45  ;;  %v2005_v22 = vmul.f32 0.0009676536, %v6969_v15 }
 0x2b6   : > { %v2760_v58 = vadd.f32 0.008333334, %v2634_v60  ;;  %v2006_v27 = vmul.f32 0.0009676536, %v6971_v2  ;;  %v3517_v8 = vmul.f32 0.5, %v6969_v15  ;;  %v3518_v46 = vmul.f32 0.5, %v6971_v2 }
 0x2b7   : > { %4395 = vst [vmem:[%s6097_s11 + $0x1e0] sm:$0xff] %v4269_v32  ;;  %4396 = vst [vmem:[%s6097_s11 + $0x1e8] sm:$0xff] %v4270_v55  ;;  %v2885_v11 = vmul.f32 %v2759_v37, %v2255_v51  ;;  %v6987_v10 = vsub.f32 %v1879_v20, %v2005_v22  ;;  %v1251_v40 = vmul.f32 %v5346_v54, %v1049_v52  ;;  %v4019_v9 = vmul.f32 2.0, %v3893_v23  ;;  %v1053_v20 = vpop.permute.xlu0 %1052 }
 0x2b8   : > { %v1252_v5 = vmul.f32 %v5348_v57, %v1049_v52  ;;  %v2886_v35 = vmul.f32 %v2760_v58, %v2256_v62  ;;  %v6991_v4 = vsub.f32 %v1880_v17, %v2006_v27  ;;  %v3643_v63 = vfloor.f32 %v3517_v8 }
 0x2b9   : > { %v3644_v26 = vfloor.f32 %v3518_v46  ;;  %v3011_v39 = vadd.f32 -0.16666667, %v2885_v11  ;;  %v2257_v38 = vmul.f32 %v6987_v10, %v6987_v10  ;;  %v1377_v18 = vadd.f32 %v1251_v40, %v8170_v61  ;;  %v8173_v61 = vld [vmem:[#allocation64_spill] sm:$0xff] }
 0x2ba   : > { %v1378_v6 = vadd.f32 %v1252_v5, %v8171_v3  ;;  %v3012_v50 = vadd.f32 -0.16666667, %v2886_v35  ;;  %v4020_v34 = vmul.f32 2.0, %v3894_v25  ;;  %v2258_v42 = vmul.f32 %v6991_v4, %v6991_v4  ;;  %v8172_v5 = vld [vmem:[#allocation10_spill] sm:$0xff] }
 0x2bb   : > { %v3137_v28 = vmul.f32 %v3011_v39, %v2255_v51  ;;  %v2383_v48 = vmul.f32 2.7557319e-06, %v2257_v38  ;;  %v1503_v0 = vmul.f32 0.31830987, %v1377_v18  ;;  %v3769_v19 = vmul.f32 2.0, %v3643_v63 }
 0x2bc   : > { %v1504_v1 = vmul.f32 0.31830987, %v1378_v6  ;;  %v3138_v31 = vmul.f32 %v3012_v50, %v2256_v62  ;;  %v2384_v7 = vmul.f32 2.7557319e-06, %v2258_v42  ;;  %v3770_v24 = vmul.f32 2.0, %v3644_v26 }
 0x2bd   : > { %v3263_v41 = vmul.f32 %v3137_v28, %v6959_v16  ;;  %v2509_v59 = vadd.f32 -0.0001984127, %v2383_v48  ;;  %v7000_v47 = vround.rtne.f32 %v1503_v0  ;;  %v4145_v21 = vsub.f32 1.0, %v4019_v9 }
 0x2be   : > { %v7002_v49 = vround.rtne.f32 %v1504_v1  ;;  %v3264_v56 = vmul.f32 %v3138_v31, %v6962_v36  ;;  %v4146_v30 = vsub.f32 1.0, %v4020_v34  ;;  %v2510_v12 = vadd.f32 -0.0001984127, %v2384_v7 }
 0x2bf   : > { %v3389_v51 = vadd.f32 %v3263_v41, %v6959_v16  ;;  %v2635_v53 = vmul.f32 %v2509_v59, %v2257_v38  ;;  %v1755_v62 = vmul.f32 3.140625, %v7000_v47  ;;  %v3895_v29 = vsub.f32 %v6969_v15, %v3769_v19 }
 0x2c0   : > { %v1756_v14 = vmul.f32 3.140625, %v7002_v49  ;;  %v3390_v44 = vadd.f32 %v3264_v56, %v6962_v36  ;;  %v2636_v13 = vmul.f32 %v2510_v12, %v2258_v42  ;;  %v3896_v45 = vsub.f32 %v6971_v2, %v3770_v24 }
 0x2c1   : > { %v4271_v60 = vmul.f32 %v4145_v21, %v3389_v51  ;;  %v2761_v23 = vadd.f32 0.008333334, %v2635_v53  ;;  %v1881_v25 = vsub.f32 %v1377_v18, %v1755_v62  ;;  %v2007_v32 = vmul.f32 0.0009676536, %v7000_v47 }
 0x2c2   : > { %v1882_v17 = vsub.f32 %v1378_v6, %v1756_v14  ;;  %v4272_v16 = vmul.f32 %v4146_v30, %v3390_v44  ;;  %v2762_v52 = vadd.f32 0.008333334, %v2636_v13  ;;  %v2008_v55 = vmul.f32 0.0009676536, %v7002_v49 }
 0x2c3   : > { %4397 = vst [vmem:[%s6097_s11 + $0x1f0] sm:$0xff] %v4271_v60  ;;  %v2887_v37 = vmul.f32 %v2761_v23, %v2257_v38  ;;  %v3519_v36 = vmul.f32 0.5, %v7000_v47  ;;  %v3520_v15 = vmul.f32 0.5, %v7002_v49  ;;  %v1253_v22 = vmul.f32 %v5346_v54, %v1053_v20 }
 0x2c4   : > { %4398 = vst [vmem:[%s6097_s11 + $0x1f8] sm:$0xff] %v4272_v16  ;;  %v2888_v2 = vmul.f32 %v2762_v52, %v2258_v42  ;;  %v7018_v58 = vsub.f32 %v1881_v25, %v2007_v32  ;;  %v7020_v27 = vsub.f32 %v1882_v17, %v2008_v55  ;;  %v1254_v8 = vmul.f32 %v5348_v57, %v1053_v20 }
 0x2c5   : > { %v3013_v46 = vadd.f32 -0.16666667, %v2887_v37  ;;  %v3645_v11 = vfloor.f32 %v3519_v36  ;;  %v3646_v40 = vfloor.f32 %v3520_v15  ;;  %v1379_v35 = vadd.f32 %v1253_v22, %v8172_v5 }
 0x2c6   : > { %v3014_v63 = vadd.f32 -0.16666667, %v2888_v2  ;;  %v2259_v26 = vmul.f32 %v7018_v58, %v7018_v58  ;;  %v2260_v39 = vmul.f32 %v7020_v27, %v7020_v27  ;;  %v1380_v18 = vadd.f32 %v1254_v8, %v8173_v61  ;;  %v8174_v8 = vld [vmem:[#allocation63_spill] sm:$0xff] }
 0x2c7   : > { %v3139_v3 = vmul.f32 %v3013_v46, %v2257_v38  ;;  %v4021_v6 = vmul.f32 2.0, %v3895_v29  ;;  %v4022_v50 = vmul.f32 2.0, %v3896_v45  ;;  %v1505_v9 = vmul.f32 0.31830987, %v1379_v35  ;;  %v1057_v45 = vpop.permute.xlu1 %1056 }
 0x2c8   : > { %v3140_v34 = vmul.f32 %v3014_v63, %v2258_v42  ;;  %v2385_v28 = vmul.f32 2.7557319e-06, %v2259_v26  ;;  %v2386_v48 = vmul.f32 2.7557319e-06, %v2260_v39  ;;  %v1506_v0 = vmul.f32 0.31830987, %v1380_v18 }
 0x2c9   : > { %v3265_v1 = vmul.f32 %v3139_v3, %v6987_v10  ;;  %v3771_v31 = vmul.f32 2.0, %v3645_v11  ;;  %v3772_v7 = vmul.f32 2.0, %v3646_v40  ;;  %v7030_v19 = vround.rtne.f32 %v1505_v9  ;;  %v8175_v11 = vld [vmem:[#allocation7_spill] sm:$0xff] }
 0x2ca   : > { %v3266_v24 = vmul.f32 %v3140_v34, %v6991_v4  ;;  %v2511_v41 = vadd.f32 -0.0001984127, %v2385_v28  ;;  %v2512_v59 = vadd.f32 -0.0001984127, %v2386_v48  ;;  %v7033_v56 = vround.rtne.f32 %v1506_v0 }
 0x2cb   : > { %v3391_v38 = vadd.f32 %v3265_v1, %v6987_v10  ;;  %v4147_v21 = vsub.f32 1.0, %v4021_v6  ;;  %v4148_v42 = vsub.f32 1.0, %v4022_v50  ;;  %v1757_v30 = vmul.f32 3.140625, %v7030_v19 }
 0x2cc   : > { %v3392_v12 = vadd.f32 %v3266_v24, %v6991_v4  ;;  %v2637_v51 = vmul.f32 %v2511_v41, %v2259_v26  ;;  %v2638_v53 = vmul.f32 %v2512_v59, %v2260_v39  ;;  %v1758_v62 = vmul.f32 3.140625, %v7033_v56 }
 0x2cd   : > { %v4273_v14 = vmul.f32 %v4147_v21, %v3391_v38  ;;  %v3897_v44 = vsub.f32 %v7000_v47, %v3771_v31  ;;  %v3898_v13 = vsub.f32 %v7002_v49, %v3772_v7  ;;  %v1883_v29 = vsub.f32 %v1379_v35, %v1757_v30  ;;  %v1061_v30 = vpop.permute.xlu0 %1060 }
 0x2ce   : > { %v4274_v10 = vmul.f32 %v4148_v42, %v3392_v12  ;;  %v2763_v20 = vadd.f32 0.008333334, %v2637_v51  ;;  %v2764_v60 = vadd.f32 0.008333334, %v2638_v53  ;;  %v1884_v23 = vsub.f32 %v1380_v18, %v1758_v62 }
 0x2cf   : > { %4399 = vst [vmem:[%s6097_s11 + $0x200] sm:$0xff] %v4273_v14  ;;  %v2009_v25 = vmul.f32 0.0009676536, %v7030_v19  ;;  %v2010_v4 = vmul.f32 0.0009676536, %v7033_v56  ;;  %v3521_v17 = vmul.f32 0.5, %v7030_v19  ;;  %v1255_v49 = vmul.f32 %v5346_v54, %v1057_v45 }
 0x2d0   : > { %v3522_v16 = vmul.f32 0.5, %v7033_v56  ;;  %4400 = vst [vmem:[%s6097_s11 + $0x208] sm:$0xff] %v4274_v10  ;;  %v2889_v52 = vmul.f32 %v2763_v20, %v2259_v26  ;;  %v2890_v47 = vmul.f32 %v2764_v60, %v2260_v39  ;;  %v1256_v32 = vmul.f32 %v5348_v57, %v1057_v45 }
 0x2d1   : > { %v7049_v55 = vsub.f32 %v1883_v29, %v2009_v25  ;;  %v7051_v37 = vsub.f32 %v1884_v23, %v2010_v4  ;;  %v3647_v36 = vfloor.f32 %v3521_v17  ;;  %v1381_v46 = vadd.f32 %v1255_v49, %v8174_v8  ;;  %v8176_v17 = vld [vmem:[#allocation67_spill] sm:$0xff] }
 0x2d2   : > { %v3648_v15 = vfloor.f32 %v3522_v16  ;;  %v3015_v22 = vadd.f32 -0.16666667, %v2889_v52  ;;  %v3016_v2 = vadd.f32 -0.16666667, %v2890_v47  ;;  %v1382_v40 = vadd.f32 %v1256_v32, %v8175_v11  ;;  %v8177_v32 = vld [vmem:[#allocation68_spill] sm:$0xff] }
 0x2d3   : > { %v4023_v5 = vmul.f32 2.0, %v3897_v44  ;;  %v4024_v35 = vmul.f32 2.0, %v3898_v13  ;;  %v2261_v63 = vmul.f32 %v7049_v55, %v7049_v55  ;;  %v2262_v61 = vmul.f32 %v7051_v37, %v7051_v37 }
 0x2d4   : > { %v3141_v18 = vmul.f32 %v3015_v22, %v2259_v26  ;;  %v3142_v3 = vmul.f32 %v3016_v2, %v2260_v39  ;;  %v1507_v6 = vmul.f32 0.31830987, %v1381_v46  ;;  %v1508_v50 = vmul.f32 0.31830987, %v1382_v40 }
 0x2d5   : > { %v2387_v9 = vmul.f32 2.7557319e-06, %v2261_v63  ;;  %v2388_v34 = vmul.f32 2.7557319e-06, %v2262_v61  ;;  %v3773_v28 = vmul.f32 2.0, %v3647_v36  ;;  %v3774_v48 = vmul.f32 2.0, %v3648_v15 }
 0x2d6   : > { %v3267_v0 = vmul.f32 %v3141_v18, %v7018_v58  ;;  %v3268_v1 = vmul.f32 %v3142_v3, %v7020_v27  ;;  %v7061_v31 = vround.rtne.f32 %v1507_v6  ;;  %v7063_v7 = vround.rtne.f32 %v1508_v50 }
 0x2d7   : > { %v4149_v24 = vsub.f32 1.0, %v4023_v5  ;;  %v4150_v41 = vsub.f32 1.0, %v4024_v35  ;;  %v2513_v59 = vadd.f32 -0.0001984127, %v2387_v9  ;;  %v2514_v38 = vadd.f32 -0.0001984127, %v2388_v34 }
 0x2d8   : > { %v3393_v26 = vadd.f32 %v3267_v0, %v7018_v58  ;;  %v3394_v39 = vadd.f32 %v3268_v1, %v7020_v27  ;;  %v1759_v21 = vmul.f32 3.140625, %v7061_v31  ;;  %v1760_v42 = vmul.f32 3.140625, %v7063_v7 }
 0x2d9   : > { %v2639_v12 = vmul.f32 %v2513_v59, %v2261_v63  ;;  %v2640_v51 = vmul.f32 %v2514_v38, %v2262_v61  ;;  %v3899_v53 = vsub.f32 %v7030_v19, %v3773_v28  ;;  %v3900_v62 = vsub.f32 %v7033_v56, %v3774_v48 }
 0x2da   : > { %v4275_v14 = vmul.f32 %v4149_v24, %v3393_v26  ;;  %v4276_v44 = vmul.f32 %v4150_v41, %v3394_v39  ;;  %v1885_v13 = vsub.f32 %v1381_v46, %v1759_v21  ;;  %v1886_v29 = vsub.f32 %v1382_v40, %v1760_v42 }
 0x2db   : > { %v2765_v58 = vadd.f32 0.008333334, %v2639_v12  ;;  %v2766_v45 = vadd.f32 0.008333334, %v2640_v51  ;;  %v2011_v27 = vmul.f32 0.0009676536, %v7061_v31  ;;  %v1257_v10 = vmul.f32 %v5346_v54, %v1061_v30 }
 0x2dc   : > { %4401 = vst [vmem:[%s6097_s11 + $0x210] sm:$0xff] %v4275_v14  ;;  %4402 = vst [vmem:[%s6097_s11 + $0x218] sm:$0xff] %v4276_v44  ;;  %v2012_v20 = vmul.f32 0.0009676536, %v7063_v7  ;;  %v3523_v60 = vmul.f32 0.5, %v7061_v31  ;;  %v3524_v19 = vmul.f32 0.5, %v7063_v7  ;;  %v1258_v56 = vmul.f32 %v5348_v57, %v1061_v30 }
 0x2dd   : > { %v2891_v23 = vmul.f32 %v2765_v58, %v2261_v63  ;;  %v2892_v25 = vmul.f32 %v2766_v45, %v2262_v61  ;;  %v7079_v4 = vsub.f32 %v1885_v13, %v2011_v27  ;;  %v1383_v16 = vadd.f32 %v1257_v10, %v8176_v17 }
 0x2de   : > { %v7082_v52 = vsub.f32 %v1886_v29, %v2012_v20  ;;  %v3649_v47 = vfloor.f32 %v3523_v60  ;;  %v3650_v49 = vfloor.f32 %v3524_v19  ;;  %v1384_v36 = vadd.f32 %v1258_v56, %v8177_v32 }
 0x2df   : > { %v3017_v15 = vadd.f32 -0.16666667, %v2891_v23  ;;  %v3018_v22 = vadd.f32 -0.16666667, %v2892_v25  ;;  %v2263_v2 = vmul.f32 %v7079_v4, %v7079_v4  ;;  %v1509_v8 = vmul.f32 0.31830987, %v1383_v16 }
 0x2e0   : > { %v4025_v46 = vmul.f32 2.0, %v3899_v53  ;;  %v4026_v11 = vmul.f32 2.0, %v3900_v62  ;;  %v2264_v40 = vmul.f32 %v7082_v52, %v7082_v52  ;;  %v1510_v5 = vmul.f32 0.31830987, %v1384_v36  ;;  %v1065_v53 = vpop.permute.xlu1 %1064  ;;  %v8178_v25 = vld [vmem:[#allocation65_spill] sm:$0xff] }
 0x2e1   : > { %v3143_v35 = vmul.f32 %v3017_v15, %v2261_v63  ;;  %v3144_v18 = vmul.f32 %v3018_v22, %v2262_v61  ;;  %v2389_v3 = vmul.f32 2.7557319e-06, %v2263_v2  ;;  %v7089_v6 = vround.rtne.f32 %v1509_v8 }
 0x2e2   : > { %v2390_v50 = vmul.f32 2.7557319e-06, %v2264_v40  ;;  %v3775_v9 = vmul.f32 2.0, %v3649_v47  ;;  %v3776_v34 = vmul.f32 2.0, %v3650_v49  ;;  %v7091_v28 = vround.rtne.f32 %v1510_v5 }
 0x2e3   : > { %v3269_v48 = vmul.f32 %v3143_v35, %v7049_v55  ;;  %v3270_v0 = vmul.f32 %v3144_v18, %v7051_v37  ;;  %v2515_v1 = vadd.f32 -0.0001984127, %v2389_v3  ;;  %v1761_v24 = vmul.f32 3.140625, %v7089_v6 }
 0x2e4   : > { %v4151_v41 = vsub.f32 1.0, %v4025_v46  ;;  %v4152_v59 = vsub.f32 1.0, %v4026_v11  ;;  %v2516_v38 = vadd.f32 -0.0001984127, %v2390_v50  ;;  %v1762_v63 = vmul.f32 3.140625, %v7091_v28 }
 0x2e5   : > { %v3395_v61 = vadd.f32 %v3269_v48, %v7049_v55  ;;  %v3396_v26 = vadd.f32 %v3270_v0, %v7051_v37  ;;  %v2641_v39 = vmul.f32 %v2515_v1, %v2263_v2  ;;  %v1887_v21 = vsub.f32 %v1383_v16, %v1761_v24  ;;  %v8179_v16 = vld [vmem:[#allocation66_spill] sm:$0xff] }
 0x2e6   : > { %v2642_v42 = vmul.f32 %v2516_v38, %v2264_v40  ;;  %v3901_v30 = vsub.f32 %v7061_v31, %v3775_v9  ;;  %v3902_v12 = vsub.f32 %v7063_v7, %v3776_v34  ;;  %v1888_v51 = vsub.f32 %v1384_v36, %v1762_v63 }
 0x2e7   : > { %v4277_v62 = vmul.f32 %v4151_v41, %v3395_v61  ;;  %v4278_v14 = vmul.f32 %v4152_v59, %v3396_v26  ;;  %v2767_v44 = vadd.f32 0.008333334, %v2641_v39  ;;  %v2013_v13 = vmul.f32 0.0009676536, %v7089_v6 }
 0x2e8   : > { %v2768_v29 = vadd.f32 0.008333334, %v2642_v42  ;;  %v2014_v55 = vmul.f32 0.0009676536, %v7091_v28  ;;  %v3525_v37 = vmul.f32 0.5, %v7089_v6  ;;  %v3526_v58 = vmul.f32 0.5, %v7091_v28 }
 0x2e9   : > { %4403 = vst [vmem:[%s6097_s11 + $0x220] sm:$0xff] %v4277_v62  ;;  %4404 = vst [vmem:[%s6097_s11 + $0x228] sm:$0xff] %v4278_v14  ;;  %v2893_v45 = vmul.f32 %v2767_v44, %v2263_v2  ;;  %v7107_v31 = vsub.f32 %v1887_v21, %v2013_v13  ;;  %v1259_v7 = vmul.f32 %v5346_v54, %v1065_v53  ;;  %v4027_v32 = vmul.f32 2.0, %v3901_v30  ;;  %v1069_v21 = vpop.permute.xlu0 %1068 }
 0x2ea   : > { %v1260_v27 = vmul.f32 %v5348_v57, %v1065_v53  ;;  %v2894_v10 = vmul.f32 %v2768_v29, %v2264_v40  ;;  %v7111_v20 = vsub.f32 %v1888_v51, %v2014_v55  ;;  %v3651_v60 = vfloor.f32 %v3525_v37 }
 0x2eb   : > { %v3652_v19 = vfloor.f32 %v3526_v58  ;;  %v3019_v56 = vadd.f32 -0.16666667, %v2893_v45  ;;  %v2265_v23 = vmul.f32 %v7107_v31, %v7107_v31  ;;  %v1385_v17 = vadd.f32 %v1259_v7, %v8178_v25  ;;  %v8181_v25 = vld [vmem:[#allocation70_spill] sm:$0xff] }
 0x2ec   : > { %v1386_v47 = vadd.f32 %v1260_v27, %v8179_v16  ;;  %v3020_v49 = vadd.f32 -0.16666667, %v2894_v10  ;;  %v4028_v36 = vmul.f32 2.0, %v3902_v12  ;;  %v2266_v15 = vmul.f32 %v7111_v20, %v7111_v20  ;;  %v8180_v27 = vld [vmem:[#allocation69_spill] sm:$0xff] }
 0x2ed   : > { %v3145_v22 = vmul.f32 %v3019_v56, %v2263_v2  ;;  %v2391_v8 = vmul.f32 2.7557319e-06, %v2265_v23  ;;  %v1511_v46 = vmul.f32 0.31830987, %v1385_v17  ;;  %v3777_v18 = vmul.f32 2.0, %v3651_v60 }
 0x2ee   : > { %v1512_v11 = vmul.f32 0.31830987, %v1386_v47  ;;  %v3146_v5 = vmul.f32 %v3020_v49, %v2264_v40  ;;  %v2392_v35 = vmul.f32 2.7557319e-06, %v2266_v15  ;;  %v3778_v3 = vmul.f32 2.0, %v3652_v19 }
 0x2ef   : > { %v3271_v50 = vmul.f32 %v3145_v22, %v7079_v4  ;;  %v2517_v9 = vadd.f32 -0.0001984127, %v2391_v8  ;;  %v7120_v34 = vround.rtne.f32 %v1511_v46  ;;  %v4153_v1 = vsub.f32 1.0, %v4027_v32 }
 0x2f0   : > { %v7122_v48 = vround.rtne.f32 %v1512_v11  ;;  %v3272_v0 = vmul.f32 %v3146_v5, %v7082_v52  ;;  %v4154_v24 = vsub.f32 1.0, %v4028_v36  ;;  %v2518_v41 = vadd.f32 -0.0001984127, %v2392_v35 }
 0x2f1   : > { %v3397_v2 = vadd.f32 %v3271_v50, %v7079_v4  ;;  %v2643_v59 = vmul.f32 %v2517_v9, %v2265_v23  ;;  %v1763_v40 = vmul.f32 3.140625, %v7120_v34  ;;  %v3903_v26 = vsub.f32 %v7089_v6, %v3777_v18 }
 0x2f2   : > { %v1764_v38 = vmul.f32 3.140625, %v7122_v48  ;;  %v3398_v63 = vadd.f32 %v3272_v0, %v7082_v52  ;;  %v2644_v61 = vmul.f32 %v2518_v41, %v2266_v15  ;;  %v3904_v39 = vsub.f32 %v7091_v28, %v3778_v3 }
 0x2f3   : > { %v4279_v42 = vmul.f32 %v4153_v1, %v3397_v2  ;;  %v2769_v30 = vadd.f32 0.008333334, %v2643_v59  ;;  %v1889_v12 = vsub.f32 %v1385_v17, %v1763_v40  ;;  %v2015_v62 = vmul.f32 0.0009676536, %v7120_v34 }
 0x2f4   : > { %v1890_v51 = vsub.f32 %v1386_v47, %v1764_v38  ;;  %v4280_v4 = vmul.f32 %v4154_v24, %v3398_v63  ;;  %v2770_v53 = vadd.f32 0.008333334, %v2644_v61  ;;  %v2016_v14 = vmul.f32 0.0009676536, %v7122_v48 }
 0x2f5   : > { %4405 = vst [vmem:[%s6097_s11 + $0x230] sm:$0xff] %v4279_v42  ;;  %v2895_v44 = vmul.f32 %v2769_v30, %v2265_v23  ;;  %v3527_v52 = vmul.f32 0.5, %v7120_v34  ;;  %v3528_v6 = vmul.f32 0.5, %v7122_v48  ;;  %v1261_v13 = vmul.f32 %v5346_v54, %v1069_v21 }
 0x2f6   : > { %4406 = vst [vmem:[%s6097_s11 + $0x238] sm:$0xff] %v4280_v4  ;;  %v2896_v28 = vmul.f32 %v2770_v53, %v2266_v15  ;;  %v7138_v29 = vsub.f32 %v1889_v12, %v2015_v62  ;;  %v7140_v55 = vsub.f32 %v1890_v51, %v2016_v14  ;;  %v1262_v37 = vmul.f32 %v5348_v57, %v1069_v21 }
 0x2f7   : > { %v3021_v58 = vadd.f32 -0.16666667, %v2895_v44  ;;  %v3653_v45 = vfloor.f32 %v3527_v52  ;;  %v3654_v7 = vfloor.f32 %v3528_v6  ;;  %v1387_v10 = vadd.f32 %v1261_v13, %v8180_v27 }
 0x2f8   : > { %v3022_v60 = vadd.f32 -0.16666667, %v2896_v28  ;;  %v2267_v19 = vmul.f32 %v7138_v29, %v7138_v29  ;;  %v2268_v56 = vmul.f32 %v7140_v55, %v7140_v55  ;;  %v1388_v17 = vadd.f32 %v1262_v37, %v8181_v25  ;;  %v8182_v37 = vld [vmem:[#allocation9_spill] sm:$0xff] }
 0x2f9   : > { %v3147_v16 = vmul.f32 %v3021_v58, %v2265_v23  ;;  %v4029_v47 = vmul.f32 2.0, %v3903_v26  ;;  %v4030_v49 = vmul.f32 2.0, %v3904_v39  ;;  %v1513_v32 = vmul.f32 0.31830987, %v1387_v10  ;;  %v1073_v39 = vpop.permute.xlu1 %1072 }
 0x2fa   : > { %v3148_v36 = vmul.f32 %v3022_v60, %v2266_v15  ;;  %v2393_v22 = vmul.f32 2.7557319e-06, %v2267_v19  ;;  %v2394_v8 = vmul.f32 2.7557319e-06, %v2268_v56  ;;  %v1514_v46 = vmul.f32 0.31830987, %v1388_v17 }
 0x2fb   : > { %v3273_v11 = vmul.f32 %v3147_v16, %v7107_v31  ;;  %v3779_v5 = vmul.f32 2.0, %v3653_v45  ;;  %v3780_v35 = vmul.f32 2.0, %v3654_v7  ;;  %v7150_v18 = vround.rtne.f32 %v1513_v32  ;;  %v8183_v45 = vld [vmem:[#allocation12_spill] sm:$0xff] }
 0x2fc   : > { %v3274_v3 = vmul.f32 %v3148_v36, %v7111_v20  ;;  %v2519_v50 = vadd.f32 -0.0001984127, %v2393_v22  ;;  %v2520_v9 = vadd.f32 -0.0001984127, %v2394_v8  ;;  %v7153_v0 = vround.rtne.f32 %v1514_v46 }
 0x2fd   : > { %v3399_v23 = vadd.f32 %v3273_v11, %v7107_v31  ;;  %v4155_v1 = vsub.f32 1.0, %v4029_v47  ;;  %v4156_v15 = vsub.f32 1.0, %v4030_v49  ;;  %v1765_v24 = vmul.f32 3.140625, %v7150_v18 }
 0x2fe   : > { %v3400_v41 = vadd.f32 %v3274_v3, %v7111_v20  ;;  %v2645_v2 = vmul.f32 %v2519_v50, %v2267_v19  ;;  %v2646_v59 = vmul.f32 %v2520_v9, %v2268_v56  ;;  %v1766_v40 = vmul.f32 3.140625, %v7153_v0 }
 0x2ff   : > { %v4281_v38 = vmul.f32 %v4155_v1, %v3399_v23  ;;  %v3905_v63 = vsub.f32 %v7120_v34, %v3779_v5  ;;  %v3906_v61 = vsub.f32 %v7122_v48, %v3780_v35  ;;  %v1891_v26 = vsub.f32 %v1387_v10, %v1765_v24  ;;  %v1077_v24 = vpop.permute.xlu0 %1076 }
 0x300   : > { %v4282_v31 = vmul.f32 %v4156_v15, %v3400_v41  ;;  %v2771_v21 = vadd.f32 0.008333334, %v2645_v2  ;;  %v2772_v42 = vadd.f32 0.008333334, %v2646_v59  ;;  %v1892_v30 = vsub.f32 %v1388_v17, %v1766_v40 }
 0x301   : > { %4407 = vst [vmem:[%s6097_s11 + $0x240] sm:$0xff] %v4281_v38  ;;  %v2017_v12 = vmul.f32 0.0009676536, %v7150_v18  ;;  %v2018_v20 = vmul.f32 0.0009676536, %v7153_v0  ;;  %v3529_v51 = vmul.f32 0.5, %v7150_v18  ;;  %v1263_v48 = vmul.f32 %v5346_v54, %v1073_v39 }
 0x302   : > { %v3530_v4 = vmul.f32 0.5, %v7153_v0  ;;  %4408 = vst [vmem:[%s6097_s11 + $0x248] sm:$0xff] %v4282_v31  ;;  %v2897_v53 = vmul.f32 %v2771_v21, %v2267_v19  ;;  %v2898_v34 = vmul.f32 %v2772_v42, %v2268_v56  ;;  %v1264_v62 = vmul.f32 %v5348_v57, %v1073_v39 }
 0x303   : > { %v7169_v14 = vsub.f32 %v1891_v26, %v2017_v12  ;;  %v7171_v44 = vsub.f32 %v1892_v30, %v2018_v20  ;;  %v3655_v52 = vfloor.f32 %v3529_v51  ;;  %v1389_v58 = vadd.f32 %v1263_v48, %v8182_v37  ;;  %v8184_v51 = vld [vmem:[#allocation73_spill] sm:$0xff] }
 0x304   : > { %v3656_v6 = vfloor.f32 %v3530_v4  ;;  %v3023_v13 = vadd.f32 -0.16666667, %v2897_v53  ;;  %v3024_v28 = vadd.f32 -0.16666667, %v2898_v34  ;;  %v1390_v7 = vadd.f32 %v1264_v62, %v8183_v45  ;;  %v8185_v62 = vld [vmem:[#allocation74_spill] sm:$0xff] }
 0x305   : > { %v4031_v27 = vmul.f32 2.0, %v3905_v63  ;;  %v4032_v10 = vmul.f32 2.0, %v3906_v61  ;;  %v2269_v60 = vmul.f32 %v7169_v14, %v7169_v14  ;;  %v2270_v25 = vmul.f32 %v7171_v44, %v7171_v44 }
 0x306   : > { %v3149_v17 = vmul.f32 %v3023_v13, %v2267_v19  ;;  %v3150_v16 = vmul.f32 %v3024_v28, %v2268_v56  ;;  %v1515_v47 = vmul.f32 0.31830987, %v1389_v58  ;;  %v1516_v49 = vmul.f32 0.31830987, %v1390_v7 }
 0x307   : > { %v2395_v32 = vmul.f32 2.7557319e-06, %v2269_v60  ;;  %v2396_v36 = vmul.f32 2.7557319e-06, %v2270_v25  ;;  %v3781_v22 = vmul.f32 2.0, %v3655_v52  ;;  %v3782_v8 = vmul.f32 2.0, %v3656_v6 }
 0x308   : > { %v3275_v46 = vmul.f32 %v3149_v17, %v7138_v29  ;;  %v3276_v11 = vmul.f32 %v3150_v16, %v7140_v55  ;;  %v7181_v5 = vround.rtne.f32 %v1515_v47  ;;  %v7183_v35 = vround.rtne.f32 %v1516_v49 }
 0x309   : > { %v4157_v3 = vsub.f32 1.0, %v4031_v27  ;;  %v4158_v50 = vsub.f32 1.0, %v4032_v10  ;;  %v2521_v9 = vadd.f32 -0.0001984127, %v2395_v32  ;;  %v2522_v23 = vadd.f32 -0.0001984127, %v2396_v36 }
 0x30a   : > { %v3401_v19 = vadd.f32 %v3275_v46, %v7138_v29  ;;  %v3402_v56 = vadd.f32 %v3276_v11, %v7140_v55  ;;  %v1767_v1 = vmul.f32 3.140625, %v7181_v5  ;;  %v1768_v15 = vmul.f32 3.140625, %v7183_v35 }
 0x30b   : > { %v2647_v41 = vmul.f32 %v2521_v9, %v2269_v60  ;;  %v2648_v2 = vmul.f32 %v2522_v23, %v2270_v25  ;;  %v3907_v59 = vsub.f32 %v7150_v18, %v3781_v22  ;;  %v3908_v40 = vsub.f32 %v7153_v0, %v3782_v8 }
 0x30c   : > { %v4283_v38 = vmul.f32 %v4157_v3, %v3401_v19  ;;  %v4284_v63 = vmul.f32 %v4158_v50, %v3402_v56  ;;  %v1893_v61 = vsub.f32 %v1389_v58, %v1767_v1  ;;  %v1894_v26 = vsub.f32 %v1390_v7, %v1768_v15 }
 0x30d   : > { %v2773_v29 = vadd.f32 0.008333334, %v2647_v41  ;;  %v2774_v39 = vadd.f32 0.008333334, %v2648_v2  ;;  %v2019_v55 = vmul.f32 0.0009676536, %v7181_v5  ;;  %v1265_v31 = vmul.f32 %v5346_v54, %v1077_v24 }
 0x30e   : > { %4409 = vst [vmem:[%s6097_s11 + $0x250] sm:$0xff] %v4283_v38  ;;  %4410 = vst [vmem:[%s6097_s11 + $0x258] sm:$0xff] %v4284_v63  ;;  %v2020_v21 = vmul.f32 0.0009676536, %v7183_v35  ;;  %v3531_v42 = vmul.f32 0.5, %v7181_v5  ;;  %v3532_v18 = vmul.f32 0.5, %v7183_v35  ;;  %v1266_v0 = vmul.f32 %v5348_v57, %v1077_v24 }
 0x30f   : > { %v2899_v30 = vmul.f32 %v2773_v29, %v2269_v60  ;;  %v2900_v12 = vmul.f32 %v2774_v39, %v2270_v25  ;;  %v7199_v20 = vsub.f32 %v1893_v61, %v2019_v55  ;;  %v1391_v4 = vadd.f32 %v1265_v31, %v8184_v51 }
 0x310   : > { %v7202_v53 = vsub.f32 %v1894_v26, %v2020_v21  ;;  %v3657_v34 = vfloor.f32 %v3531_v42  ;;  %v3658_v48 = vfloor.f32 %v3532_v18  ;;  %v1392_v52 = vadd.f32 %v1266_v0, %v8185_v62 }
 0x311   : > { %v3025_v6 = vadd.f32 -0.16666667, %v2899_v30  ;;  %v3026_v13 = vadd.f32 -0.16666667, %v2900_v12  ;;  %v2271_v28 = vmul.f32 %v7199_v20, %v7199_v20  ;;  %v1517_v37 = vmul.f32 0.31830987, %v1391_v4 }
 0x312   : > { %v4033_v58 = vmul.f32 2.0, %v3907_v59  ;;  %v4034_v45 = vmul.f32 2.0, %v3908_v40  ;;  %v2272_v7 = vmul.f32 %v7202_v53, %v7202_v53  ;;  %v1518_v27 = vmul.f32 0.31830987, %v1392_v52  ;;  %v1081_v59 = vpop.permute.xlu1 %1080  ;;  %v8186_v12 = vld [vmem:[#allocation71_spill] sm:$0xff] }
 0x313   : > { %v3151_v10 = vmul.f32 %v3025_v6, %v2269_v60  ;;  %v3152_v17 = vmul.f32 %v3026_v13, %v2270_v25  ;;  %v2397_v16 = vmul.f32 2.7557319e-06, %v2271_v28  ;;  %v7209_v47 = vround.rtne.f32 %v1517_v37 }
 0x314   : > { %v2398_v49 = vmul.f32 2.7557319e-06, %v2272_v7  ;;  %v3783_v32 = vmul.f32 2.0, %v3657_v34  ;;  %v3784_v36 = vmul.f32 2.0, %v3658_v48  ;;  %v7211_v22 = vround.rtne.f32 %v1518_v27 }
 0x315   : > { %v3277_v8 = vmul.f32 %v3151_v10, %v7169_v14  ;;  %v3278_v46 = vmul.f32 %v3152_v17, %v7171_v44  ;;  %v2523_v11 = vadd.f32 -0.0001984127, %v2397_v16  ;;  %v1769_v3 = vmul.f32 3.140625, %v7209_v47 }
 0x316   : > { %v4159_v50 = vsub.f32 1.0, %v4033_v58  ;;  %v4160_v9 = vsub.f32 1.0, %v4034_v45  ;;  %v2524_v23 = vadd.f32 -0.0001984127, %v2398_v49  ;;  %v1770_v60 = vmul.f32 3.140625, %v7211_v22 }
 0x317   : > { %v3403_v25 = vadd.f32 %v3277_v8, %v7169_v14  ;;  %v3404_v19 = vadd.f32 %v3278_v46, %v7171_v44  ;;  %v2649_v56 = vmul.f32 %v2523_v11, %v2271_v28  ;;  %v1895_v1 = vsub.f32 %v1391_v4, %v1769_v3  ;;  %v8187_v4 = vld [vmem:[#allocation72_spill] sm:$0xff] }
 0x318   : > { %v2650_v15 = vmul.f32 %v2524_v23, %v2272_v7  ;;  %v3909_v24 = vsub.f32 %v7181_v5, %v3783_v32  ;;  %v3910_v41 = vsub.f32 %v7183_v35, %v3784_v36  ;;  %v1896_v2 = vsub.f32 %v1392_v52, %v1770_v60 }
 0x319   : > { %v4285_v40 = vmul.f32 %v4159_v50, %v3403_v25  ;;  %v4286_v38 = vmul.f32 %v4160_v9, %v3404_v19  ;;  %v2775_v63 = vadd.f32 0.008333334, %v2649_v56  ;;  %v2021_v61 = vmul.f32 0.0009676536, %v7209_v47 }
 0x31a   : > { %v2776_v26 = vadd.f32 0.008333334, %v2650_v15  ;;  %v2022_v14 = vmul.f32 0.0009676536, %v7211_v22  ;;  %v3533_v44 = vmul.f32 0.5, %v7209_v47  ;;  %v3534_v29 = vmul.f32 0.5, %v7211_v22 }
 0x31b   : > { %4411 = vst [vmem:[%s6097_s11 + $0x260] sm:$0xff] %v4285_v40  ;;  %4412 = vst [vmem:[%s6097_s11 + $0x268] sm:$0xff] %v4286_v38  ;;  %v2901_v39 = vmul.f32 %v2775_v63, %v2271_v28  ;;  %v7227_v5 = vsub.f32 %v1895_v1, %v2021_v61  ;;  %v1267_v35 = vmul.f32 %v5346_v54, %v1081_v59  ;;  %v4035_v62 = vmul.f32 2.0, %v3909_v24  ;;  %v1085_v1 = vpop.permute.xlu0 %1084 }
 0x31c   : > { %v1268_v55 = vmul.f32 %v5348_v57, %v1081_v59  ;;  %v2902_v31 = vmul.f32 %v2776_v26, %v2272_v7  ;;  %v7231_v21 = vsub.f32 %v1896_v2, %v2022_v14  ;;  %v3659_v42 = vfloor.f32 %v3533_v44 }
 0x31d   : > { %v3660_v18 = vfloor.f32 %v3534_v29  ;;  %v3027_v0 = vadd.f32 -0.16666667, %v2901_v39  ;;  %v2273_v30 = vmul.f32 %v7227_v5, %v7227_v5  ;;  %v1393_v51 = vadd.f32 %v1267_v35, %v8186_v12  ;;  %v8189_v12 = vld [vmem:[#allocation76_spill] sm:$0xff] }
 0x31e   : > { %v1394_v34 = vadd.f32 %v1268_v55, %v8187_v4  ;;  %v3028_v48 = vadd.f32 -0.16666667, %v2902_v31  ;;  %v4036_v52 = vmul.f32 2.0, %v3910_v41  ;;  %v2274_v6 = vmul.f32 %v7231_v21, %v7231_v21  ;;  %v8188_v55 = vld [vmem:[#allocation75_spill] sm:$0xff] }
 0x31f   : > { %v3153_v13 = vmul.f32 %v3027_v0, %v2271_v28  ;;  %v2399_v37 = vmul.f32 2.7557319e-06, %v2273_v30  ;;  %v1519_v58 = vmul.f32 0.31830987, %v1393_v51  ;;  %v3785_v17 = vmul.f32 2.0, %v3659_v42 }
 0x320   : > { %v1520_v45 = vmul.f32 0.31830987, %v1394_v34  ;;  %v3154_v27 = vmul.f32 %v3028_v48, %v2272_v7  ;;  %v2400_v10 = vmul.f32 2.7557319e-06, %v2274_v6  ;;  %v3786_v16 = vmul.f32 2.0, %v3660_v18 }
 0x321   : > { %v3279_v49 = vmul.f32 %v3153_v13, %v7199_v20  ;;  %v2525_v32 = vadd.f32 -0.0001984127, %v2399_v37  ;;  %v7240_v36 = vround.rtne.f32 %v1519_v58  ;;  %v4161_v11 = vsub.f32 1.0, %v4035_v62 }
 0x322   : > { %v7242_v8 = vround.rtne.f32 %v1520_v45  ;;  %v3280_v46 = vmul.f32 %v3154_v27, %v7202_v53  ;;  %v4162_v3 = vsub.f32 1.0, %v4036_v52  ;;  %v2526_v50 = vadd.f32 -0.0001984127, %v2400_v10 }
 0x323   : > { %v3405_v28 = vadd.f32 %v3279_v49, %v7199_v20  ;;  %v2651_v9 = vmul.f32 %v2525_v32, %v2273_v30  ;;  %v1771_v7 = vmul.f32 3.140625, %v7240_v36  ;;  %v3911_v19 = vsub.f32 %v7209_v47, %v3785_v17 }
 0x324   : > { %v1772_v23 = vmul.f32 3.140625, %v7242_v8  ;;  %v3406_v60 = vadd.f32 %v3280_v46, %v7202_v53  ;;  %v2652_v25 = vmul.f32 %v2526_v50, %v2274_v6  ;;  %v3912_v56 = vsub.f32 %v7211_v22, %v3786_v16 }
 0x325   : > { %v4287_v15 = vmul.f32 %v4161_v11, %v3405_v28  ;;  %v2777_v24 = vadd.f32 0.008333334, %v2651_v9  ;;  %v1897_v41 = vsub.f32 %v1393_v51, %v1771_v7  ;;  %v2023_v40 = vmul.f32 0.0009676536, %v7240_v36 }
 0x326   : > { %v1898_v2 = vsub.f32 %v1394_v34, %v1772_v23  ;;  %v4288_v20 = vmul.f32 %v4162_v3, %v3406_v60  ;;  %v2778_v59 = vadd.f32 0.008333334, %v2652_v25  ;;  %v2024_v38 = vmul.f32 0.0009676536, %v7242_v8 }
 0x327   : > { %4413 = vst [vmem:[%s6097_s11 + $0x270] sm:$0xff] %v4287_v15  ;;  %v2903_v63 = vmul.f32 %v2777_v24, %v2273_v30  ;;  %v3535_v53 = vmul.f32 0.5, %v7240_v36  ;;  %v3536_v47 = vmul.f32 0.5, %v7242_v8  ;;  %v1269_v61 = vmul.f32 %v5346_v54, %v1085_v1 }
 0x328   : > { %4414 = vst [vmem:[%s6097_s11 + $0x278] sm:$0xff] %v4288_v20  ;;  %v2904_v22 = vmul.f32 %v2778_v59, %v2274_v6  ;;  %v7258_v26 = vsub.f32 %v1897_v41, %v2023_v40  ;;  %v7260_v14 = vsub.f32 %v1898_v2, %v2024_v38  ;;  %v1270_v44 = vmul.f32 %v5348_v57, %v1085_v1 }
 0x329   : > { %v3029_v29 = vadd.f32 -0.16666667, %v2903_v63  ;;  %v3661_v39 = vfloor.f32 %v3535_v53  ;;  %v3662_v35 = vfloor.f32 %v3536_v47  ;;  %v1395_v31 = vadd.f32 %v1269_v61, %v8188_v55 }
 0x32a   : > { %v3030_v42 = vadd.f32 -0.16666667, %v2904_v22  ;;  %v2275_v18 = vmul.f32 %v7258_v26, %v7258_v26  ;;  %v2276_v0 = vmul.f32 %v7260_v14, %v7260_v14  ;;  %v1396_v51 = vadd.f32 %v1270_v44, %v8189_v12  ;;  %v8190_v44 = vld [vmem:[#allocation11_spill] sm:$0xff] }
 0x32b   : > { %v3155_v4 = vmul.f32 %v3029_v29, %v2273_v30  ;;  %v4037_v34 = vmul.f32 2.0, %v3911_v19  ;;  %v4038_v48 = vmul.f32 2.0, %v3912_v56  ;;  %v1521_v62 = vmul.f32 0.31830987, %v1395_v31  ;;  %v1089_v56 = vpop.permute.xlu1 %1088 }
 0x32c   : > { %v3156_v52 = vmul.f32 %v3030_v42, %v2274_v6  ;;  %v2401_v13 = vmul.f32 2.7557319e-06, %v2275_v18  ;;  %v2402_v37 = vmul.f32 2.7557319e-06, %v2276_v0  ;;  %v1522_v58 = vmul.f32 0.31830987, %v1396_v51 }
 0x32d   : > { %v3281_v45 = vmul.f32 %v3155_v4, %v7227_v5  ;;  %v3787_v27 = vmul.f32 2.0, %v3661_v39  ;;  %v3788_v10 = vmul.f32 2.0, %v3662_v35  ;;  %v7270_v17 = vround.rtne.f32 %v1521_v62  ;;  %v8191_v39 = vld [vmem:[#allocation14_spill] sm:$0xff] }
 0x32e   : > { %v3282_v16 = vmul.f32 %v3156_v52, %v7231_v21  ;;  %v2527_v49 = vadd.f32 -0.0001984127, %v2401_v13  ;;  %v2528_v32 = vadd.f32 -0.0001984127, %v2402_v37  ;;  %v7273_v46 = vround.rtne.f32 %v1522_v58 }
 0x32f   : > { %v3407_v30 = vadd.f32 %v3281_v45, %v7227_v5  ;;  %v4163_v11 = vsub.f32 1.0, %v4037_v34  ;;  %v4164_v6 = vsub.f32 1.0, %v4038_v48  ;;  %v1773_v3 = vmul.f32 3.140625, %v7270_v17 }
 0x330   : > { %v3408_v50 = vadd.f32 %v3282_v16, %v7231_v21  ;;  %v2653_v28 = vmul.f32 %v2527_v49, %v2275_v18  ;;  %v2654_v9 = vmul.f32 %v2528_v32, %v2276_v0  ;;  %v1774_v7 = vmul.f32 3.140625, %v7273_v46 }
 0x331   : > { %v4289_v23 = vmul.f32 %v4163_v11, %v3407_v30  ;;  %v3913_v60 = vsub.f32 %v7240_v36, %v3787_v27  ;;  %v3914_v25 = vsub.f32 %v7242_v8, %v3788_v10  ;;  %v1899_v19 = vsub.f32 %v1395_v31, %v1773_v3  ;;  %v1093_v3 = vpop.permute.xlu0 %1092 }
 0x332   : > { %v4290_v5 = vmul.f32 %v4164_v6, %v3408_v50  ;;  %v2779_v1 = vadd.f32 0.008333334, %v2653_v28  ;;  %v2780_v15 = vadd.f32 0.008333334, %v2654_v9  ;;  %v1900_v24 = vsub.f32 %v1396_v51, %v1774_v7 }
 0x333   : > { %4415 = vst [vmem:[%s6097_s11 + $0x280] sm:$0xff] %v4289_v23  ;;  %v2025_v41 = vmul.f32 0.0009676536, %v7270_v17  ;;  %v2026_v21 = vmul.f32 0.0009676536, %v7273_v46  ;;  %v3537_v2 = vmul.f32 0.5, %v7270_v17  ;;  %v1271_v8 = vmul.f32 %v5346_v54, %v1089_v56 }
 0x334   : > { %v3538_v20 = vmul.f32 0.5, %v7273_v46  ;;  %4416 = vst [vmem:[%s6097_s11 + $0x288] sm:$0xff] %v4290_v5  ;;  %v2905_v59 = vmul.f32 %v2779_v1, %v2275_v18  ;;  %v2906_v36 = vmul.f32 %v2780_v15, %v2276_v0  ;;  %v1272_v40 = vmul.f32 %v5348_v57, %v1089_v56 }
 0x335   : > { %v7289_v38 = vsub.f32 %v1899_v19, %v2025_v41  ;;  %v7291_v63 = vsub.f32 %v1900_v24, %v2026_v21  ;;  %v3663_v53 = vfloor.f32 %v3537_v2  ;;  %v1397_v29 = vadd.f32 %v1271_v8, %v8190_v44  ;;  %v8192_v2 = vld [vmem:[#allocation79_spill] sm:$0xff] }
 0x336   : > { %v3664_v47 = vfloor.f32 %v3538_v20  ;;  %v3031_v61 = vadd.f32 -0.16666667, %v2905_v59  ;;  %v3032_v22 = vadd.f32 -0.16666667, %v2906_v36  ;;  %v1398_v35 = vadd.f32 %v1272_v40, %v8191_v39  ;;  %v8193_v40 = vld [vmem:[#allocation13_spill] sm:$0xff] }
 0x337   : > { %v4039_v55 = vmul.f32 2.0, %v3913_v60  ;;  %v4040_v31 = vmul.f32 2.0, %v3914_v25  ;;  %v2277_v42 = vmul.f32 %v7289_v38, %v7289_v38  ;;  %v2278_v12 = vmul.f32 %v7291_v63, %v7291_v63 }
 0x338   : > { %v3157_v51 = vmul.f32 %v3031_v61, %v2275_v18  ;;  %v3158_v4 = vmul.f32 %v3032_v22, %v2276_v0  ;;  %v1523_v34 = vmul.f32 0.31830987, %v1397_v29  ;;  %v1524_v48 = vmul.f32 0.31830987, %v1398_v35 }
 0x339   : > { %v2403_v62 = vmul.f32 2.7557319e-06, %v2277_v42  ;;  %v2404_v52 = vmul.f32 2.7557319e-06, %v2278_v12  ;;  %v3789_v13 = vmul.f32 2.0, %v3663_v53  ;;  %v3790_v37 = vmul.f32 2.0, %v3664_v47 }
 0x33a   : > { %v3283_v58 = vmul.f32 %v3157_v51, %v7258_v26  ;;  %v3284_v45 = vmul.f32 %v3158_v4, %v7260_v14  ;;  %v7301_v27 = vround.rtne.f32 %v1523_v34  ;;  %v7303_v10 = vround.rtne.f32 %v1524_v48 }
 0x33b   : > { %v4165_v16 = vsub.f32 1.0, %v4039_v55  ;;  %v4166_v49 = vsub.f32 1.0, %v4040_v31  ;;  %v2529_v32 = vadd.f32 -0.0001984127, %v2403_v62  ;;  %v2530_v30 = vadd.f32 -0.0001984127, %v2404_v52 }
 0x33c   : > { %v3409_v18 = vadd.f32 %v3283_v58, %v7258_v26  ;;  %v3410_v0 = vadd.f32 %v3284_v45, %v7260_v14  ;;  %v1775_v11 = vmul.f32 3.140625, %v7301_v27  ;;  %v1776_v6 = vmul.f32 3.140625, %v7303_v10 }
 0x33d   : > { %v2655_v50 = vmul.f32 %v2529_v32, %v2277_v42  ;;  %v2656_v28 = vmul.f32 %v2530_v30, %v2278_v12  ;;  %v3915_v9 = vsub.f32 %v7270_v17, %v3789_v13  ;;  %v3916_v7 = vsub.f32 %v7273_v46, %v3790_v37 }
 0x33e   : > { %v4291_v23 = vmul.f32 %v4165_v16, %v3409_v18  ;;  %v4292_v60 = vmul.f32 %v4166_v49, %v3410_v0  ;;  %v1901_v25 = vsub.f32 %v1397_v29, %v1775_v11  ;;  %v1902_v19 = vsub.f32 %v1398_v35, %v1776_v6 }
 0x33f   : > { %v2781_v26 = vadd.f32 0.008333334, %v2655_v50  ;;  %v2782_v56 = vadd.f32 0.008333334, %v2656_v28  ;;  %v2027_v14 = vmul.f32 0.0009676536, %v7301_v27  ;;  %v1273_v5 = vmul.f32 %v5346_v54, %v1093_v3 }
 0x340   : > { %4417 = vst [vmem:[%s6097_s11 + $0x290] sm:$0xff] %v4291_v23  ;;  %4418 = vst [vmem:[%s6097_s11 + $0x298] sm:$0xff] %v4292_v60  ;;  %v2028_v1 = vmul.f32 0.0009676536, %v7303_v10  ;;  %v3539_v15 = vmul.f32 0.5, %v7301_v27  ;;  %v3540_v17 = vmul.f32 0.5, %v7303_v10  ;;  %v1274_v46 = vmul.f32 %v5348_v57, %v1093_v3 }
 0x341   : > { %v2907_v24 = vmul.f32 %v2781_v26, %v2277_v42  ;;  %v2908_v41 = vmul.f32 %v2782_v56, %v2278_v12  ;;  %v7319_v21 = vsub.f32 %v1901_v25, %v2027_v14  ;;  %v1399_v20 = vadd.f32 %v1273_v5, %v8192_v2 }
 0x342   : > { %v7322_v59 = vsub.f32 %v1902_v19, %v2028_v1  ;;  %v3665_v36 = vfloor.f32 %v3539_v15  ;;  %v3666_v8 = vfloor.f32 %v3540_v17  ;;  %v1400_v53 = vadd.f32 %v1274_v46, %v8193_v40 }
 0x343   : > { %v3033_v47 = vadd.f32 -0.16666667, %v2907_v24  ;;  %v3034_v61 = vadd.f32 -0.16666667, %v2908_v41  ;;  %v2279_v22 = vmul.f32 %v7319_v21, %v7319_v21  ;;  %v1525_v44 = vmul.f32 0.31830987, %v1399_v20 }
 0x344   : > { %v4041_v29 = vmul.f32 2.0, %v3915_v9  ;;  %v4042_v39 = vmul.f32 2.0, %v3916_v7  ;;  %v2280_v35 = vmul.f32 %v7322_v59, %v7322_v59  ;;  %v1526_v55 = vmul.f32 0.31830987, %v1400_v53  ;;  %v1097_v9 = vpop.permute.xlu1 %1096  ;;  %v8194_v41 = vld [vmem:[#allocation77_spill] sm:$0xff] }
 0x345   : > { %v3159_v31 = vmul.f32 %v3033_v47, %v2277_v42  ;;  %v3160_v51 = vmul.f32 %v3034_v61, %v2278_v12  ;;  %v2405_v4 = vmul.f32 2.7557319e-06, %v2279_v22  ;;  %v7329_v34 = vround.rtne.f32 %v1525_v44 }
 0x346   : > { %v2406_v48 = vmul.f32 2.7557319e-06, %v2280_v35  ;;  %v3791_v62 = vmul.f32 2.0, %v3665_v36  ;;  %v3792_v52 = vmul.f32 2.0, %v3666_v8  ;;  %v7331_v13 = vround.rtne.f32 %v1526_v55 }
 0x347   : > { %v3285_v37 = vmul.f32 %v3159_v31, %v7289_v38  ;;  %v3286_v58 = vmul.f32 %v3160_v51, %v7291_v63  ;;  %v2531_v45 = vadd.f32 -0.0001984127, %v2405_v4  ;;  %v1777_v16 = vmul.f32 3.140625, %v7329_v34 }
 0x348   : > { %v4167_v49 = vsub.f32 1.0, %v4041_v29  ;;  %v4168_v32 = vsub.f32 1.0, %v4042_v39  ;;  %v2532_v30 = vadd.f32 -0.0001984127, %v2406_v48  ;;  %v1778_v42 = vmul.f32 3.140625, %v7331_v13 }
 0x349   : > { %v3411_v12 = vadd.f32 %v3285_v37, %v7289_v38  ;;  %v3412_v18 = vadd.f32 %v3286_v58, %v7291_v63  ;;  %v2657_v0 = vmul.f32 %v2531_v45, %v2279_v22  ;;  %v1903_v11 = vsub.f32 %v1399_v20, %v1777_v16  ;;  %v8195_v20 = vld [vmem:[#allocation78_spill] sm:$0xff] }
 0x34a   : > { %v2658_v6 = vmul.f32 %v2532_v30, %v2280_v35  ;;  %v3917_v3 = vsub.f32 %v7301_v27, %v3791_v62  ;;  %v3918_v50 = vsub.f32 %v7303_v10, %v3792_v52  ;;  %v1904_v28 = vsub.f32 %v1400_v53, %v1778_v42 }
 0x34b   : > { %v4293_v7 = vmul.f32 %v4167_v49, %v3411_v12  ;;  %v4294_v23 = vmul.f32 %v4168_v32, %v3412_v18  ;;  %v2783_v60 = vadd.f32 0.008333334, %v2657_v0  ;;  %v2029_v25 = vmul.f32 0.0009676536, %v7329_v34 }
 0x34c   : > { %v2784_v19 = vadd.f32 0.008333334, %v2658_v6  ;;  %v2030_v38 = vmul.f32 0.0009676536, %v7331_v13  ;;  %v3541_v63 = vmul.f32 0.5, %v7329_v34  ;;  %v3542_v26 = vmul.f32 0.5, %v7331_v13 }
 0x34d   : > { %4419 = vst [vmem:[%s6097_s11 + $0x2a0] sm:$0xff] %v4293_v7  ;;  %4420 = vst [vmem:[%s6097_s11 + $0x2a8] sm:$0xff] %v4294_v23  ;;  %v2909_v56 = vmul.f32 %v2783_v60, %v2279_v22  ;;  %v7347_v27 = vsub.f32 %v1903_v11, %v2029_v25  ;;  %v1275_v10 = vmul.f32 %v5346_v54, %v1097_v9  ;;  %v4043_v40 = vmul.f32 2.0, %v3917_v3  ;;  %v1101_v11 = vpop.permute.xlu0 %1100 }
 0x34e   : > { %v1276_v14 = vmul.f32 %v5348_v57, %v1097_v9  ;;  %v2910_v5 = vmul.f32 %v2784_v19, %v2280_v35  ;;  %v7351_v1 = vsub.f32 %v1904_v28, %v2030_v38  ;;  %v3667_v15 = vfloor.f32 %v3541_v63 }
 0x34f   : > { %v3668_v17 = vfloor.f32 %v3542_v26  ;;  %v3035_v46 = vadd.f32 -0.16666667, %v2909_v56  ;;  %v2281_v24 = vmul.f32 %v7347_v27, %v7347_v27  ;;  %v1401_v2 = vadd.f32 %v1275_v10, %v8194_v41  ;;  %v8197_v41 = vld [vmem:[#allocation82_spill] sm:$0xff] }
 0x350   : > { %v1402_v36 = vadd.f32 %v1276_v14, %v8195_v20  ;;  %v3036_v8 = vadd.f32 -0.16666667, %v2910_v5  ;;  %v4044_v53 = vmul.f32 2.0, %v3918_v50  ;;  %v2282_v47 = vmul.f32 %v7351_v1, %v7351_v1  ;;  %v8196_v14 = vld [vmem:[#allocation81_spill] sm:$0xff] }
 0x351   : > { %v3161_v61 = vmul.f32 %v3035_v46, %v2279_v22  ;;  %v2407_v44 = vmul.f32 2.7557319e-06, %v2281_v24  ;;  %v1527_v29 = vmul.f32 0.31830987, %v1401_v2  ;;  %v3793_v51 = vmul.f32 2.0, %v3667_v15 }
 0x352   : > { %v1528_v39 = vmul.f32 0.31830987, %v1402_v36  ;;  %v3162_v55 = vmul.f32 %v3036_v8, %v2280_v35  ;;  %v2408_v31 = vmul.f32 2.7557319e-06, %v2282_v47  ;;  %v3794_v4 = vmul.f32 2.0, %v3668_v17 }
 0x353   : > { %v3287_v48 = vmul.f32 %v3161_v61, %v7319_v21  ;;  %v2533_v62 = vadd.f32 -0.0001984127, %v2407_v44  ;;  %v7360_v52 = vround.rtne.f32 %v1527_v29  ;;  %v4169_v45 = vsub.f32 1.0, %v4043_v40 }
 0x354   : > { %v7362_v37 = vround.rtne.f32 %v1528_v39  ;;  %v3288_v58 = vmul.f32 %v3162_v55, %v7322_v59  ;;  %v4170_v16 = vsub.f32 1.0, %v4044_v53  ;;  %v2534_v49 = vadd.f32 -0.0001984127, %v2408_v31 }
 0x355   : > { %v3413_v22 = vadd.f32 %v3287_v48, %v7319_v21  ;;  %v2659_v32 = vmul.f32 %v2533_v62, %v2281_v24  ;;  %v1779_v35 = vmul.f32 3.140625, %v7360_v52  ;;  %v3919_v18 = vsub.f32 %v7329_v34, %v3793_v51 }
 0x356   : > { %v1780_v30 = vmul.f32 3.140625, %v7362_v37  ;;  %v3414_v42 = vadd.f32 %v3288_v58, %v7322_v59  ;;  %v2660_v12 = vmul.f32 %v2534_v49, %v2282_v47  ;;  %v3920_v0 = vsub.f32 %v7331_v13, %v3794_v4 }
 0x357   : > { %v4295_v6 = vmul.f32 %v4169_v45, %v3413_v22  ;;  %v2785_v3 = vadd.f32 0.008333334, %v2659_v32  ;;  %v1905_v50 = vsub.f32 %v1401_v2, %v1779_v35  ;;  %v2031_v7 = vmul.f32 0.0009676536, %v7360_v52 }
 0x358   : > { %v1906_v28 = vsub.f32 %v1402_v36, %v1780_v30  ;;  %v4296_v21 = vmul.f32 %v4170_v16, %v3414_v42  ;;  %v2786_v9 = vadd.f32 0.008333334, %v2660_v12  ;;  %v2032_v23 = vmul.f32 0.0009676536, %v7362_v37 }
 0x359   : > { %4421 = vst [vmem:[%s6097_s11 + $0x2b0] sm:$0xff] %v4295_v6  ;;  %v2911_v60 = vmul.f32 %v2785_v3, %v2281_v24  ;;  %v3543_v59 = vmul.f32 0.5, %v7360_v52  ;;  %v3544_v34 = vmul.f32 0.5, %v7362_v37  ;;  %v1277_v25 = vmul.f32 %v5346_v54, %v1101_v11 }
 0x35a   : > { %4422 = vst [vmem:[%s6097_s11 + $0x2b8] sm:$0xff] %v4296_v21  ;;  %v2912_v13 = vmul.f32 %v2786_v9, %v2282_v47  ;;  %v7378_v19 = vsub.f32 %v1905_v50, %v2031_v7  ;;  %v7380_v38 = vsub.f32 %v1906_v28, %v2032_v23  ;;  %v1278_v63 = vmul.f32 %v5348_v57, %v1101_v11 }
 0x35b   : > { %v3037_v26 = vadd.f32 -0.16666667, %v2911_v60  ;;  %v3669_v56 = vfloor.f32 %v3543_v59  ;;  %v3670_v10 = vfloor.f32 %v3544_v34  ;;  %v1403_v5 = vadd.f32 %v1277_v25, %v8196_v14 }
 0x35c   : > { %v3038_v15 = vadd.f32 -0.16666667, %v2912_v13  ;;  %v2283_v17 = vmul.f32 %v7378_v19, %v7378_v19  ;;  %v2284_v46 = vmul.f32 %v7380_v38, %v7380_v38  ;;  %v1404_v2 = vadd.f32 %v1278_v63, %v8197_v41  ;;  %v8198_v63 = vld [vmem:[#allocation16_spill] sm:$0xff] }
 0x35d   : > { %v3163_v20 = vmul.f32 %v3037_v26, %v2281_v24  ;;  %v4045_v36 = vmul.f32 2.0, %v3919_v18  ;;  %v4046_v8 = vmul.f32 2.0, %v3920_v0  ;;  %v1529_v40 = vmul.f32 0.31830987, %v1403_v5  ;;  %v1105_v0 = vpop.permute.xlu1 %1104 }
 0x35e   : > { %v3164_v53 = vmul.f32 %v3038_v15, %v2282_v47  ;;  %v2409_v61 = vmul.f32 2.7557319e-06, %v2283_v17  ;;  %v2410_v44 = vmul.f32 2.7557319e-06, %v2284_v46  ;;  %v1530_v29 = vmul.f32 0.31830987, %v1404_v2 }
 0x35f   : > { %v3289_v39 = vmul.f32 %v3163_v20, %v7347_v27  ;;  %v3795_v55 = vmul.f32 2.0, %v3669_v56  ;;  %v3796_v31 = vmul.f32 2.0, %v3670_v10  ;;  %v7390_v51 = vround.rtne.f32 %v1529_v40  ;;  %v8199_v56 = vld [vmem:[#allocation80_spill] sm:$0xff] }
 0x360   : > { %v3290_v4 = vmul.f32 %v3164_v53, %v7351_v1  ;;  %v2535_v48 = vadd.f32 -0.0001984127, %v2409_v61  ;;  %v2536_v62 = vadd.f32 -0.0001984127, %v2410_v44  ;;  %v7393_v58 = vround.rtne.f32 %v1530_v29 }
 0x361   : > { %v3415_v24 = vadd.f32 %v3289_v39, %v7347_v27  ;;  %v4171_v45 = vsub.f32 1.0, %v4045_v36  ;;  %v4172_v47 = vsub.f32 1.0, %v4046_v8  ;;  %v1781_v16 = vmul.f32 3.140625, %v7390_v51 }
 0x362   : > { %v3416_v49 = vadd.f32 %v3290_v4, %v7351_v1  ;;  %v2661_v22 = vmul.f32 %v2535_v48, %v2283_v17  ;;  %v2662_v32 = vmul.f32 %v2536_v62, %v2284_v46  ;;  %v1782_v35 = vmul.f32 3.140625, %v7393_v58 }
 0x363   : > { %v4297_v30 = vmul.f32 %v4171_v45, %v3415_v24  ;;  %v3921_v42 = vsub.f32 %v7360_v52, %v3795_v55  ;;  %v3922_v12 = vsub.f32 %v7362_v37, %v3796_v31  ;;  %v1907_v18 = vsub.f32 %v1403_v5, %v1781_v16  ;;  %v1109_v16 = vpop.permute.xlu0 %1108 }
 0x364   : > { %v4298_v27 = vmul.f32 %v4172_v47, %v3416_v49  ;;  %v2787_v11 = vadd.f32 0.008333334, %v2661_v22  ;;  %v2788_v6 = vadd.f32 0.008333334, %v2662_v32  ;;  %v1908_v3 = vsub.f32 %v1404_v2, %v1782_v35 }
 0x365   : > { %4423 = vst [vmem:[%s6097_s11 + $0x2c0] sm:$0xff] %v4297_v30  ;;  %v2033_v50 = vmul.f32 0.0009676536, %v7390_v51  ;;  %v2034_v1 = vmul.f32 0.0009676536, %v7393_v58  ;;  %v3545_v28 = vmul.f32 0.5, %v7390_v51  ;;  %v1279_v37 = vmul.f32 %v5346_v54, %v1105_v0 }
 0x366   : > { %v3546_v21 = vmul.f32 0.5, %v7393_v58  ;;  %4424 = vst [vmem:[%s6097_s11 + $0x2c8] sm:$0xff] %v4298_v27  ;;  %v2913_v9 = vmul.f32 %v2787_v11, %v2283_v17  ;;  %v2914_v52 = vmul.f32 %v2788_v6, %v2284_v46  ;;  %v1280_v7 = vmul.f32 %v5348_v57, %v1105_v0 }
 0x367   : > { %v7409_v23 = vsub.f32 %v1907_v18, %v2033_v50  ;;  %v7411_v60 = vsub.f32 %v1908_v3, %v2034_v1  ;;  %v3671_v59 = vfloor.f32 %v3545_v28  ;;  %v1405_v26 = vadd.f32 %v1279_v37, %v8198_v63  ;;  %v8200_v28 = vld [vmem:[#allocation85_spill] sm:$0xff] }
 0x368   : > { %v3672_v34 = vfloor.f32 %v3546_v21  ;;  %v3039_v25 = vadd.f32 -0.16666667, %v2913_v9  ;;  %v3040_v13 = vadd.f32 -0.16666667, %v2914_v52  ;;  %v1406_v10 = vadd.f32 %v1280_v7, %v8199_v56  ;;  %v8201_v7 = vld [vmem:[#allocation15_spill] sm:$0xff] }
 0x369   : > { %v4047_v14 = vmul.f32 2.0, %v3921_v42  ;;  %v4048_v5 = vmul.f32 2.0, %v3922_v12  ;;  %v2285_v15 = vmul.f32 %v7409_v23, %v7409_v23  ;;  %v2286_v41 = vmul.f32 %v7411_v60, %v7411_v60 }
 0x36a   : > { %v3165_v2 = vmul.f32 %v3039_v25, %v2283_v17  ;;  %v3166_v20 = vmul.f32 %v3040_v13, %v2284_v46  ;;  %v1531_v36 = vmul.f32 0.31830987, %v1405_v26  ;;  %v1532_v8 = vmul.f32 0.31830987, %v1406_v10 }
 0x36b   : > { %v2411_v40 = vmul.f32 2.7557319e-06, %v2285_v15  ;;  %v2412_v53 = vmul.f32 2.7557319e-06, %v2286_v41  ;;  %v3797_v61 = vmul.f32 2.0, %v3671_v59  ;;  %v3798_v44 = vmul.f32 2.0, %v3672_v34 }
 0x36c   : > { %v3291_v29 = vmul.f32 %v3165_v2, %v7378_v19  ;;  %v3292_v39 = vmul.f32 %v3166_v20, %v7380_v38  ;;  %v7421_v55 = vround.rtne.f32 %v1531_v36  ;;  %v7423_v31 = vround.rtne.f32 %v1532_v8 }
 0x36d   : > { %v4173_v4 = vsub.f32 1.0, %v4047_v14  ;;  %v4174_v48 = vsub.f32 1.0, %v4048_v5  ;;  %v2537_v62 = vadd.f32 -0.0001984127, %v2411_v40  ;;  %v2538_v24 = vadd.f32 -0.0001984127, %v2412_v53 }
 0x36e   : > { %v3417_v17 = vadd.f32 %v3291_v29, %v7378_v19  ;;  %v3418_v46 = vadd.f32 %v3292_v39, %v7380_v38  ;;  %v1783_v45 = vmul.f32 3.140625, %v7421_v55  ;;  %v1784_v47 = vmul.f32 3.140625, %v7423_v31 }
 0x36f   : > { %v2663_v49 = vmul.f32 %v2537_v62, %v2285_v15  ;;  %v2664_v22 = vmul.f32 %v2538_v24, %v2286_v41  ;;  %v3923_v32 = vsub.f32 %v7390_v51, %v3797_v61  ;;  %v3924_v35 = vsub.f32 %v7393_v58, %v3798_v44 }
 0x370   : > { %v4299_v30 = vmul.f32 %v4173_v4, %v3417_v17  ;;  %v4300_v42 = vmul.f32 %v4174_v48, %v3418_v46  ;;  %v1909_v12 = vsub.f32 %v1405_v26, %v1783_v45  ;;  %v1910_v18 = vsub.f32 %v1406_v10, %v1784_v47 }
 0x371   : > { %v2789_v19 = vadd.f32 0.008333334, %v2663_v49  ;;  %v2790_v0 = vadd.f32 0.008333334, %v2664_v22  ;;  %v2035_v38 = vmul.f32 0.0009676536, %v7421_v55  ;;  %v1281_v27 = vmul.f32 %v5346_v54, %v1109_v16 }
 0x372   : > { %4425 = vst [vmem:[%s6097_s11 + $0x2d0] sm:$0xff] %v4299_v30  ;;  %4426 = vst [vmem:[%s6097_s11 + $0x2d8] sm:$0xff] %v4300_v42  ;;  %v2036_v11 = vmul.f32 0.0009676536, %v7423_v31  ;;  %v3547_v6 = vmul.f32 0.5, %v7421_v55  ;;  %v3548_v51 = vmul.f32 0.5, %v7423_v31  ;;  %v1282_v58 = vmul.f32 %v5348_v57, %v1109_v16 }
 0x373   : > { %v2915_v3 = vmul.f32 %v2789_v19, %v2285_v15  ;;  %v2916_v50 = vmul.f32 %v2790_v0, %v2286_v41  ;;  %v7439_v1 = vsub.f32 %v1909_v12, %v2035_v38  ;;  %v1407_v21 = vadd.f32 %v1281_v27, %v8200_v28 }
 0x374   : > { %v7442_v9 = vsub.f32 %v1910_v18, %v2036_v11  ;;  %v3673_v52 = vfloor.f32 %v3547_v6  ;;  %v3674_v37 = vfloor.f32 %v3548_v51  ;;  %v1408_v59 = vadd.f32 %v1282_v58, %v8201_v7 }
 0x375   : > { %v3041_v34 = vadd.f32 -0.16666667, %v2915_v3  ;;  %v3042_v25 = vadd.f32 -0.16666667, %v2916_v50  ;;  %v2287_v13 = vmul.f32 %v7439_v1, %v7439_v1  ;;  %v1533_v63 = vmul.f32 0.31830987, %v1407_v21 }
 0x376   : > { %v4049_v26 = vmul.f32 2.0, %v3923_v32  ;;  %v4050_v56 = vmul.f32 2.0, %v3924_v35  ;;  %v2288_v10 = vmul.f32 %v7442_v9, %v7442_v9  ;;  %v1534_v14 = vmul.f32 0.31830987, %v1408_v59  ;;  %v1113_v32 = vpop.permute.xlu1 %1112  ;;  %v8202_v50 = vld [vmem:[#allocation83_spill] sm:$0xff] }
 0x377   : > { %v3167_v5 = vmul.f32 %v3041_v34, %v2285_v15  ;;  %v3168_v2 = vmul.f32 %v3042_v25, %v2286_v41  ;;  %v2413_v20 = vmul.f32 2.7557319e-06, %v2287_v13  ;;  %v7449_v36 = vround.rtne.f32 %v1533_v63 }
 0x378   : > { %v2414_v8 = vmul.f32 2.7557319e-06, %v2288_v10  ;;  %v3799_v40 = vmul.f32 2.0, %v3673_v52  ;;  %v3800_v53 = vmul.f32 2.0, %v3674_v37  ;;  %v7451_v61 = vround.rtne.f32 %v1534_v14 }
 0x379   : > { %v3293_v44 = vmul.f32 %v3167_v5, %v7409_v23  ;;  %v3294_v29 = vmul.f32 %v3168_v2, %v7411_v60  ;;  %v2539_v39 = vadd.f32 -0.0001984127, %v2413_v20  ;;  %v1785_v4 = vmul.f32 3.140625, %v7449_v36 }
 0x37a   : > { %v4175_v48 = vsub.f32 1.0, %v4049_v26  ;;  %v4176_v62 = vsub.f32 1.0, %v4050_v56  ;;  %v2540_v24 = vadd.f32 -0.0001984127, %v2414_v8  ;;  %v1786_v15 = vmul.f32 3.140625, %v7451_v61 }
 0x37b   : > { %v3419_v41 = vadd.f32 %v3293_v44, %v7409_v23  ;;  %v3420_v17 = vadd.f32 %v3294_v29, %v7411_v60  ;;  %v2665_v46 = vmul.f32 %v2539_v39, %v2287_v13  ;;  %v1911_v45 = vsub.f32 %v1407_v21, %v1785_v4  ;;  %v8203_v21 = vld [vmem:[#allocation84_spill] sm:$0xff] }
 0x37c   : > { %v2666_v47 = vmul.f32 %v2540_v24, %v2288_v10  ;;  %v3925_v16 = vsub.f32 %v7421_v55, %v3799_v40  ;;  %v3926_v49 = vsub.f32 %v7423_v31, %v3800_v53  ;;  %v1912_v22 = vsub.f32 %v1408_v59, %v1786_v15 }
 0x37d   : > { %v4301_v35 = vmul.f32 %v4175_v48, %v3419_v41  ;;  %v4302_v30 = vmul.f32 %v4176_v62, %v3420_v17  ;;  %v2791_v42 = vadd.f32 0.008333334, %v2665_v46  ;;  %v2037_v12 = vmul.f32 0.0009676536, %v7449_v36 }
 0x37e   : > { %v2792_v18 = vadd.f32 0.008333334, %v2666_v47  ;;  %v2038_v23 = vmul.f32 0.0009676536, %v7451_v61  ;;  %v3549_v60 = vmul.f32 0.5, %v7449_v36  ;;  %v3550_v19 = vmul.f32 0.5, %v7451_v61 }
 0x37f   : > { %4427 = vst [vmem:[%s6097_s11 + $0x2e0] sm:$0xff] %v4301_v35  ;;  %4428 = vst [vmem:[%s6097_s11 + $0x2e8] sm:$0xff] %v4302_v30  ;;  %v2917_v0 = vmul.f32 %v2791_v42, %v2287_v13  ;;  %v7467_v55 = vsub.f32 %v1911_v45, %v2037_v12  ;;  %v1283_v31 = vmul.f32 %v5346_v54, %v1113_v32  ;;  %v4051_v7 = vmul.f32 2.0, %v3925_v16  ;;  %v1117_v45 = vpop.permute.xlu0 %1116 }
 0x380   : > { %v1284_v38 = vmul.f32 %v5348_v57, %v1113_v32  ;;  %v2918_v27 = vmul.f32 %v2792_v18, %v2288_v10  ;;  %v7471_v11 = vsub.f32 %v1912_v22, %v2038_v23  ;;  %v3675_v6 = vfloor.f32 %v3549_v60 }
 0x381   : > { %v3676_v51 = vfloor.f32 %v3550_v19  ;;  %v3043_v58 = vadd.f32 -0.16666667, %v2917_v0  ;;  %v2289_v3 = vmul.f32 %v7467_v55, %v7467_v55  ;;  %v1409_v28 = vadd.f32 %v1283_v31, %v8202_v50  ;;  %v8205_v50 = vld [vmem:[#allocation88_spill] sm:$0xff] }
 0x382   : > { %v1410_v52 = vadd.f32 %v1284_v38, %v8203_v21  ;;  %v3044_v37 = vadd.f32 -0.16666667, %v2918_v27  ;;  %v4052_v59 = vmul.f32 2.0, %v3926_v49  ;;  %v2290_v34 = vmul.f32 %v7471_v11, %v7471_v11  ;;  %v8204_v38 = vld [vmem:[#allocation87_spill] sm:$0xff] }
 0x383   : > { %v3169_v25 = vmul.f32 %v3043_v58, %v2287_v13  ;;  %v2415_v63 = vmul.f32 2.7557319e-06, %v2289_v3  ;;  %v1535_v26 = vmul.f32 0.31830987, %v1409_v28  ;;  %v3801_v2 = vmul.f32 2.0, %v3675_v6 }
 0x384   : > { %v1536_v56 = vmul.f32 0.31830987, %v1410_v52  ;;  %v3170_v14 = vmul.f32 %v3044_v37, %v2288_v10  ;;  %v2416_v5 = vmul.f32 2.7557319e-06, %v2290_v34  ;;  %v3802_v20 = vmul.f32 2.0, %v3676_v51 }
 0x385   : > { %v3295_v8 = vmul.f32 %v3169_v25, %v7439_v1  ;;  %v2541_v40 = vadd.f32 -0.0001984127, %v2415_v63  ;;  %v7480_v53 = vround.rtne.f32 %v1535_v26  ;;  %v4177_v39 = vsub.f32 1.0, %v4051_v7 }
 0x386   : > { %v7482_v44 = vround.rtne.f32 %v1536_v56  ;;  %v3296_v29 = vmul.f32 %v3170_v14, %v7442_v9  ;;  %v4178_v4 = vsub.f32 1.0, %v4052_v59  ;;  %v2542_v48 = vadd.f32 -0.0001984127, %v2416_v5 }
 0x387   : > { %v3421_v13 = vadd.f32 %v3295_v8, %v7439_v1  ;;  %v2667_v62 = vmul.f32 %v2541_v40, %v2289_v3  ;;  %v1787_v10 = vmul.f32 3.140625, %v7480_v53  ;;  %v3927_v17 = vsub.f32 %v7449_v36, %v3801_v2 }
 0x388   : > { %v1788_v24 = vmul.f32 3.140625, %v7482_v44  ;;  %v3422_v15 = vadd.f32 %v3296_v29, %v7442_v9  ;;  %v2668_v41 = vmul.f32 %v2542_v48, %v2290_v34  ;;  %v3928_v46 = vsub.f32 %v7451_v61, %v3802_v20 }
 0x389   : > { %v4303_v47 = vmul.f32 %v4177_v39, %v3421_v13  ;;  %v2793_v16 = vadd.f32 0.008333334, %v2667_v62  ;;  %v1913_v49 = vsub.f32 %v1409_v28, %v1787_v10  ;;  %v2039_v35 = vmul.f32 0.0009676536, %v7480_v53 }
 0x38a   : > { %v1914_v22 = vsub.f32 %v1410_v52, %v1788_v24  ;;  %v4304_v1 = vmul.f32 %v4178_v4, %v3422_v15  ;;  %v2794_v32 = vadd.f32 0.008333334, %v2668_v41  ;;  %v2040_v30 = vmul.f32 0.0009676536, %v7482_v44 }
 0x38b   : > { %4429 = vst [vmem:[%s6097_s11 + $0x2f0] sm:$0xff] %v4303_v47  ;;  %v2919_v42 = vmul.f32 %v2793_v16, %v2289_v3  ;;  %v3551_v9 = vmul.f32 0.5, %v7480_v53  ;;  %v3552_v36 = vmul.f32 0.5, %v7482_v44  ;;  %v1285_v12 = vmul.f32 %v5346_v54, %v1117_v45 }
 0x38c   : > { %4430 = vst [vmem:[%s6097_s11 + $0x2f8] sm:$0xff] %v4304_v1  ;;  %v2920_v61 = vmul.f32 %v2794_v32, %v2290_v34  ;;  %v7498_v18 = vsub.f32 %v1913_v49, %v2039_v35  ;;  %v7500_v23 = vsub.f32 %v1914_v22, %v2040_v30  ;;  %v1286_v60 = vmul.f32 %v5348_v57, %v1117_v45 }
 0x38d   : > { %v3045_v19 = vadd.f32 -0.16666667, %v2919_v42  ;;  %v3677_v0 = vfloor.f32 %v3551_v9  ;;  %v3678_v31 = vfloor.f32 %v3552_v36  ;;  %v1411_v27 = vadd.f32 %v1285_v12, %v8204_v38 }
 0x38e   : > { %v3046_v6 = vadd.f32 -0.16666667, %v2920_v61  ;;  %v2291_v51 = vmul.f32 %v7498_v18, %v7498_v18  ;;  %v2292_v58 = vmul.f32 %v7500_v23, %v7500_v23  ;;  %v1412_v28 = vadd.f32 %v1286_v60, %v8205_v50  ;;  %v8206_v60 = vld [vmem:[#allocation18_spill] sm:$0xff] }
 0x38f   : > { %v3171_v21 = vmul.f32 %v3045_v19, %v2289_v3  ;;  %v4053_v52 = vmul.f32 2.0, %v3927_v17  ;;  %v4054_v37 = vmul.f32 2.0, %v3928_v46  ;;  %v1537_v7 = vmul.f32 0.31830987, %v1411_v27  ;;  %v1121_v46 = vpop.permute.xlu1 %1120 }
 0x390   : > { %v3172_v59 = vmul.f32 %v3046_v6, %v2290_v34  ;;  %v2417_v25 = vmul.f32 2.7557319e-06, %v2291_v51  ;;  %v2418_v63 = vmul.f32 2.7557319e-06, %v2292_v58  ;;  %v1538_v26 = vmul.f32 0.31830987, %v1412_v28 }
 0x391   : > { %v3297_v56 = vmul.f32 %v3171_v21, %v7467_v55  ;;  %v3803_v14 = vmul.f32 2.0, %v3677_v0  ;;  %v3804_v5 = vmul.f32 2.0, %v3678_v31  ;;  %v7510_v2 = vround.rtne.f32 %v1537_v7  ;;  %v8207_v0 = vld [vmem:[#allocation86_spill] sm:$0xff] }
 0x392   : > { %v3298_v20 = vmul.f32 %v3172_v59, %v7471_v11  ;;  %v2543_v8 = vadd.f32 -0.0001984127, %v2417_v25  ;;  %v2544_v40 = vadd.f32 -0.0001984127, %v2418_v63  ;;  %v7513_v29 = vround.rtne.f32 %v1538_v26 }
 0x393   : > { %v3423_v3 = vadd.f32 %v3297_v56, %v7467_v55  ;;  %v4179_v39 = vsub.f32 1.0, %v4053_v52  ;;  %v4180_v34 = vsub.f32 1.0, %v4054_v37  ;;  %v1789_v4 = vmul.f32 3.140625, %v7510_v2 }
 0x394   : > { %v3424_v48 = vadd.f32 %v3298_v20, %v7471_v11  ;;  %v2669_v13 = vmul.f32 %v2543_v8, %v2291_v51  ;;  %v2670_v62 = vmul.f32 %v2544_v40, %v2292_v58  ;;  %v1790_v10 = vmul.f32 3.140625, %v7513_v29 }
 0x395   : > { %v4305_v24 = vmul.f32 %v4179_v39, %v3423_v3  ;;  %v3929_v15 = vsub.f32 %v7480_v53, %v3803_v14  ;;  %v3930_v41 = vsub.f32 %v7482_v44, %v3804_v5  ;;  %v1915_v17 = vsub.f32 %v1411_v27, %v1789_v4  ;;  %v1125_v4 = vpop.permute.xlu0 %1124 }
 0x396   : > { %v4306_v55 = vmul.f32 %v4180_v34, %v3424_v48  ;;  %v2795_v45 = vadd.f32 0.008333334, %v2669_v13  ;;  %v2796_v47 = vadd.f32 0.008333334, %v2670_v62  ;;  %v1916_v16 = vsub.f32 %v1412_v28, %v1790_v10 }
 0x397   : > { %4431 = vst [vmem:[%s6097_s11 + $0x300] sm:$0xff] %v4305_v24  ;;  %v2041_v49 = vmul.f32 0.0009676536, %v7510_v2  ;;  %v2042_v11 = vmul.f32 0.0009676536, %v7513_v29  ;;  %v3553_v22 = vmul.f32 0.5, %v7510_v2  ;;  %v1287_v44 = vmul.f32 %v5346_v54, %v1121_v46 }
 0x398   : > { %v3554_v1 = vmul.f32 0.5, %v7513_v29  ;;  %4432 = vst [vmem:[%s6097_s11 + $0x308] sm:$0xff] %v4306_v55  ;;  %v2921_v32 = vmul.f32 %v2795_v45, %v2291_v51  ;;  %v2922_v53 = vmul.f32 %v2796_v47, %v2292_v58  ;;  %v1288_v35 = vmul.f32 %v5348_v57, %v1121_v46 }
 0x399   : > { %v7529_v30 = vsub.f32 %v1915_v17, %v2041_v49  ;;  %v7531_v42 = vsub.f32 %v1916_v16, %v2042_v11  ;;  %v3679_v9 = vfloor.f32 %v3553_v22  ;;  %v1413_v19 = vadd.f32 %v1287_v44, %v8206_v60  ;;  %v8208_v22 = vld [vmem:[#allocation17_spill] sm:$0xff] }
 0x39a   : > { %v3680_v36 = vfloor.f32 %v3554_v1  ;;  %v3047_v12 = vadd.f32 -0.16666667, %v2921_v32  ;;  %v3048_v61 = vadd.f32 -0.16666667, %v2922_v53  ;;  %v1414_v31 = vadd.f32 %v1288_v35, %v8207_v0  ;;  %v8209_v35 = vld [vmem:[#allocation19_spill] sm:$0xff] }
 0x39b   : > { %v4055_v38 = vmul.f32 2.0, %v3929_v15  ;;  %v4056_v27 = vmul.f32 2.0, %v3930_v41  ;;  %v2293_v6 = vmul.f32 %v7529_v30, %v7529_v30  ;;  %v2294_v50 = vmul.f32 %v7531_v42, %v7531_v42 }
 0x39c   : > { %v3173_v28 = vmul.f32 %v3047_v12, %v2291_v51  ;;  %v3174_v21 = vmul.f32 %v3048_v61, %v2292_v58  ;;  %v1539_v52 = vmul.f32 0.31830987, %v1413_v19  ;;  %v1540_v37 = vmul.f32 0.31830987, %v1414_v31 }
 0x39d   : > { %v2419_v7 = vmul.f32 2.7557319e-06, %v2293_v6  ;;  %v2420_v59 = vmul.f32 2.7557319e-06, %v2294_v50  ;;  %v3805_v25 = vmul.f32 2.0, %v3679_v9  ;;  %v3806_v63 = vmul.f32 2.0, %v3680_v36 }
 0x39e   : > { %v3299_v26 = vmul.f32 %v3173_v28, %v7498_v18  ;;  %v3300_v56 = vmul.f32 %v3174_v21, %v7500_v23  ;;  %v7541_v14 = vround.rtne.f32 %v1539_v52  ;;  %v7543_v5 = vround.rtne.f32 %v1540_v37 }
 0x39f   : > { %v4181_v20 = vsub.f32 1.0, %v4055_v38  ;;  %v4182_v8 = vsub.f32 1.0, %v4056_v27  ;;  %v2545_v40 = vadd.f32 -0.0001984127, %v2419_v7  ;;  %v2546_v3 = vadd.f32 -0.0001984127, %v2420_v59 }
 0x3a0   : > { %v3425_v51 = vadd.f32 %v3299_v26, %v7498_v18  ;;  %v3426_v58 = vadd.f32 %v3300_v56, %v7500_v23  ;;  %v1791_v39 = vmul.f32 3.140625, %v7541_v14  ;;  %v1792_v34 = vmul.f32 3.140625, %v7543_v5 }
 0x3a1   : > { %v2671_v48 = vmul.f32 %v2545_v40, %v2293_v6  ;;  %v2672_v13 = vmul.f32 %v2546_v3, %v2294_v50  ;;  %v3931_v62 = vsub.f32 %v7510_v2, %v3805_v25  ;;  %v3932_v10 = vsub.f32 %v7513_v29, %v3806_v63 }
 0x3a2   : > { %v4307_v24 = vmul.f32 %v4181_v20, %v3425_v51  ;;  %v4308_v15 = vmul.f32 %v4182_v8, %v3426_v58  ;;  %v1917_v41 = vsub.f32 %v1413_v19, %v1791_v39  ;;  %v1918_v17 = vsub.f32 %v1414_v31, %v1792_v34 }
 0x3a3   : > { %v2797_v18 = vadd.f32 0.008333334, %v2671_v48  ;;  %v2798_v46 = vadd.f32 0.008333334, %v2672_v13  ;;  %v2043_v23 = vmul.f32 0.0009676536, %v7541_v14  ;;  %v1289_v55 = vmul.f32 %v5346_v54, %v1125_v4 }
 0x3a4   : > { %4433 = vst [vmem:[%s6097_s11 + $0x310] sm:$0xff] %v4307_v24  ;;  %4434 = vst [vmem:[%s6097_s11 + $0x318] sm:$0xff] %v4308_v15  ;;  %v2044_v45 = vmul.f32 0.0009676536, %v7543_v5  ;;  %v3555_v47 = vmul.f32 0.5, %v7541_v14  ;;  %v3556_v2 = vmul.f32 0.5, %v7543_v5  ;;  %v1290_v29 = vmul.f32 %v5348_v57, %v1125_v4 }
 0x3a5   : > { %v2923_v16 = vmul.f32 %v2797_v18, %v2293_v6  ;;  %v2924_v49 = vmul.f32 %v2798_v46, %v2294_v50  ;;  %v7559_v11 = vsub.f32 %v1917_v41, %v2043_v23  ;;  %v1415_v1 = vadd.f32 %v1289_v55, %v8208_v22 }
 0x3a6   : > { %v7562_v32 = vsub.f32 %v1918_v17, %v2044_v45  ;;  %v3681_v53 = vfloor.f32 %v3555_v47  ;;  %v3682_v44 = vfloor.f32 %v3556_v2  ;;  %v1416_v9 = vadd.f32 %v1290_v29, %v8209_v35 }
 0x3a7   : > { %v3049_v36 = vadd.f32 -0.16666667, %v2923_v16  ;;  %v3050_v12 = vadd.f32 -0.16666667, %v2924_v49  ;;  %v2295_v61 = vmul.f32 %v7559_v11, %v7559_v11  ;;  %v1541_v60 = vmul.f32 0.31830987, %v1415_v1 }
 0x3a8   : > { %v4057_v19 = vmul.f32 2.0, %v3931_v62  ;;  %v4058_v0 = vmul.f32 2.0, %v3932_v10  ;;  %v2296_v31 = vmul.f32 %v7562_v32, %v7562_v32  ;;  %v1542_v38 = vmul.f32 0.31830987, %v1416_v9  ;;  %v1129_v62 = vpop.permute.xlu1 %1128  ;;  %v8210_v49 = vld [vmem:[#allocation89_spill] sm:$0xff] }
 0x3a9   : > { %v3175_v27 = vmul.f32 %v3049_v36, %v2293_v6  ;;  %v3176_v28 = vmul.f32 %v3050_v12, %v2294_v50  ;;  %v2421_v21 = vmul.f32 2.7557319e-06, %v2295_v61  ;;  %v7569_v52 = vround.rtne.f32 %v1541_v60 }
 0x3aa   : > { %v2422_v37 = vmul.f32 2.7557319e-06, %v2296_v31  ;;  %v3807_v7 = vmul.f32 2.0, %v3681_v53  ;;  %v3808_v59 = vmul.f32 2.0, %v3682_v44  ;;  %v7571_v25 = vround.rtne.f32 %v1542_v38 }
 0x3ab   : > { %v3301_v63 = vmul.f32 %v3175_v27, %v7529_v30  ;;  %v3302_v26 = vmul.f32 %v3176_v28, %v7531_v42  ;;  %v2547_v56 = vadd.f32 -0.0001984127, %v2421_v21  ;;  %v1793_v20 = vmul.f32 3.140625, %v7569_v52 }
 0x3ac   : > { %v4183_v8 = vsub.f32 1.0, %v4057_v19  ;;  %v4184_v40 = vsub.f32 1.0, %v4058_v0  ;;  %v2548_v3 = vadd.f32 -0.0001984127, %v2422_v37  ;;  %v1794_v6 = vmul.f32 3.140625, %v7571_v25 }
 0x3ad   : > { %v3427_v50 = vadd.f32 %v3301_v63, %v7529_v30  ;;  %v3428_v51 = vadd.f32 %v3302_v26, %v7531_v42  ;;  %v2673_v58 = vmul.f32 %v2547_v56, %v2295_v61  ;;  %v1919_v39 = vsub.f32 %v1415_v1, %v1793_v20  ;;  %v8211_v1 = vld [vmem:[#allocation90_spill] sm:$0xff] }
 0x3ae   : > { %v2674_v34 = vmul.f32 %v2548_v3, %v2296_v31  ;;  %v3933_v4 = vsub.f32 %v7541_v14, %v3807_v7  ;;  %v3934_v48 = vsub.f32 %v7543_v5, %v3808_v59  ;;  %v1920_v13 = vsub.f32 %v1416_v9, %v1794_v6 }
 0x3af   : > { %v4309_v10 = vmul.f32 %v4183_v8, %v3427_v50  ;;  %v4310_v24 = vmul.f32 %v4184_v40, %v3428_v51  ;;  %v2799_v15 = vadd.f32 0.008333334, %v2673_v58  ;;  %v2045_v41 = vmul.f32 0.0009676536, %v7569_v52 }
 0x3b0   : > { %v2800_v17 = vadd.f32 0.008333334, %v2674_v34  ;;  %v2046_v30 = vmul.f32 0.0009676536, %v7571_v25  ;;  %v3557_v42 = vmul.f32 0.5, %v7569_v52  ;;  %v3558_v18 = vmul.f32 0.5, %v7571_v25 }
 0x3b1   : > { %4435 = vst [vmem:[%s6097_s11 + $0x320] sm:$0xff] %v4309_v10  ;;  %4436 = vst [vmem:[%s6097_s11 + $0x328] sm:$0xff] %v4310_v24  ;;  %v2925_v46 = vmul.f32 %v2799_v15, %v2295_v61  ;;  %v7587_v14 = vsub.f32 %v1919_v39, %v2045_v41  ;;  %v1291_v5 = vmul.f32 %v5346_v54, %v1129_v62  ;;  %v4059_v35 = vmul.f32 2.0, %v3933_v4  ;;  %v1133_v39 = vpop.permute.xlu0 %1132 }
 0x3b2   : > { %v1292_v23 = vmul.f32 %v5348_v57, %v1129_v62  ;;  %v2926_v55 = vmul.f32 %v2800_v17, %v2296_v31  ;;  %v7591_v45 = vsub.f32 %v1920_v13, %v2046_v30  ;;  %v3683_v47 = vfloor.f32 %v3557_v42 }
 0x3b3   : > { %v3684_v2 = vfloor.f32 %v3558_v18  ;;  %v3051_v29 = vadd.f32 -0.16666667, %v2925_v46  ;;  %v2297_v16 = vmul.f32 %v7587_v14, %v7587_v14  ;;  %v1417_v22 = vadd.f32 %v1291_v5, %v8210_v49  ;;  %v8213_v49 = vld [vmem:[#allocation94_spill] sm:$0xff] }
 0x3b4   : > { %v1418_v53 = vadd.f32 %v1292_v23, %v8211_v1  ;;  %v3052_v44 = vadd.f32 -0.16666667, %v2926_v55  ;;  %v4060_v9 = vmul.f32 2.0, %v3934_v48  ;;  %v2298_v36 = vmul.f32 %v7591_v45, %v7591_v45  ;;  %v8212_v23 = vld [vmem:[#allocation93_spill] sm:$0xff] }
 0x3b5   : > { %v3177_v12 = vmul.f32 %v3051_v29, %v2295_v61  ;;  %v2423_v60 = vmul.f32 2.7557319e-06, %v2297_v16  ;;  %v1543_v19 = vmul.f32 0.31830987, %v1417_v22  ;;  %v3809_v28 = vmul.f32 2.0, %v3683_v47 }
 0x3b6   : > { %v1544_v0 = vmul.f32 0.31830987, %v1418_v53  ;;  %v3178_v38 = vmul.f32 %v3052_v44, %v2296_v31  ;;  %v2424_v27 = vmul.f32 2.7557319e-06, %v2298_v36  ;;  %v3810_v21 = vmul.f32 2.0, %v3684_v2 }
 0x3b7   : > { %v3303_v37 = vmul.f32 %v3177_v12, %v7559_v11  ;;  %v2549_v7 = vadd.f32 -0.0001984127, %v2423_v60  ;;  %v7600_v59 = vround.rtne.f32 %v1543_v19  ;;  %v4185_v56 = vsub.f32 1.0, %v4059_v35 }
 0x3b8   : > { %v7602_v63 = vround.rtne.f32 %v1544_v0  ;;  %v3304_v26 = vmul.f32 %v3178_v38, %v7562_v32  ;;  %v4186_v20 = vsub.f32 1.0, %v4060_v9  ;;  %v2550_v8 = vadd.f32 -0.0001984127, %v2424_v27 }
 0x3b9   : > { %v3429_v61 = vadd.f32 %v3303_v37, %v7559_v11  ;;  %v2675_v40 = vmul.f32 %v2549_v7, %v2297_v16  ;;  %v1795_v31 = vmul.f32 3.140625, %v7600_v59  ;;  %v3935_v51 = vsub.f32 %v7569_v52, %v3809_v28 }
 0x3ba   : > { %v1796_v3 = vmul.f32 3.140625, %v7602_v63  ;;  %v3430_v6 = vadd.f32 %v3304_v26, %v7562_v32  ;;  %v2676_v50 = vmul.f32 %v2550_v8, %v2298_v36  ;;  %v3936_v58 = vsub.f32 %v7571_v25, %v3810_v21 }
 0x3bb   : > { %v4311_v34 = vmul.f32 %v4185_v56, %v3429_v61  ;;  %v2801_v4 = vadd.f32 0.008333334, %v2675_v40  ;;  %v1921_v48 = vsub.f32 %v1417_v22, %v1795_v31  ;;  %v2047_v10 = vmul.f32 0.0009676536, %v7600_v59 }
 0x3bc   : > { %v1922_v13 = vsub.f32 %v1418_v53, %v1796_v3  ;;  %v4312_v11 = vmul.f32 %v4186_v20, %v3430_v6  ;;  %v2802_v62 = vadd.f32 0.008333334, %v2676_v50  ;;  %v2048_v24 = vmul.f32 0.0009676536, %v7602_v63 }
 0x3bd   : > { %4437 = vst [vmem:[%s6097_s11 + $0x330] sm:$0xff] %v4311_v34  ;;  %v2927_v15 = vmul.f32 %v2801_v4, %v2297_v16  ;;  %v3559_v32 = vmul.f32 0.5, %v7600_v59  ;;  %v3560_v52 = vmul.f32 0.5, %v7602_v63  ;;  %v1293_v41 = vmul.f32 %v5346_v54, %v1133_v39 }
 0x3be   : > { %4438 = vst [vmem:[%s6097_s11 + $0x338] sm:$0xff] %v4312_v11  ;;  %v2928_v25 = vmul.f32 %v2802_v62, %v2298_v36  ;;  %v7618_v17 = vsub.f32 %v1921_v48, %v2047_v10  ;;  %v7620_v30 = vsub.f32 %v1922_v13, %v2048_v24  ;;  %v1294_v42 = vmul.f32 %v5348_v57, %v1133_v39 }
 0x3bf   : > { %v3053_v18 = vadd.f32 -0.16666667, %v2927_v15  ;;  %v3685_v46 = vfloor.f32 %v3559_v32  ;;  %v3686_v5 = vfloor.f32 %v3560_v52  ;;  %v1419_v55 = vadd.f32 %v1293_v41, %v8212_v23 }
 0x3c0   : > { %v3054_v47 = vadd.f32 -0.16666667, %v2928_v25  ;;  %v2299_v2 = vmul.f32 %v7618_v17, %v7618_v17  ;;  %v2300_v29 = vmul.f32 %v7620_v30, %v7620_v30  ;;  %v1420_v22 = vadd.f32 %v1294_v42, %v8213_v49  ;;  %v8214_v42 = vld [vmem:[#allocation91_spill] sm:$0xff] }
 0x3c1   : > { %v3179_v1 = vmul.f32 %v3053_v18, %v2297_v16  ;;  %v4061_v53 = vmul.f32 2.0, %v3935_v51  ;;  %v4062_v44 = vmul.f32 2.0, %v3936_v58  ;;  %v1545_v35 = vmul.f32 0.31830987, %v1419_v55  ;;  %v1137_v58 = vpop.permute.xlu1 %1136 }
 0x3c2   : > { %v3180_v9 = vmul.f32 %v3054_v47, %v2298_v36  ;;  %v2425_v12 = vmul.f32 2.7557319e-06, %v2299_v2  ;;  %v2426_v60 = vmul.f32 2.7557319e-06, %v2300_v29  ;;  %v1546_v19 = vmul.f32 0.31830987, %v1420_v22 }
 0x3c3   : > { %v3305_v0 = vmul.f32 %v3179_v1, %v7587_v14  ;;  %v3811_v38 = vmul.f32 2.0, %v3685_v46  ;;  %v3812_v27 = vmul.f32 2.0, %v3686_v5  ;;  %v7630_v28 = vround.rtne.f32 %v1545_v35  ;;  %v8215_v46 = vld [vmem:[#allocation92_spill] sm:$0xff] }
 0x3c4   : > { %v3306_v21 = vmul.f32 %v3180_v9, %v7591_v45  ;;  %v2551_v37 = vadd.f32 -0.0001984127, %v2425_v12  ;;  %v2552_v7 = vadd.f32 -0.0001984127, %v2426_v60  ;;  %v7633_v26 = vround.rtne.f32 %v1546_v19 }
 0x3c5   : > { %v3431_v16 = vadd.f32 %v3305_v0, %v7587_v14  ;;  %v4187_v56 = vsub.f32 1.0, %v4061_v53  ;;  %v4188_v36 = vsub.f32 1.0, %v4062_v44  ;;  %v1797_v20 = vmul.f32 3.140625, %v7630_v28 }
 0x3c6   : > { %v3432_v8 = vadd.f32 %v3306_v21, %v7591_v45  ;;  %v2677_v61 = vmul.f32 %v2551_v37, %v2299_v2  ;;  %v2678_v40 = vmul.f32 %v2552_v7, %v2300_v29  ;;  %v1798_v31 = vmul.f32 3.140625, %v7633_v26 }
 0x3c7   : > { %v4313_v3 = vmul.f32 %v4187_v56, %v3431_v16  ;;  %v3937_v6 = vsub.f32 %v7600_v59, %v3811_v38  ;;  %v3938_v50 = vsub.f32 %v7602_v63, %v3812_v27  ;;  %v1923_v51 = vsub.f32 %v1419_v55, %v1797_v20  ;;  %v1141_v20 = vpop.permute.xlu0 %1140 }
 0x3c8   : > { %v4314_v14 = vmul.f32 %v4188_v36, %v3432_v8  ;;  %v2803_v39 = vadd.f32 0.008333334, %v2677_v61  ;;  %v2804_v34 = vadd.f32 0.008333334, %v2678_v40  ;;  %v1924_v4 = vsub.f32 %v1420_v22, %v1798_v31 }
 0x3c9   : > { %4439 = vst [vmem:[%s6097_s11 + $0x340] sm:$0xff] %v4313_v3  ;;  %v2049_v48 = vmul.f32 0.0009676536, %v7630_v28  ;;  %v2050_v45 = vmul.f32 0.0009676536, %v7633_v26  ;;  %v3561_v13 = vmul.f32 0.5, %v7630_v28  ;;  %v1295_v63 = vmul.f32 %v5346_v54, %v1137_v58 }
 0x3ca   : > { %v3562_v11 = vmul.f32 0.5, %v7633_v26  ;;  %4440 = vst [vmem:[%s6097_s11 + $0x348] sm:$0xff] %v4314_v14  ;;  %v2929_v62 = vmul.f32 %v2803_v39, %v2299_v2  ;;  %v2930_v59 = vmul.f32 %v2804_v34, %v2300_v29  ;;  %v1296_v10 = vmul.f32 %v5348_v57, %v1137_v58 }
 0x3cb   : > { %v7649_v24 = vsub.f32 %v1923_v51, %v2049_v48  ;;  %v7651_v15 = vsub.f32 %v1924_v4, %v2050_v45  ;;  %v3687_v32 = vfloor.f32 %v3561_v13  ;;  %v1421_v18 = vadd.f32 %v1295_v63, %v8214_v42  ;;  %v8216_v13 = vld [vmem:[#allocation97_spill] sm:$0xff] }
 0x3cc   : > { %v3688_v52 = vfloor.f32 %v3562_v11  ;;  %v3055_v41 = vadd.f32 -0.16666667, %v2929_v62  ;;  %v3056_v25 = vadd.f32 -0.16666667, %v2930_v59  ;;  %v1422_v5 = vadd.f32 %v1296_v10, %v8215_v46  ;;  %v8217_v10 = vld [vmem:[#allocation98_spill] sm:$0xff] }
 0x3cd   : > { %v4063_v23 = vmul.f32 2.0, %v3937_v6  ;;  %v4064_v55 = vmul.f32 2.0, %v3938_v50  ;;  %v2301_v47 = vmul.f32 %v7649_v24, %v7649_v24  ;;  %v2302_v49 = vmul.f32 %v7651_v15, %v7651_v15 }
 0x3ce   : > { %v3181_v22 = vmul.f32 %v3055_v41, %v2299_v2  ;;  %v3182_v1 = vmul.f32 %v3056_v25, %v2300_v29  ;;  %v1547_v53 = vmul.f32 0.31830987, %v1421_v18  ;;  %v1548_v44 = vmul.f32 0.31830987, %v1422_v5 }
 0x3cf   : > { %v2427_v35 = vmul.f32 2.7557319e-06, %v2301_v47  ;;  %v2428_v9 = vmul.f32 2.7557319e-06, %v2302_v49  ;;  %v3813_v12 = vmul.f32 2.0, %v3687_v32  ;;  %v3814_v60 = vmul.f32 2.0, %v3688_v52 }
 0x3d0   : > { %v3307_v19 = vmul.f32 %v3181_v22, %v7618_v17  ;;  %v3308_v0 = vmul.f32 %v3182_v1, %v7620_v30  ;;  %v7661_v38 = vround.rtne.f32 %v1547_v53  ;;  %v7663_v27 = vround.rtne.f32 %v1548_v44 }
 0x3d1   : > { %v4189_v21 = vsub.f32 1.0, %v4063_v23  ;;  %v4190_v37 = vsub.f32 1.0, %v4064_v55  ;;  %v2553_v7 = vadd.f32 -0.0001984127, %v2427_v35  ;;  %v2554_v16 = vadd.f32 -0.0001984127, %v2428_v9 }
 0x3d2   : > { %v3433_v2 = vadd.f32 %v3307_v19, %v7618_v17  ;;  %v3434_v29 = vadd.f32 %v3308_v0, %v7620_v30  ;;  %v1799_v56 = vmul.f32 3.140625, %v7661_v38  ;;  %v1800_v36 = vmul.f32 3.140625, %v7663_v27 }
 0x3d3   : > { %v2679_v8 = vmul.f32 %v2553_v7, %v2301_v47  ;;  %v2680_v61 = vmul.f32 %v2554_v16, %v2302_v49  ;;  %v3939_v40 = vsub.f32 %v7630_v28, %v3813_v12  ;;  %v3940_v31 = vsub.f32 %v7633_v26, %v3814_v60 }
 0x3d4   : > { %v4315_v3 = vmul.f32 %v4189_v21, %v3433_v2  ;;  %v4316_v6 = vmul.f32 %v4190_v37, %v3434_v29  ;;  %v1925_v50 = vsub.f32 %v1421_v18, %v1799_v56  ;;  %v1926_v51 = vsub.f32 %v1422_v5, %v1800_v36 }
 0x3d5   : > { %v2805_v17 = vadd.f32 0.008333334, %v2679_v8  ;;  %v2806_v58 = vadd.f32 0.008333334, %v2680_v61  ;;  %v2051_v30 = vmul.f32 0.0009676536, %v7661_v38  ;;  %v1297_v14 = vmul.f32 %v5346_v54, %v1141_v20 }
 0x3d6   : > { %4441 = vst [vmem:[%s6097_s11 + $0x350] sm:$0xff] %v4315_v3  ;;  %4442 = vst [vmem:[%s6097_s11 + $0x358] sm:$0xff] %v4316_v6  ;;  %v2052_v39 = vmul.f32 0.0009676536, %v7663_v27  ;;  %v3563_v34 = vmul.f32 0.5, %v7661_v38  ;;  %v3564_v28 = vmul.f32 0.5, %v7663_v27  ;;  %v1298_v26 = vmul.f32 %v5348_v57, %v1141_v20 }
 0x3d7   : > { %v2931_v4 = vmul.f32 %v2805_v17, %v2301_v47  ;;  %v2932_v48 = vmul.f32 %v2806_v58, %v2302_v49  ;;  %v7679_v45 = vsub.f32 %v1925_v50, %v2051_v30  ;;  %v1423_v11 = vadd.f32 %v1297_v14, %v8216_v13 }
 0x3d8   : > { %v7682_v62 = vsub.f32 %v1926_v51, %v2052_v39  ;;  %v3689_v59 = vfloor.f32 %v3563_v34  ;;  %v3690_v63 = vfloor.f32 %v3564_v28  ;;  %v1424_v32 = vadd.f32 %v1298_v26, %v8217_v10 }
 0x3d9   : > { %v3057_v52 = vadd.f32 -0.16666667, %v2931_v4  ;;  %v3058_v41 = vadd.f32 -0.16666667, %v2932_v48  ;;  %v2303_v25 = vmul.f32 %v7679_v45, %v7679_v45  ;;  %v1549_v42 = vmul.f32 0.31830987, %v1423_v11 }
 0x3da   : > { %v4065_v18 = vmul.f32 2.0, %v3939_v40  ;;  %v4066_v46 = vmul.f32 2.0, %v3940_v31  ;;  %v2304_v5 = vmul.f32 %v7682_v62, %v7682_v62  ;;  %v1550_v23 = vmul.f32 0.31830987, %v1424_v32  ;;  %v1145_v40 = vpop.permute.xlu1 %1144  ;;  %v8218_v48 = vld [vmem:[#allocation95_spill] sm:$0xff] }
 0x3db   : > { %v3183_v55 = vmul.f32 %v3057_v52, %v2301_v47  ;;  %v3184_v22 = vmul.f32 %v3058_v41, %v2302_v49  ;;  %v2429_v1 = vmul.f32 2.7557319e-06, %v2303_v25  ;;  %v7689_v53 = vround.rtne.f32 %v1549_v42 }
 0x3dc   : > { %v2430_v44 = vmul.f32 2.7557319e-06, %v2304_v5  ;;  %v3815_v35 = vmul.f32 2.0, %v3689_v59  ;;  %v3816_v9 = vmul.f32 2.0, %v3690_v63  ;;  %v7691_v12 = vround.rtne.f32 %v1550_v23 }
 0x3dd   : > { %v3309_v60 = vmul.f32 %v3183_v55, %v7649_v24  ;;  %v3310_v19 = vmul.f32 %v3184_v22, %v7651_v15  ;;  %v2555_v0 = vadd.f32 -0.0001984127, %v2429_v1  ;;  %v1801_v21 = vmul.f32 3.140625, %v7689_v53 }
 0x3de   : > { %v4191_v37 = vsub.f32 1.0, %v4065_v18  ;;  %v4192_v7 = vsub.f32 1.0, %v4066_v46  ;;  %v2556_v16 = vadd.f32 -0.0001984127, %v2430_v44  ;;  %v1802_v47 = vmul.f32 3.140625, %v7691_v12 }
 0x3df   : > { %v3435_v49 = vadd.f32 %v3309_v60, %v7649_v24  ;;  %v3436_v2 = vadd.f32 %v3310_v19, %v7651_v15  ;;  %v2681_v29 = vmul.f32 %v2555_v0, %v2303_v25  ;;  %v1927_v56 = vsub.f32 %v1423_v11, %v1801_v21  ;;  %v8219_v11 = vld [vmem:[#allocation96_spill] sm:$0xff] }
 0x3e0   : > { %v2682_v36 = vmul.f32 %v2556_v16, %v2304_v5  ;;  %v3941_v20 = vsub.f32 %v7661_v38, %v3815_v35  ;;  %v3942_v8 = vsub.f32 %v7663_v27, %v3816_v9  ;;  %v1928_v61 = vsub.f32 %v1424_v32, %v1802_v47 }
 0x3e1   : > { %v4317_v31 = vmul.f32 %v4191_v37, %v3435_v49  ;;  %v4318_v3 = vmul.f32 %v4192_v7, %v3436_v2  ;;  %v2807_v6 = vadd.f32 0.008333334, %v2681_v29  ;;  %v2053_v50 = vmul.f32 0.0009676536, %v7689_v53 }
 0x3e2   : > { %v2808_v51 = vadd.f32 0.008333334, %v2682_v36  ;;  %v2054_v24 = vmul.f32 0.0009676536, %v7691_v12  ;;  %v3565_v15 = vmul.f32 0.5, %v7689_v53  ;;  %v3566_v17 = vmul.f32 0.5, %v7691_v12 }
 0x3e3   : > { %4443 = vst [vmem:[%s6097_s11 + $0x360] sm:$0xff] %v4317_v31  ;;  %4444 = vst [vmem:[%s6097_s11 + $0x368] sm:$0xff] %v4318_v3  ;;  %v2933_v58 = vmul.f32 %v2807_v6, %v2303_v25  ;;  %v7707_v38 = vsub.f32 %v1927_v56, %v2053_v50  ;;  %v1299_v27 = vmul.f32 %v5346_v54, %v1145_v40  ;;  %v4067_v10 = vmul.f32 2.0, %v3941_v20  ;;  %v1149_v56 = vpop.permute.xlu0 %1148 }
 0x3e4   : > { %v1300_v30 = vmul.f32 %v5348_v57, %v1145_v40  ;;  %v2934_v14 = vmul.f32 %v2808_v51, %v2304_v5  ;;  %v7711_v39 = vsub.f32 %v1928_v61, %v2054_v24  ;;  %v3691_v34 = vfloor.f32 %v3565_v15 }
 0x3e5   : > { %v3692_v28 = vfloor.f32 %v3566_v17  ;;  %v3059_v26 = vadd.f32 -0.16666667, %v2933_v58  ;;  %v2305_v4 = vmul.f32 %v7707_v38, %v7707_v38  ;;  %v1425_v13 = vadd.f32 %v1299_v27, %v8218_v48  ;;  %v8221_v48 = vld [vmem:[#allocation102_spill] sm:$0xff] }
 0x3e6   : > { %v1426_v59 = vadd.f32 %v1300_v30, %v8219_v11  ;;  %v3060_v63 = vadd.f32 -0.16666667, %v2934_v14  ;;  %v4068_v32 = vmul.f32 2.0, %v3942_v8  ;;  %v2306_v52 = vmul.f32 %v7711_v39, %v7711_v39  ;;  %v8220_v30 = vld [vmem:[#allocation101_spill] sm:$0xff] }
 0x3e7   : > { %v3185_v41 = vmul.f32 %v3059_v26, %v2303_v25  ;;  %v2431_v42 = vmul.f32 2.7557319e-06, %v2305_v4  ;;  %v1551_v18 = vmul.f32 0.31830987, %v1425_v13  ;;  %v3817_v22 = vmul.f32 2.0, %v3691_v34 }
 0x3e8   : > { %v1552_v46 = vmul.f32 0.31830987, %v1426_v59  ;;  %v3186_v23 = vmul.f32 %v3060_v63, %v2304_v5  ;;  %v2432_v55 = vmul.f32 2.7557319e-06, %v2306_v52  ;;  %v3818_v1 = vmul.f32 2.0, %v3692_v28 }
 0x3e9   : > { %v3311_v44 = vmul.f32 %v3185_v41, %v7679_v45  ;;  %v2557_v35 = vadd.f32 -0.0001984127, %v2431_v42  ;;  %v7720_v9 = vround.rtne.f32 %v1551_v18  ;;  %v4193_v0 = vsub.f32 1.0, %v4067_v10 }
 0x3ea   : > { %v7722_v60 = vround.rtne.f32 %v1552_v46  ;;  %v3312_v19 = vmul.f32 %v3186_v23, %v7682_v62  ;;  %v4194_v21 = vsub.f32 1.0, %v4068_v32  ;;  %v2558_v37 = vadd.f32 -0.0001984127, %v2432_v55 }
 0x3eb   : > { %v3437_v25 = vadd.f32 %v3311_v44, %v7679_v45  ;;  %v2683_v7 = vmul.f32 %v2557_v35, %v2305_v4  ;;  %v1803_v5 = vmul.f32 3.140625, %v7720_v9  ;;  %v3943_v2 = vsub.f32 %v7689_v53, %v3817_v22 }
 0x3ec   : > { %v1804_v16 = vmul.f32 3.140625, %v7722_v60  ;;  %v3438_v47 = vadd.f32 %v3312_v19, %v7682_v62  ;;  %v2684_v49 = vmul.f32 %v2558_v37, %v2306_v52  ;;  %v3944_v29 = vsub.f32 %v7691_v12, %v3818_v1 }
 0x3ed   : > { %v4319_v36 = vmul.f32 %v4193_v0, %v3437_v25  ;;  %v2809_v20 = vadd.f32 0.008333334, %v2683_v7  ;;  %v1929_v8 = vsub.f32 %v1425_v13, %v1803_v5  ;;  %v2055_v31 = vmul.f32 0.0009676536, %v7720_v9 }
 0x3ee   : > { %v1930_v61 = vsub.f32 %v1426_v59, %v1804_v16  ;;  %v4320_v45 = vmul.f32 %v4194_v21, %v3438_v47  ;;  %v2810_v40 = vadd.f32 0.008333334, %v2684_v49  ;;  %v2056_v3 = vmul.f32 0.0009676536, %v7722_v60 }
 0x3ef   : > { %4445 = vst [vmem:[%s6097_s11 + $0x370] sm:$0xff] %v4319_v36  ;;  %v2935_v6 = vmul.f32 %v2809_v20, %v2305_v4  ;;  %v3567_v62 = vmul.f32 0.5, %v7720_v9  ;;  %v3568_v53 = vmul.f32 0.5, %v7722_v60  ;;  %v1301_v50 = vmul.f32 %v5346_v54, %v1149_v56 }
 0x3f0   : > { %4446 = vst [vmem:[%s6097_s11 + $0x378] sm:$0xff] %v4320_v45  ;;  %v2936_v12 = vmul.f32 %v2810_v40, %v2306_v52  ;;  %v7738_v51 = vsub.f32 %v1929_v8, %v2055_v31  ;;  %v7740_v24 = vsub.f32 %v1930_v61, %v2056_v3  ;;  %v1302_v15 = vmul.f32 %v5348_v57, %v1149_v56 }
 0x3f1   : > { %v3061_v17 = vadd.f32 -0.16666667, %v2935_v6  ;;  %v3693_v58 = vfloor.f32 %v3567_v62  ;;  %v3694_v27 = vfloor.f32 %v3568_v53  ;;  %v1427_v14 = vadd.f32 %v1301_v50, %v8220_v30 }
 0x3f2   : > { %v3062_v34 = vadd.f32 -0.16666667, %v2936_v12  ;;  %v2307_v28 = vmul.f32 %v7738_v51, %v7738_v51  ;;  %v2308_v26 = vmul.f32 %v7740_v24, %v7740_v24  ;;  %v1428_v13 = vadd.f32 %v1302_v15, %v8221_v48  ;;  %v8222_v15 = vld [vmem:[#allocation99_spill] sm:$0xff] }
 0x3f3   : > { %v3187_v11 = vmul.f32 %v3061_v17, %v2305_v4  ;;  %v4069_v59 = vmul.f32 2.0, %v3943_v2  ;;  %v4070_v63 = vmul.f32 2.0, %v3944_v29  ;;  %v1553_v10 = vmul.f32 0.31830987, %v1427_v14  ;;  %v1153_v29 = vpop.permute.xlu1 %1152 }
 0x3f4   : > { %v3188_v32 = vmul.f32 %v3062_v34, %v2306_v52  ;;  %v2433_v41 = vmul.f32 2.7557319e-06, %v2307_v28  ;;  %v2434_v42 = vmul.f32 2.7557319e-06, %v2308_v26  ;;  %v1554_v18 = vmul.f32 0.31830987, %v1428_v13 }
 0x3f5   : > { %v3313_v46 = vmul.f32 %v3187_v11, %v7707_v38  ;;  %v3819_v23 = vmul.f32 2.0, %v3693_v58  ;;  %v3820_v55 = vmul.f32 2.0, %v3694_v27  ;;  %v7750_v22 = vround.rtne.f32 %v1553_v10  ;;  %v8223_v58 = vld [vmem:[#allocation100_spill] sm:$0xff] }
 0x3f6   : > { %v3314_v1 = vmul.f32 %v3188_v32, %v7711_v39  ;;  %v2559_v44 = vadd.f32 -0.0001984127, %v2433_v41  ;;  %v2560_v35 = vadd.f32 -0.0001984127, %v2434_v42  ;;  %v7753_v19 = vround.rtne.f32 %v1554_v18 }
 0x3f7   : > { %v3439_v4 = vadd.f32 %v3313_v46, %v7707_v38  ;;  %v4195_v0 = vsub.f32 1.0, %v4069_v59  ;;  %v4196_v52 = vsub.f32 1.0, %v4070_v63  ;;  %v1805_v21 = vmul.f32 3.140625, %v7750_v22 }
 0x3f8   : > { %v3440_v37 = vadd.f32 %v3314_v1, %v7711_v39  ;;  %v2685_v25 = vmul.f32 %v2559_v44, %v2307_v28  ;;  %v2686_v7 = vmul.f32 %v2560_v35, %v2308_v26  ;;  %v1806_v5 = vmul.f32 3.140625, %v7753_v19 }
 0x3f9   : > { %v4321_v16 = vmul.f32 %v4195_v0, %v3439_v4  ;;  %v3945_v47 = vsub.f32 %v7720_v9, %v3819_v23  ;;  %v3946_v49 = vsub.f32 %v7722_v60, %v3820_v55  ;;  %v1931_v2 = vsub.f32 %v1427_v14, %v1805_v21  ;;  %v1157_v21 = vpop.permute.xlu0 %1156 }
 0x3fa   : > { %v4322_v38 = vmul.f32 %v4196_v52, %v3440_v37  ;;  %v2811_v56 = vadd.f32 0.008333334, %v2685_v25  ;;  %v2812_v36 = vadd.f32 0.008333334, %v2686_v7  ;;  %v1932_v20 = vsub.f32 %v1428_v13, %v1806_v5 }
 0x3fb   : > { %4447 = vst [vmem:[%s6097_s11 + $0x380] sm:$0xff] %v4321_v16  ;;  %v2057_v8 = vmul.f32 0.0009676536, %v7750_v22  ;;  %v2058_v39 = vmul.f32 0.0009676536, %v7753_v19  ;;  %v3569_v61 = vmul.f32 0.5, %v7750_v22  ;;  %v1303_v60 = vmul.f32 %v5346_v54, %v1153_v29 }
 0x3fc   : > { %v3570_v45 = vmul.f32 0.5, %v7753_v19  ;;  %4448 = vst [vmem:[%s6097_s11 + $0x388] sm:$0xff] %v4322_v38  ;;  %v2937_v40 = vmul.f32 %v2811_v56, %v2307_v28  ;;  %v2938_v9 = vmul.f32 %v2812_v36, %v2308_v26  ;;  %v1304_v31 = vmul.f32 %v5348_v57, %v1153_v29 }
 0x3fd   : > { %v7769_v3 = vsub.f32 %v1931_v2, %v2057_v8  ;;  %v7771_v6 = vsub.f32 %v1932_v20, %v2058_v39  ;;  %v3695_v62 = vfloor.f32 %v3569_v61  ;;  %v1429_v17 = vadd.f32 %v1303_v60, %v8222_v15  ;;  %v8224_v61 = vld [vmem:[#allocation22_spill] sm:$0xff] }
 0x3fe   : > { %v3696_v53 = vfloor.f32 %v3570_v45  ;;  %v3063_v50 = vadd.f32 -0.16666667, %v2937_v40  ;;  %v3064_v12 = vadd.f32 -0.16666667, %v2938_v9  ;;  %v1430_v27 = vadd.f32 %v1304_v31, %v8223_v58  ;;  %v8225_v31 = vld [vmem:[#allocation23_spill] sm:$0xff] }
 0x3ff   : > { %v4071_v30 = vmul.f32 2.0, %v3945_v47  ;;  %v4072_v14 = vmul.f32 2.0, %v3946_v49  ;;  %v2309_v34 = vmul.f32 %v7769_v3, %v7769_v3  ;;  %v2310_v48 = vmul.f32 %v7771_v6, %v7771_v6 }
 0x400   : > { %v3189_v13 = vmul.f32 %v3063_v50, %v2307_v28  ;;  %v3190_v11 = vmul.f32 %v3064_v12, %v2308_v26  ;;  %v1555_v59 = vmul.f32 0.31830987, %v1429_v17  ;;  %v1556_v63 = vmul.f32 0.31830987, %v1430_v27 }
 0x401   : > { %v2435_v10 = vmul.f32 2.7557319e-06, %v2309_v34  ;;  %v2436_v32 = vmul.f32 2.7557319e-06, %v2310_v48  ;;  %v3821_v41 = vmul.f32 2.0, %v3695_v62  ;;  %v3822_v42 = vmul.f32 2.0, %v3696_v53 }
 0x402   : > { %v3315_v18 = vmul.f32 %v3189_v13, %v7738_v51  ;;  %v3316_v46 = vmul.f32 %v3190_v11, %v7740_v24  ;;  %v7781_v23 = vround.rtne.f32 %v1555_v59  ;;  %v7783_v55 = vround.rtne.f32 %v1556_v63 }
 0x403   : > { %v4197_v1 = vsub.f32 1.0, %v4071_v30  ;;  %v4198_v44 = vsub.f32 1.0, %v4072_v14  ;;  %v2561_v35 = vadd.f32 -0.0001984127, %v2435_v10  ;;  %v2562_v4 = vadd.f32 -0.0001984127, %v2436_v32 }
 0x404   : > { %v3441_v28 = vadd.f32 %v3315_v18, %v7738_v51  ;;  %v3442_v26 = vadd.f32 %v3316_v46, %v7740_v24  ;;  %v1807_v0 = vmul.f32 3.140625, %v7781_v23  ;;  %v1808_v52 = vmul.f32 3.140625, %v7783_v55 }
 0x405   : > { %v2687_v37 = vmul.f32 %v2561_v35, %v2309_v34  ;;  %v2688_v25 = vmul.f32 %v2562_v4, %v2310_v48  ;;  %v3947_v7 = vsub.f32 %v7750_v22, %v3821_v41  ;;  %v3948_v5 = vsub.f32 %v7753_v19, %v3822_v42 }
 0x406   : > { %v4323_v16 = vmul.f32 %v4197_v1, %v3441_v28  ;;  %v4324_v47 = vmul.f32 %v4198_v44, %v3442_v26  ;;  %v1933_v49 = vsub.f32 %v1429_v17, %v1807_v0  ;;  %v1934_v2 = vsub.f32 %v1430_v27, %v1808_v52 }
 0x407   : > { %v2813_v51 = vadd.f32 0.008333334, %v2687_v37  ;;  %v2814_v29 = vadd.f32 0.008333334, %v2688_v25  ;;  %v2059_v24 = vmul.f32 0.0009676536, %v7781_v23  ;;  %v1305_v38 = vmul.f32 %v5346_v54, %v1157_v21 }
 0x408   : > { %4449 = vst [vmem:[%s6097_s11 + $0x390] sm:$0xff] %v4323_v16  ;;  %4450 = vst [vmem:[%s6097_s11 + $0x398] sm:$0xff] %v4324_v47  ;;  %v2060_v56 = vmul.f32 0.0009676536, %v7783_v55  ;;  %v3571_v36 = vmul.f32 0.5, %v7781_v23  ;;  %v3572_v22 = vmul.f32 0.5, %v7783_v55  ;;  %v1306_v19 = vmul.f32 %v5348_v57, %v1157_v21 }
 0x409   : > { %v2939_v20 = vmul.f32 %v2813_v51, %v2309_v34  ;;  %v2940_v8 = vmul.f32 %v2814_v29, %v2310_v48  ;;  %v7799_v39 = vsub.f32 %v1933_v49, %v2059_v24  ;;  %v1431_v45 = vadd.f32 %v1305_v38, %v8224_v61 }
 0x40a   : > { %v7802_v40 = vsub.f32 %v1934_v2, %v2060_v56  ;;  %v3697_v9 = vfloor.f32 %v3571_v36  ;;  %v3698_v60 = vfloor.f32 %v3572_v22  ;;  %v1432_v62 = vadd.f32 %v1306_v19, %v8225_v31 }
 0x40b   : > { %v3065_v53 = vadd.f32 -0.16666667, %v2939_v20  ;;  %v3066_v50 = vadd.f32 -0.16666667, %v2940_v8  ;;  %v2311_v12 = vmul.f32 %v7799_v39, %v7799_v39  ;;  %v1557_v15 = vmul.f32 0.31830987, %v1431_v45 }
 0x40c   : > { %v4073_v17 = vmul.f32 2.0, %v3947_v7  ;;  %v4074_v58 = vmul.f32 2.0, %v3948_v5  ;;  %v2312_v27 = vmul.f32 %v7802_v40, %v7802_v40  ;;  %v1558_v30 = vmul.f32 0.31830987, %v1432_v62  ;;  %v1161_v7 = vpop.permute.xlu1 %1160  ;;  %v8226_v8 = vld [vmem:[#allocation103_spill] sm:$0xff] }
 0x40d   : > { %v3191_v14 = vmul.f32 %v3065_v53, %v2309_v34  ;;  %v3192_v13 = vmul.f32 %v3066_v50, %v2310_v48  ;;  %v2437_v11 = vmul.f32 2.7557319e-06, %v2311_v12  ;;  %v7809_v59 = vround.rtne.f32 %v1557_v15 }
 0x40e   : > { %v2438_v63 = vmul.f32 2.7557319e-06, %v2312_v27  ;;  %v3823_v10 = vmul.f32 2.0, %v3697_v9  ;;  %v3824_v32 = vmul.f32 2.0, %v3698_v60  ;;  %v7811_v41 = vround.rtne.f32 %v1558_v30 }
 0x40f   : > { %v3317_v42 = vmul.f32 %v3191_v14, %v7769_v3  ;;  %v3318_v18 = vmul.f32 %v3192_v13, %v7771_v6  ;;  %v2563_v46 = vadd.f32 -0.0001984127, %v2437_v11  ;;  %v1809_v1 = vmul.f32 3.140625, %v7809_v59 }
 0x410   : > { %v4199_v44 = vsub.f32 1.0, %v4073_v17  ;;  %v4200_v35 = vsub.f32 1.0, %v4074_v58  ;;  %v2564_v4 = vadd.f32 -0.0001984127, %v2438_v63  ;;  %v1810_v34 = vmul.f32 3.140625, %v7811_v41 }
 0x411   : > { %v3443_v48 = vadd.f32 %v3317_v42, %v7769_v3  ;;  %v3444_v28 = vadd.f32 %v3318_v18, %v7771_v6  ;;  %v2689_v26 = vmul.f32 %v2563_v46, %v2311_v12  ;;  %v1935_v0 = vsub.f32 %v1431_v45, %v1809_v1  ;;  %v8227_v45 = vld [vmem:[#allocation104_spill] sm:$0xff] }
 0x412   : > { %v2690_v52 = vmul.f32 %v2564_v4, %v2312_v27  ;;  %v3949_v21 = vsub.f32 %v7781_v23, %v3823_v10  ;;  %v3950_v37 = vsub.f32 %v7783_v55, %v3824_v32  ;;  %v1936_v25 = vsub.f32 %v1432_v62, %v1810_v34 }
 0x413   : > { %v4325_v5 = vmul.f32 %v4199_v44, %v3443_v48  ;;  %v4326_v16 = vmul.f32 %v4200_v35, %v3444_v28  ;;  %v2815_v47 = vadd.f32 0.008333334, %v2689_v26  ;;  %v2061_v49 = vmul.f32 0.0009676536, %v7809_v59 }
 0x414   : > { %v2816_v2 = vadd.f32 0.008333334, %v2690_v52  ;;  %v2062_v3 = vmul.f32 0.0009676536, %v7811_v41  ;;  %v3573_v6 = vmul.f32 0.5, %v7809_v59  ;;  %v3574_v51 = vmul.f32 0.5, %v7811_v41 }
 0x415   : > { %4451 = vst [vmem:[%s6097_s11 + $0x3a0] sm:$0xff] %v4325_v5  ;;  %4452 = vst [vmem:[%s6097_s11 + $0x3a8] sm:$0xff] %v4326_v16  ;;  %v2941_v29 = vmul.f32 %v2815_v47, %v2311_v12  ;;  %v7827_v23 = vsub.f32 %v1935_v0, %v2061_v49  ;;  %v1307_v55 = vmul.f32 %v5346_v54, %v1161_v7  ;;  %v4075_v31 = vmul.f32 2.0, %v3949_v21  ;;  %v1165_v0 = vpop.permute.xlu0 %1164 }
 0x416   : > { %v1308_v24 = vmul.f32 %v5348_v57, %v1161_v7  ;;  %v2942_v38 = vmul.f32 %v2816_v2, %v2312_v27  ;;  %v7831_v56 = vsub.f32 %v1936_v25, %v2062_v3  ;;  %v3699_v36 = vfloor.f32 %v3573_v6 }
 0x417   : > { %v3700_v22 = vfloor.f32 %v3574_v51  ;;  %v3067_v19 = vadd.f32 -0.16666667, %v2941_v29  ;;  %v2313_v20 = vmul.f32 %v7827_v23, %v7827_v23  ;;  %v1433_v61 = vadd.f32 %v1307_v55, %v8226_v8 }
 0x418   : > { %v1434_v9 = vadd.f32 %v1308_v24, %v8227_v45  ;;  %v3068_v60 = vadd.f32 -0.16666667, %v2942_v38  ;;  %v4076_v62 = vmul.f32 2.0, %v3950_v37  ;;  %v2314_v53 = vmul.f32 %v7831_v56, %v7831_v56 }
 0x419   : > { %v3193_v50 = vmul.f32 %v3067_v19, %v2311_v12  ;;  %v2439_v15 = vmul.f32 2.7557319e-06, %v2313_v20  ;;  %v1559_v17 = vmul.f32 0.31830987, %v1433_v61  ;;  %v3825_v13 = vmul.f32 2.0, %v3699_v36 }
 0x41a   : > { %v1560_v58 = vmul.f32 0.31830987, %v1434_v9  ;;  %v3194_v30 = vmul.f32 %v3068_v60, %v2312_v27  ;;  %v2440_v14 = vmul.f32 2.7557319e-06, %v2314_v53  ;;  %v3826_v11 = vmul.f32 2.0, %v3700_v22 }
 0x41b   : > { %v3319_v63 = vmul.f32 %v3193_v50, %v7799_v39  ;;  %v2565_v10 = vadd.f32 -0.0001984127, %v2439_v15  ;;  %v7840_v32 = vround.rtne.f32 %v1559_v17  ;;  %v4201_v46 = vsub.f32 1.0, %v4075_v31 }
 0x41c   : > { %v7842_v42 = vround.rtne.f32 %v1560_v58  ;;  %v3320_v18 = vmul.f32 %v3194_v30, %v7802_v40  ;;  %v4202_v1 = vsub.f32 1.0, %v4076_v62  ;;  %v2566_v44 = vadd.f32 -0.0001984127, %v2440_v14 }
 0x41d   : > { %v3445_v12 = vadd.f32 %v3319_v63, %v7799_v39  ;;  %v2691_v35 = vmul.f32 %v2565_v10, %v2313_v20  ;;  %v1811_v27 = vmul.f32 3.140625, %v7840_v32  ;;  %v3951_v28 = vsub.f32 %v7809_v59, %v3825_v13 }
 0x41e   : > { %v1812_v4 = vmul.f32 3.140625, %v7842_v42  ;;  %v3446_v34 = vadd.f32 %v3320_v18, %v7802_v40  ;;  %v2692_v48 = vmul.f32 %v2566_v44, %v2314_v53  ;;  %v3952_v26 = vsub.f32 %v7811_v41, %v3826_v11 }
 0x41f   : > { %v4327_v52 = vmul.f32 %v4201_v46, %v3445_v12  ;;  %v2817_v21 = vadd.f32 0.008333334, %v2691_v35  ;;  %v1937_v37 = vsub.f32 %v1433_v61, %v1811_v27  ;;  %v2063_v5 = vmul.f32 0.0009676536, %v7840_v32 }
 0x420   : > { %v1938_v25 = vsub.f32 %v1434_v9, %v1812_v4  ;;  %v4328_v39 = vmul.f32 %v4202_v1, %v3446_v34  ;;  %v2818_v7 = vadd.f32 0.008333334, %v2692_v48  ;;  %v2064_v16 = vmul.f32 0.0009676536, %v7842_v42 }
 0x421   : > { %4453 = vst [vmem:[%s6097_s11 + $0x3b0] sm:$0xff] %v4327_v52  ;;  %v2943_v47 = vmul.f32 %v2817_v21, %v2313_v20  ;;  %v3575_v40 = vmul.f32 0.5, %v7840_v32  ;;  %v3576_v59 = vmul.f32 0.5, %v7842_v42  ;;  %v1309_v49 = vmul.f32 %v5346_v54, %v1165_v0 }
 0x422   : > { %4454 = vst [vmem:[%s6097_s11 + $0x3b8] sm:$0xff] %v4328_v39  ;;  %v2944_v41 = vmul.f32 %v2818_v7, %v2314_v53  ;;  %v7858_v2 = vsub.f32 %v1937_v37, %v2063_v5  ;;  %v7860_v3 = vsub.f32 %v1938_v25, %v2064_v16  ;;  %v1310_v6 = vmul.f32 %v5348_v57, %v1165_v0 }
 0x423   : > { %v3069_v51 = vadd.f32 -0.16666667, %v2943_v47  ;;  %v4077_v29 = vmul.f32 2.0, %v3951_v28  ;;  %v4078_v55 = vmul.f32 2.0, %v3952_v26  ;;  %v1435_v24 = vadd.f32 %v1309_v49, %v6224_v43 }
 0x424   : > { %v3070_v38 = vadd.f32 -0.16666667, %v2944_v41  ;;  %v2315_v36 = vmul.f32 %v7858_v2, %v7858_v2  ;;  %v2316_v54 = vmul.f32 %v7860_v3, %v7860_v3  ;;  %v1436_v22 = vadd.f32 %v1310_v6, %v6307_v33 }
 0x425   : > { %v3195_v19 = vmul.f32 %v3069_v51, %v2313_v20  ;;  %v3701_v8 = vfloor.f32 %v3575_v40  ;;  %v3702_v61 = vfloor.f32 %v3576_v59  ;;  %v1561_v45 = vmul.f32 0.31830987, %v1435_v24 }
 0x426   : > { %v3196_v9 = vmul.f32 %v3070_v38, %v2314_v53  ;;  %v2441_v57 = vmul.f32 2.7557319e-06, %v2315_v36  ;;  %v2442_v60 = vmul.f32 2.7557319e-06, %v2316_v54  ;;  %v1562_v31 = vmul.f32 0.31830987, %v1436_v22 }
 0x427   : > { %v3321_v62 = vmul.f32 %v3195_v19, %v7827_v23  ;;  %v4203_v43 = vsub.f32 1.0, %v4077_v29  ;;  %v4204_v50 = vsub.f32 1.0, %v4078_v55  ;;  %v7870_v15 = vround.rtne.f32 %v1561_v45 }
 0x428   : > { %v3322_v17 = vmul.f32 %v3196_v9, %v7831_v56  ;;  %v2567_v58 = vadd.f32 -0.0001984127, %v2441_v57  ;;  %v2568_v30 = vadd.f32 -0.0001984127, %v2442_v60  ;;  %v7873_v33 = vround.rtne.f32 %v1562_v31 }
 0x429   : > { %v3447_v20 = vadd.f32 %v3321_v62, %v7827_v23  ;;  %v3827_v14 = vmul.f32 2.0, %v3701_v8  ;;  %v3828_v53 = vmul.f32 2.0, %v3702_v61  ;;  %v1813_v13 = vmul.f32 3.140625, %v7870_v15 }
 0x42a   : > { %v3448_v11 = vadd.f32 %v3322_v17, %v7831_v56  ;;  %v2693_v63 = vmul.f32 %v2567_v58, %v2315_v36  ;;  %v2694_v10 = vmul.f32 %v2568_v30, %v2316_v54  ;;  %v1814_v18 = vmul.f32 3.140625, %v7873_v33 }
 0x42b   : > { %v4329_v46 = vmul.f32 %v4203_v43, %v3447_v20  ;;  %v1939_v1 = vsub.f32 %v1435_v24, %v1813_v13  ;;  %v2065_v23 = vmul.f32 0.0009676536, %v7870_v15  ;;  %v2066_v4 = vmul.f32 0.0009676536, %v7873_v33 }
 0x42c   : > { %v4330_v44 = vmul.f32 %v4204_v50, %v3448_v11  ;;  %v2819_v12 = vadd.f32 0.008333334, %v2693_v63  ;;  %v2820_v35 = vadd.f32 0.008333334, %v2694_v10  ;;  %v1940_v27 = vsub.f32 %v1436_v22, %v1814_v18 }
 0x42d   : > { %4455 = vst [vmem:[%s6097_s11 + $0x3c0] sm:$0xff] %v4329_v46  ;;  %v3953_v56 = vsub.f32 %v7840_v32, %v3827_v14  ;;  %v3954_v28 = vsub.f32 %v7842_v42, %v3828_v53  ;;  %v2191_v26 = vsub.f32 %v1939_v1, %v2065_v23  ;;  %v3577_v52 = vmul.f32 0.5, %v7870_v15 }
 0x42e   : > { %4456 = vst [vmem:[%s6097_s11 + $0x3c8] sm:$0xff] %v4330_v44  ;;  %v2945_v34 = vmul.f32 %v2819_v12, %v2315_v36  ;;  %v2946_v48 = vmul.f32 %v2820_v35, %v2316_v54  ;;  %v2192_v0 = vsub.f32 %v1940_v27, %v2066_v4  ;;  %v3578_v21 = vmul.f32 0.5, %v7873_v33 }
 0x42f   : > { %v2317_v39 = vmul.f32 %v2191_v26, %v2191_v26  ;;  %v4079_v47 = vmul.f32 2.0, %v3953_v56  ;;  %v4080_v40 = vmul.f32 2.0, %v3954_v28  ;;  %v3703_v41 = vfloor.f32 %v3577_v52 }
 0x430   : > { %v3071_v37 = vadd.f32 -0.16666667, %v2945_v34  ;;  %v3072_v25 = vadd.f32 -0.16666667, %v2946_v48  ;;  %v2318_v7 = vmul.f32 %v2192_v0, %v2192_v0  ;;  %v3704_v32 = vfloor.f32 %v3578_v21 }
 0x431   : > { %v2443_v59 = vmul.f32 2.7557319e-06, %v2317_v39  ;;  %v4205_v38 = vsub.f32 1.0, %v4079_v47  ;;  %v3829_v19 = vmul.f32 2.0, %v3703_v41 }
 0x432   : > { %v3197_v5 = vmul.f32 %v3071_v37, %v2315_v36  ;;  %v3198_v16 = vmul.f32 %v3072_v25, %v2316_v54  ;;  %v2444_v49 = vmul.f32 2.7557319e-06, %v2318_v7  ;;  %v4206_v36 = vsub.f32 1.0, %v4080_v40 }
 0x433   : > { %v2569_v51 = vadd.f32 -0.0001984127, %v2443_v59  ;;  %v3830_v8 = vmul.f32 2.0, %v3704_v32  ;;  %v3955_v62 = vsub.f32 %v7870_v15, %v3829_v19 }
 0x434   : > { %v3323_v42 = vmul.f32 %v3197_v5, %v7858_v2  ;;  %v3324_v6 = vmul.f32 %v3198_v16, %v7860_v3  ;;  %v2570_v29 = vadd.f32 -0.0001984127, %v2444_v49 }
 0x435   : > { %v2695_v54 = vmul.f32 %v2569_v51, %v2317_v39  ;;  %v4081_v58 = vmul.f32 2.0, %v3955_v62 }
 0x436   : > { %v3449_v55 = vadd.f32 %v3323_v42, %v7858_v2  ;;  %v3450_v24 = vadd.f32 %v3324_v6, %v7860_v3  ;;  %v2696_v22 = vmul.f32 %v2570_v29, %v2318_v7  ;;  %v3956_v2 = vsub.f32 %v7873_v33, %v3830_v8 }
 0x437   : > { %v2821_v9 = vadd.f32 0.008333334, %v2695_v54  ;;  %v4207_v11 = vsub.f32 1.0, %v4081_v58 }
 0x438   : > { %v4331_v61 = vmul.f32 %v4205_v38, %v3449_v55  ;;  %v4332_v45 = vmul.f32 %v4206_v36, %v3450_v24  ;;  %v2822_v57 = vadd.f32 0.008333334, %v2696_v22  ;;  %v4082_v30 = vmul.f32 2.0, %v3956_v2 }
 0x439   : > { %v2947_v60 = vmul.f32 %v2821_v9, %v2317_v39 }
 0x43a   : > { %4457 = vst [vmem:[%s6097_s11 + $0x3d0] sm:$0xff] %v4331_v61  ;;  %4458 = vst [vmem:[%s6097_s11 + $0x3d8] sm:$0xff] %v4332_v45  ;;  %v2948_v31 = vmul.f32 %v2822_v57, %v2318_v7  ;;  %v4208_v63 = vsub.f32 1.0, %v4082_v30 }
 0x43b   : > { %v3073_v3 = vadd.f32 -0.16666667, %v2947_v60 }
 0x43c   : > { %v3074_v43 = vadd.f32 -0.16666667, %v2948_v31 }
 0x43d   : > { %v3199_v50 = vmul.f32 %v3073_v3, %v2317_v39 }
 0x43e   : > { %v3200_v17 = vmul.f32 %v3074_v43, %v2318_v7 }
 0x43f   : > { %v3325_v20 = vmul.f32 %v3199_v50, %v2191_v26 }
 0x440   : > { %v3326_v14 = vmul.f32 %v3200_v17, %v2192_v0  ;;  %4468 = sbr.rel (!%p4940_p4) target bundleno = 1123 (0x463), region = 36 }
 0x441   : > { %v3451_v53 = vadd.f32 %v3325_v20, %v2191_v26 }
 0x442   : > { %v3452_v13 = vadd.f32 %v3326_v14, %v2192_v0 }
 0x443   : > { %v4333_v10 = vmul.f32 %v4207_v11, %v3451_v53 }
 0x444   : > { %v4334_v18 = vmul.f32 %v4208_v63, %v3452_v13 }
 0x445   : > { %4459 = vst [vmem:[%s6097_s11 + $0x3e0] sm:$0xff] %v4333_v10 }
 0x446   : > { %4460 = vst [vmem:[%s6097_s11 + $0x3e8] sm:$0xff] %v4334_v18 }
 0x447   : > { %s8236_s19 = smov (!%p4472_p12, %s4471_s19), 63 }
 0x448   : > { %s7904_s21 = sshll.u32 %s8236_s19, 8 }
 0x449   : > { %s4477_s23 = ssub.s32 16128, %s7904_s21 }
 0x44a   : > { %4478 = vsyncadd %s7899_s18, %s4477_s23  ;;  %p4595_p13 = scmp.ne.s32.totalorder %s7904_s21, 0  ;;  %s4605_s27 = smul.u32 16128, %s4865_s15 }
 0x44b   : > { %s4485_s28 = sshll.u32 %s6097_s11, 4  ;;  %s4877_s4 = smov [#allocation2]   ;;  %s7916_s28 = int_to_ptr.vmem [resolvable:$true] %s4485_s28 }
 0x44c   : > { %s7914_s30 = scalar_lea.hbm %s7968_s3, %s4605_s27  ;;  %s4795_s26 = scalar_lea.vmem %s7916_s28, %s7904_s21 }
 0x44d   : > { %p4796_p0 = scmp.ne.s32.totalorder %s7916_s28, %s4795_s26  ;;  %s4799_s5 = sshll.u32 %s4877_s4, 4  ;;  %s4800_s5 = int_to_ptr.vmem [resolvable:$false] %s4799_s5 }
 0x44e   : > { %s4801_s15 = scalar_lea.vmem %s4800_s5, 32256  ;;  %p4802_p3 = scmp.lt.s32.totalorder %s7916_s28, %s4800_s5 }
 0x44f   : > { %p4797_p1 = pnand %p4796_p0, %p4595_p13  ;;  %p4803_p4 = scmp.lt.s32.totalorder %s4801_s15, %s4795_s26 }
 0x451   : > { %p4798_p2 = pneg %p4797_p1  ;;  %p4804_p5 = por %p4803_p4, %p4802_p3 }
 0x453   : > { %p4805_p6 = pnand %p4804_p5, %p4798_p2 }
 0x455   : > { %4808 = shalt.err (!%p4805_p6)
}
 0x456   : > { %s4809_s6 = scalar_lea.hbm %s7914_s30, %s7904_s21  ;;  %s4813_s9 = scalar_lea.hbm %s7968_s3, 32000 }
 0x457   : > { %p4810_p7 = scmp.ne.s32.totalorder %s7914_s30, %s4809_s6  ;;  %p4814_p11 = scmp.lt.u32.totalorder %s7914_s30, %s7968_s3 }
 0x458   : > { %p4815_p12 = scmp.lt.u32.totalorder %s4813_s9, %s4809_s6  ;;  %p4817_p1 = scmp.lt.u32.totalorder %s4809_s6, %s7914_s30 }
 0x459   : > { %p4811_p9 = pnand %p4810_p7, %p4595_p13 }
 0x45a   : > { %p4816_p0 = por %p4815_p12, %p4814_p11 }
 0x45b   : > { %p4812_p10 = pneg %p4811_p9 }
 0x45c   : > { %p4818_p2 = por %p4817_p1, %p4816_p0 }
 0x45e   : > { %p4819_p3 = pnand %p4818_p2, %p4812_p10 }
 0x460   : > { %4822 = shalt.err (!%p4819_p3)
}
 0x461   : > { %s4878_s19 = smov 256   ;;  %s4879_s23 = smov 16  }
 0x462   : > { %4491 = dma.vmem_to_hbm [thread:$0]  (%p4595_p13), %s7916_s28, %s7904_s21, %s7914_s30, %s7899_s18, %s4878_s19, %s4878_s19, %s4879_s23  }
 0x463 PF: > { %p4738_p4 = scmp.ge.s32.totalorder %s4873_s17, 2  ;;  %s4500_s27 = sand.u32 1, %s4853_s12  }
 0x464   : > { %s4501_s22 = scalar_lea.sflag [#allocation3], %s4500_s27 }
 0x465   : > { %p4735_p5 = pnand %p4738_p4, %p4947_p8 }
 0x467   : > { %4848 = dma.done.wait (!%p4735_p5), %s4501_s22, 16128  }
 0x468   : > { %4850 = vsyncadd (!%p4735_p5), %s4501_s22, 4294951168  ;;  %s16_s17 = sadd.s32 1, %s4873_s17   ;;  %s8228_s12 = smov %s4857_s13 }
 0x469   : > { %p13_p6 = scmp.ge.s32.totalorder %s16_s17, 4   ;;  %s8229_s13 = smov %s4861_s14 }
 0x46a   : > { %s8230_s14 = smov %s4953_s25  ;;  %s8231_s15 = smov %s4869_s16 }
 0x46b   : > { %s8232_s16 = smov %s8234_s20  ;;  %15 = sbr.rel (!%p13_p6) target bundleno = 4 (0x4), region = 73 }
 0x472   :  { %4506 = vsyncpa [#allocation3], 1 }
 0x473   :  { %4508 = vsyncpa [#allocation3 + $0x1], 1 }

</bundles_post_ra>
